<compile_context>
chip_gen: v5e
topology: v5e:2x2
jax: 0.10.0
libtpu: 0.0.40
codegen_flags: <defaults>
</compile_context>

<pallas_src>
import jax
import jax.numpy as jnp
import numpy as np
from jax import lax
from jax.experimental import pallas as pl
from jax.experimental.pallas import tpu as pltpu


def net_kernel(patches_ref, w_ref, out_ref):
    f32 = jnp.float32

    # ---- conv1 (5x5 stride 5) + bias (ones-column fold) + ReLU ----------------
    # patches rows: q*32 + (ph*5+pw), q = maxpool1 quadrant (dh*2+dw)
    # slab cols 0:10, rows = ic*25+kh*5+kw, row 75 = bias, rows 76:128 = 0.
    y1 = jnp.maximum(
        jnp.dot(patches_ref[...], w_ref[0:128, 0:10],
                preferred_element_type=f32), 0.0)                          # (128,10)

    # ---- maxpool1 2x2 stride 2: max over the 4 quadrant slabs -----------------
    p1 = jnp.maximum(jnp.maximum(y1[0:32, :], y1[32:64, :]),
                     jnp.maximum(y1[64:96, :], y1[96:128, :]))             # (32,10)

    # ---- conv2 (2x2 stride 1): 4 accumulated matmuls on shifted views ---------
    # 5-wide frame row r = i*5 + j; tap offsets {0,1,5,6} <-> (kh,kw) in {0,1}^2.
    acc = jnp.dot(p1[0:25, :], w_ref[0:10, 128:148], preferred_element_type=f32)
    acc = acc + jnp.dot(p1[1:26, :], w_ref[16:26, 128:148], preferred_element_type=f32)
    acc = acc + jnp.dot(p1[5:30, :], w_ref[32:42, 128:148], preferred_element_type=f32)
    acc = acc + jnp.dot(p1[6:31, :], w_ref[48:58, 128:148], preferred_element_type=f32)
    y2 = jnp.maximum(acc + w_ref[64:65, 128:148], 0.0)                     # (25,20)

    # ---- maxpool2 3x3 stride 1 over the valid 4x4 grid ------------------------
    a = jnp.maximum(jnp.maximum(y2[0:23, :], y2[1:24, :]), y2[2:25, :])    # width-3
    b = jnp.maximum(jnp.maximum(a[0:13, :], a[5:18, :]), a[10:23, :])      # height-3

    # ---- folded (lin2 . lin1) tail: 4 accumulated (1,20)@(20,128) matmuls -----
    # pooled 2x2 outputs sit at frame rows {0,1,5,6}; the per-position folded
    # (20,2) weights are stored 128 lanes wide (lanes 2:128 zero) so the dots
    # directly yield a lane-dense (1,128) logits row.
    h2 = jnp.dot(b[0:1, :], w_ref[0:20, 256:384], preferred_element_type=f32)
    h2 = h2 + jnp.dot(b[1:2, :], w_ref[24:44, 256:384], preferred_element_type=f32)
    h2 = h2 + jnp.dot(b[5:6, :], w_ref[48:68, 256:384], preferred_element_type=f32)
    h2 = h2 + jnp.dot(b[6:7, :], w_ref[72:92, 256:384], preferred_element_type=f32)
    h2 = h2 + w_ref[96:97, 256:384]                                        # (1,128)

    # ---- exp(log_softmax(dim=0)) == softmax over the 2 logits (lanes 0:2) -----
    lane = lax.broadcasted_iota(jnp.int32, (1, 128), 1)
    logits = jnp.where(lane < 2, h2, -1e30)
    m = jnp.max(logits, axis=-1, keepdims=True)
    e = jnp.exp(logits - m)
    probs = e / jnp.sum(e, axis=-1, keepdims=True)
    out_ref[...] = jnp.broadcast_to(probs, (8, 128))                       # lane-dense


def prepare_net_params(params):
    """One-time host-side re-layout of the PyTorch parameters into a single
    lane-aligned f32 slab (128 x 384).  Every block starts at lane col 0/128/256
    and an 8-aligned row, so the kernel's static slices need no relayout:

      cols   0: 10  rows 0:76   conv1 im2col weight (rows ic*25+kh*5+kw, row 75 = bias)
      cols 128:148  rows 0:58   conv2 weight, 4 (10,20) bands at rows 0/16/32/48
                    row  64     conv2 bias
      cols 256:384  rows 0:92   folded lin2∘lin1 weights, 4 (20,128) bands at
                                rows 0/24/48/72 (only lanes 0:2 non-zero)
                    row  96     folded bias (lanes 0:2)
    """
    w1, b1, w2, b2, wl1, bl1, wl2, bl2 = [np.asarray(p, np.float64) for p in params]
    slab = np.zeros((128, 384), np.float64)

    # conv1: rows = ic*25 + kh*5 + kw; row 75 carries the bias (ones-column fold)
    slab[0:75, 0:10] = w1.reshape(10, 75).T
    slab[75, 0:10] = b1

    # conv2: band k = kh*2+kw -> rows 16k:16k+10, entries [ic, oc]
    w2_t = np.transpose(w2, (2, 3, 1, 0))            # (kh, kw, ic, oc)
    for kh in range(2):
        for kw in range(2):
            k = kh * 2 + kw
            slab[16 * k:16 * k + 10, 128:148] = w2_t[kh, kw]
    slab[64, 128:148] = b2

    # folded linear tail: lin2(lin1(x)) == x @ C.T + d  (exact -- no nonlinearity
    # between lin1 and lin2 in Net.forward).  torch flat index = c*4 + (h*2+w).
    C = wl2 @ wl1                                    # (2, 80)
    d = wl2 @ bl1 + bl2                              # (2,)
    Cb = C.reshape(2, 20, 4)                         # [out_j, c, s], s = h*2+w
    for s in range(4):
        slab[24 * s:24 * s + 20, 256:258] = Cb[:, :, s].T
    slab[96, 256:258] = d
    return jnp.asarray(slab, jnp.float32)


@jax.jit
def net_forward_pallas(x, w_slab):
    """x: (1,3,50,50) float32 NCHW; w_slab: prepare_net_params(params).
    Returns (2,) probabilities (exp(log_softmax))."""
    xs = x[0]                                                # (3,50,50)
    # conv1 im2col, quadrant-grouped rows: row = (dh*2+dw)*32 + (ph*5+pw)
    xr = xs.reshape(3, 5, 2, 5, 5, 2, 5)                     # [ic,ph,dh,kh,pw,dw,kw]
    pt = jnp.transpose(xr, (2, 5, 1, 4, 0, 3, 6)).reshape(4, 25, 75)
    pt = jnp.pad(pt, ((0, 0), (0, 7), (0, 53)))              # (4,32,128)
    pt = pt.at[:, :25, 75].set(1.0)                          # ones column -> bias fold
    patches = pt.reshape(128, 128)

    out = pl.pallas_call(
        net_kernel,
        out_shape=jax.ShapeDtypeStruct((8, 128), jnp.float32),
        in_specs=[pl.BlockSpec((128, 128), lambda: (0, 0)),
                  pl.BlockSpec((128, 384), lambda: (0, 0))],
        out_specs=pl.BlockSpec((8, 128), lambda: (0, 0)),
        compiler_params=pltpu.CompilerParams(
            # let the im2col producer fuse into the pallas_call input (patches);
            # the weight slab is a plain materialized constant-like array.
            allow_input_fusion=[True, False]),
    )(patches, w_slab)
    return out[0, :2]


def net_forward_reference(x, params):
    """Pure-JAX/XLA reference of the PyTorch forward (for verification)."""
    w1, b1, w2, b2, wl1, bl1, wl2, bl2 = params
    dn = ('NCHW', 'OIHW', 'NCHW')
    hp = jax.lax.Precision.HIGHEST
    y = jax.lax.conv_general_dilated(x, w1, (5, 5), 'VALID',
                                     dimension_numbers=dn, precision=hp)
    y = jax.nn.relu(y + b1.reshape(1, 10, 1, 1))
    y = jax.lax.reduce_window(y, -jnp.inf, jax.lax.max,
                              (1, 1, 2, 2), (1, 1, 2, 2), 'VALID')
    y = jax.lax.conv_general_dilated(y, w2, (1, 1), 'VALID',
                                     dimension_numbers=dn, precision=hp)
    y = jax.nn.relu(y + b2.reshape(1, 20, 1, 1))
    y = jax.lax.reduce_window(y, -jnp.inf, jax.lax.max,
                              (1, 1, 3, 3), (1, 1, 1, 1), 'VALID')
    flat = y.reshape(-1)                    # torch.flatten order: (n, c, h, w)
    h = flat @ wl1.T + bl1
    h = h @ wl2.T + bl2
    return jax.nn.softmax(h)                # exp(log_softmax(dim=0)) on a (2,) vector


if __name__ == "__main__":
    key = jax.random.PRNGKey(0)
    ks = jax.random.split(key, 9)
    u = lambda k, shape, s: jax.random.uniform(k, shape, jnp.float32, -s, s)

    # deterministic synthetic parameters (shapes from Net.__init__)
    w1 = u(ks[0], (10, 3, 5, 5), 0.1)
    b1 = u(ks[1], (10,), 0.1)
    w2 = u(ks[2], (20, 10, 2, 2), 0.1)
    b2 = u(ks[3], (20,), 0.1)
    wl1 = u(ks[4], (150, 80), 0.1)
    bl1 = u(ks[5], (150,), 0.1)
    wl2 = u(ks[6], (2, 150), 0.1)
    bl2 = u(ks[7], (2,), 0.1)
    params = (w1, b1, w2, b2, wl1, bl1, wl2, bl2)

    # input shape implied by the forward pass (flatten -> 2*2*20 = 80 requires
    # batch=1 and 50x50 spatial with these convs/pools)
    x = jax.random.normal(ks[8], (1, 3, 50, 50), jnp.float32)

    w_slab = jax.block_until_ready(prepare_net_params(params))   # one-time prep

    out = jax.block_until_ready(net_forward_pallas(x, w_slab))
    ref = jax.block_until_ready(net_forward_reference(x, params))

    assert out.shape == (2,)
    np.testing.assert_allclose(np.asarray(out), np.asarray(ref),
                               rtol=1e-3, atol=1e-4)
    print("KERNEL_OK")
</pallas_src>

<mosaic_0001>
module attributes {stable_mosaic.version = 11 : i64} {
  func.func @net_kernel(%arg0: memref<128x128xf32, #tpu.memory_space<vmem>>, %arg1: memref<128x384xf32, #tpu.memory_space<vmem>>, %arg2: memref<8x128xf32, #tpu.memory_space<vmem>>) attributes {dimension_semantics = [], scalar_prefetch = 0 : i64, scratch_operands = 0 : i64, tpu.core_type = #tpu.core_type<tc>} {
    %c0 = arith.constant 0 : index
    %c0_0 = arith.constant 0 : index
    %0 = vector.load %arg0[%c0, %c0_0] : memref<128x128xf32, #tpu.memory_space<vmem>>, vector<128x128xf32>
    %c0_1 = arith.constant 0 : index
    %c0_2 = arith.constant 0 : index
    %1 = vector.load %arg1[%c0_1, %c0_2] : memref<128x384xf32, #tpu.memory_space<vmem>>, vector<128x10xf32>
    %cst = arith.constant dense<0.000000e+00> : vector<128x10xf32>
    %2 = tpu.matmul %0, %1, %cst {dimension_numbers = #tpu.dot_dimension_numbers<[1], [0], [0], [1], [0, 0, 1, 1], [], []>} : vector<128x128xf32>, vector<128x10xf32>, vector<128x10xf32> -> vector<128x10xf32>
    %cst_3 = arith.constant 0.000000e+00 : f32
    %3 = vector.broadcast %cst_3 : f32 to vector<128x10xf32>
    %4 = arith.maximumf %2, %3 : vector<128x10xf32>
    %5 = vector.extract_strided_slice %4 {offsets = [0, 0], sizes = [32, 10], strides = [1, 1]} : vector<128x10xf32> to vector<32x10xf32>
    %6 = vector.extract_strided_slice %4 {offsets = [32, 0], sizes = [32, 10], strides = [1, 1]} : vector<128x10xf32> to vector<32x10xf32>
    %7 = arith.maximumf %5, %6 : vector<32x10xf32>
    %8 = vector.extract_strided_slice %4 {offsets = [64, 0], sizes = [32, 10], strides = [1, 1]} : vector<128x10xf32> to vector<32x10xf32>
    %9 = vector.extract_strided_slice %4 {offsets = [96, 0], sizes = [32, 10], strides = [1, 1]} : vector<128x10xf32> to vector<32x10xf32>
    %10 = arith.maximumf %8, %9 : vector<32x10xf32>
    %11 = arith.maximumf %7, %10 : vector<32x10xf32>
    %12 = vector.extract_strided_slice %11 {offsets = [0, 0], sizes = [25, 10], strides = [1, 1]} : vector<32x10xf32> to vector<25x10xf32>
    %c0_4 = arith.constant 0 : index
    %c128 = arith.constant 128 : index
    %13 = vector.load %arg1[%c0_4, %c128] : memref<128x384xf32, #tpu.memory_space<vmem>>, vector<10x20xf32>
    %cst_5 = arith.constant dense<0.000000e+00> : vector<25x20xf32>
    %14 = tpu.matmul %12, %13, %cst_5 {dimension_numbers = #tpu.dot_dimension_numbers<[1], [0], [0], [1], [0, 0, 1, 1], [], []>} : vector<25x10xf32>, vector<10x20xf32>, vector<25x20xf32> -> vector<25x20xf32>
    %15 = vector.extract_strided_slice %11 {offsets = [1, 0], sizes = [25, 10], strides = [1, 1]} : vector<32x10xf32> to vector<25x10xf32>
    %c16 = arith.constant 16 : index
    %c128_6 = arith.constant 128 : index
    %16 = vector.load %arg1[%c16, %c128_6] : memref<128x384xf32, #tpu.memory_space<vmem>>, vector<10x20xf32>
    %cst_7 = arith.constant dense<0.000000e+00> : vector<25x20xf32>
    %17 = tpu.matmul %15, %16, %cst_7 {dimension_numbers = #tpu.dot_dimension_numbers<[1], [0], [0], [1], [0, 0, 1, 1], [], []>} : vector<25x10xf32>, vector<10x20xf32>, vector<25x20xf32> -> vector<25x20xf32>
    %18 = arith.addf %14, %17 : vector<25x20xf32>
    %19 = vector.extract_strided_slice %11 {offsets = [5, 0], sizes = [25, 10], strides = [1, 1]} : vector<32x10xf32> to vector<25x10xf32>
    %c32 = arith.constant 32 : index
    %c128_8 = arith.constant 128 : index
    %20 = vector.load %arg1[%c32, %c128_8] : memref<128x384xf32, #tpu.memory_space<vmem>>, vector<10x20xf32>
    %cst_9 = arith.constant dense<0.000000e+00> : vector<25x20xf32>
    %21 = tpu.matmul %19, %20, %cst_9 {dimension_numbers = #tpu.dot_dimension_numbers<[1], [0], [0], [1], [0, 0, 1, 1], [], []>} : vector<25x10xf32>, vector<10x20xf32>, vector<25x20xf32> -> vector<25x20xf32>
    %22 = arith.addf %18, %21 : vector<25x20xf32>
    %23 = vector.extract_strided_slice %11 {offsets = [6, 0], sizes = [25, 10], strides = [1, 1]} : vector<32x10xf32> to vector<25x10xf32>
    %c48 = arith.constant 48 : index
    %c128_10 = arith.constant 128 : index
    %24 = vector.load %arg1[%c48, %c128_10] : memref<128x384xf32, #tpu.memory_space<vmem>>, vector<10x20xf32>
    %cst_11 = arith.constant dense<0.000000e+00> : vector<25x20xf32>
    %25 = tpu.matmul %23, %24, %cst_11 {dimension_numbers = #tpu.dot_dimension_numbers<[1], [0], [0], [1], [0, 0, 1, 1], [], []>} : vector<25x10xf32>, vector<10x20xf32>, vector<25x20xf32> -> vector<25x20xf32>
    %26 = arith.addf %22, %25 : vector<25x20xf32>
    %c64 = arith.constant 64 : index
    %c128_12 = arith.constant 128 : index
    %27 = vector.load %arg1[%c64, %c128_12] : memref<128x384xf32, #tpu.memory_space<vmem>>, vector<1x20xf32>
    %28 = vector.broadcast %27 : vector<1x20xf32> to vector<25x20xf32>
    %29 = arith.addf %26, %28 : vector<25x20xf32>
    %cst_13 = arith.constant 0.000000e+00 : f32
    %30 = vector.broadcast %cst_13 : f32 to vector<25x20xf32>
    %31 = arith.maximumf %29, %30 : vector<25x20xf32>
    %32 = vector.extract_strided_slice %31 {offsets = [0, 0], sizes = [23, 20], strides = [1, 1]} : vector<25x20xf32> to vector<23x20xf32>
    %33 = vector.extract_strided_slice %31 {offsets = [1, 0], sizes = [23, 20], strides = [1, 1]} : vector<25x20xf32> to vector<23x20xf32>
    %34 = arith.maximumf %32, %33 : vector<23x20xf32>
    %35 = vector.extract_strided_slice %31 {offsets = [2, 0], sizes = [23, 20], strides = [1, 1]} : vector<25x20xf32> to vector<23x20xf32>
    %36 = arith.maximumf %34, %35 : vector<23x20xf32>
    %37 = vector.extract_strided_slice %36 {offsets = [0, 0], sizes = [13, 20], strides = [1, 1]} : vector<23x20xf32> to vector<13x20xf32>
    %38 = vector.extract_strided_slice %36 {offsets = [5, 0], sizes = [13, 20], strides = [1, 1]} : vector<23x20xf32> to vector<13x20xf32>
    %39 = arith.maximumf %37, %38 : vector<13x20xf32>
    %40 = vector.extract_strided_slice %36 {offsets = [10, 0], sizes = [13, 20], strides = [1, 1]} : vector<23x20xf32> to vector<13x20xf32>
    %41 = arith.maximumf %39, %40 : vector<13x20xf32>
    %42 = vector.extract_strided_slice %41 {offsets = [0, 0], sizes = [1, 20], strides = [1, 1]} : vector<13x20xf32> to vector<1x20xf32>
    %c0_14 = arith.constant 0 : index
    %c256 = arith.constant 256 : index
    %43 = vector.load %arg1[%c0_14, %c256] : memref<128x384xf32, #tpu.memory_space<vmem>>, vector<20x128xf32>
    %cst_15 = arith.constant dense<0.000000e+00> : vector<1x128xf32>
    %44 = tpu.matmul %42, %43, %cst_15 {dimension_numbers = #tpu.dot_dimension_numbers<[1], [0], [0], [1], [0, 0, 1, 1], [], []>} : vector<1x20xf32>, vector<20x128xf32>, vector<1x128xf32> -> vector<1x128xf32>
    %45 = vector.extract_strided_slice %41 {offsets = [1, 0], sizes = [1, 20], strides = [1, 1]} : vector<13x20xf32> to vector<1x20xf32>
    %c24 = arith.constant 24 : index
    %c256_16 = arith.constant 256 : index
    %46 = vector.load %arg1[%c24, %c256_16] : memref<128x384xf32, #tpu.memory_space<vmem>>, vector<20x128xf32>
    %cst_17 = arith.constant dense<0.000000e+00> : vector<1x128xf32>
    %47 = tpu.matmul %45, %46, %cst_17 {dimension_numbers = #tpu.dot_dimension_numbers<[1], [0], [0], [1], [0, 0, 1, 1], [], []>} : vector<1x20xf32>, vector<20x128xf32>, vector<1x128xf32> -> vector<1x128xf32>
    %48 = arith.addf %44, %47 : vector<1x128xf32>
    %49 = vector.extract_strided_slice %41 {offsets = [5, 0], sizes = [1, 20], strides = [1, 1]} : vector<13x20xf32> to vector<1x20xf32>
    %c48_18 = arith.constant 48 : index
    %c256_19 = arith.constant 256 : index
    %50 = vector.load %arg1[%c48_18, %c256_19] : memref<128x384xf32, #tpu.memory_space<vmem>>, vector<20x128xf32>
    %cst_20 = arith.constant dense<0.000000e+00> : vector<1x128xf32>
    %51 = tpu.matmul %49, %50, %cst_20 {dimension_numbers = #tpu.dot_dimension_numbers<[1], [0], [0], [1], [0, 0, 1, 1], [], []>} : vector<1x20xf32>, vector<20x128xf32>, vector<1x128xf32> -> vector<1x128xf32>
    %52 = arith.addf %48, %51 : vector<1x128xf32>
    %53 = vector.extract_strided_slice %41 {offsets = [6, 0], sizes = [1, 20], strides = [1, 1]} : vector<13x20xf32> to vector<1x20xf32>
    %c72 = arith.constant 72 : index
    %c256_21 = arith.constant 256 : index
    %54 = vector.load %arg1[%c72, %c256_21] : memref<128x384xf32, #tpu.memory_space<vmem>>, vector<20x128xf32>
    %cst_22 = arith.constant dense<0.000000e+00> : vector<1x128xf32>
    %55 = tpu.matmul %53, %54, %cst_22 {dimension_numbers = #tpu.dot_dimension_numbers<[1], [0], [0], [1], [0, 0, 1, 1], [], []>} : vector<1x20xf32>, vector<20x128xf32>, vector<1x128xf32> -> vector<1x128xf32>
    %56 = arith.addf %52, %55 : vector<1x128xf32>
    %c96 = arith.constant 96 : index
    %c256_23 = arith.constant 256 : index
    %57 = vector.load %arg1[%c96, %c256_23] : memref<128x384xf32, #tpu.memory_space<vmem>>, vector<1x128xf32>
    %58 = arith.addf %56, %57 : vector<1x128xf32>
    %59 = tpu.iota {dimensions = array<i32: 1>} : vector<1x128xi32>
    %c2_i32 = arith.constant 2 : i32
    %60 = vector.broadcast %c2_i32 : i32 to vector<1x128xi32>
    %61 = arith.cmpi slt, %59, %60 : vector<1x128xi32>
    %cst_24 = arith.constant -1.000000e+30 : f32
    %62 = vector.broadcast %cst_24 : f32 to vector<1x128xf32>
    %63 = arith.select %61, %58, %62 : vector<1x128xi1>, vector<1x128xf32>
    %cst_25 = arith.constant dense<0xFF800000> : vector<1xf32>
    %64 = vector.multi_reduction <maximumf>, %63, %cst_25 [1] : vector<1x128xf32> to vector<1xf32>
    %65 = vector.shape_cast %64 : vector<1xf32> to vector<1x1xf32>
    %66 = vector.broadcast %65 : vector<1x1xf32> to vector<1x128xf32>
    %67 = arith.subf %63, %66 : vector<1x128xf32>
    %68 = math.exp %67 : vector<1x128xf32>
    %cst_26 = arith.constant dense<0.000000e+00> : vector<1xf32>
    %69 = vector.multi_reduction <add>, %68, %cst_26 [1] : vector<1x128xf32> to vector<1xf32>
    %70 = vector.shape_cast %69 : vector<1xf32> to vector<1x1xf32>
    %71 = vector.broadcast %70 : vector<1x1xf32> to vector<1x128xf32>
    %72 = arith.divf %68, %71 : vector<1x128xf32>
    %73 = vector.shape_cast %72 : vector<1x128xf32> to vector<1x128xf32>
    %74 = vector.broadcast %73 : vector<1x128xf32> to vector<8x128xf32>
    %c0_27 = arith.constant 0 : index
    %c0_28 = arith.constant 0 : index
    %75 = vector.load %arg2[%c0_27, %c0_28] : memref<8x128xf32, #tpu.memory_space<vmem>>, vector<8x128xf32>
    tpu.vector_store %arg2[%c0_27, %c0_28], %74 {strides = array<i32>} : memref<8x128xf32, #tpu.memory_space<vmem>>, vector<8x128xf32>,
    return
  }
}

</mosaic_0001>

<bundles_post_ra>
// kernel: squeeze.2
= control target key start
LH: loop header
LB: loop body
LE: loop exit
PB: predicated region body
PF: predicated region fallthrough
CT: control target
= control target key end

     0   :  { %s7554_s12 = smov 123   ;;  %s7555_s21 = smov 118   ;;  %vm3_vm0 = vcmask 39936   ;;  %s11715_s0 = inlined_call_operand.vmem [shape: f32[3,50,50], index: 0, kind: input, shape index: {}]   ;;  %s11716_s1 = inlined_call_operand.vmem [shape: f32[3,5,2,5,5,2,5], index: 1, kind: output, shape index: {}]  }
   0x1   :  { %v6637_v0 = vld [vmem:[%s11715_s0 + $0x20] sm:$0xff]   ;;  %v6635_v1 = vld [vmem:[%s11715_s0 + $0x10] sm:$0xff]   ;;  %v6638_v3 = vld [vmem:[%s11715_s0 + $0x28] sm:$0xff]   ;;  %s7556_s2 = smov 113   ;;  %s7558_s23 = smov 103  }
   0x2   :  { %v140_v2 = vld [vmem:[%s11715_s0] sm:$0xff]   ;;  %177 = vrot.lane.b32.xlu2 %v6637_v0, %s7554_s12  ;;  %159 = vrot.lane.b32.xlu1 %v6635_v1, %s7554_s12  ;;  %v6636_v4 = vld [vmem:[%s11715_s0 + $0x18] sm:$0xff]   ;;  %31 = vst.msk [vmem:[#allocation0 + $0x500] ss:$40 sm:$0xf] %vm3_vm0, %v6637_v0   ;;  %s7559_s19 = smov 98  }
   0x3   :  { %141 = vrot.lane.b32.xlu0 %v140_v2, %s7554_s12  ;;  %v6634_v5 = vld [vmem:[%s11715_s0 + $0x8] sm:$0xff]   ;;  %v6640_v7 = vld [vmem:[%s11715_s0 + $0x3e] sm:$0xff]   ;;  %v6639_v8 = vld.sshfl [vmem:[%s11715_s0 + $0x30] sm:$0xff pattern:$0xdcba9810]   ;;  %s7561_s7 = smov 88  }
   0x4   :  { %v6641_v6 = vld [vmem:[%s11715_s0 + $0x46] sm:$0xff]   ;;  %v6644_v9 = vld [vmem:[%s11715_s0 + $0x5e] sm:$0xff]   ;;  %v6643_v10 = vld [vmem:[%s11715_s0 + $0x56] sm:$0xff]   ;;  %33 = vst.msk [vmem:[#allocation0 + $0x500] ss:$40 sm:$0xf0] %vm3_vm0, %v6637_v0  }
   0x5   :  { %v6642_v11 = vld [vmem:[%s11715_s0 + $0x4e] sm:$0xff]   ;;  %v6647_v12 = vld [vmem:[%s11715_s0 + $0x7c] sm:$0xff]   ;;  %v6648_v17 = vld [vmem:[%s11715_s0 + $0x84] sm:$0xff]   ;;  %38 = vst.msk [vmem:[#allocation0 + $0x640] ss:$40 sm:$0xf] %vm3_vm0, %v6638_v3  }
   0x6   :  { %v6646_v13 = vld [vmem:[%s11715_s0 + $0x74] sm:$0xff]   ;;  %v6645_v14 = vld.sshfl [vmem:[%s11715_s0 + $0x66] sm:$0xff pattern:$0xdcba3210]   ;;  %v6651_v20 = vld [vmem:[%s11715_s0 + $0x9c] sm:$0x3f]  }
   0x7   :  { %v6650_v15 = vld [vmem:[%s11715_s0 + $0x94] sm:$0xff]   ;;  %v6649_v16 = vld [vmem:[%s11715_s0 + $0x8c] sm:$0xff]   ;;  %v310_v19 = vld.sshfl [vmem:[%s11715_s0] sm:$0xff pattern:$0x65472103]   ;;  %s7562_s15 = smov 83  }
   0x8   :  { %v7648_v18 = vld.sshfl [vmem:[%s11715_s0 + $0x8] sm:$0xff pattern:$0x65472103]   ;;  %v7663_v21 = vld.sshfl [vmem:[%s11715_s0 + $0x20] sm:$0xff pattern:$0x65472103]  }
   0x9   :  { %v7668_v22 = vld.sshfl [vmem:[%s11715_s0 + $0x18] sm:$0xff pattern:$0x65472103]   ;;  %v7673_v23 = vld.sshfl [vmem:[%s11715_s0 + $0x10] sm:$0xff pattern:$0x65472103]  }
   0xa   :  { %186 = vrot.lane.b32.xlu2 %v6638_v3, %s7554_s12  ;;  %168 = vrot.lane.b32.xlu1 %v6636_v4, %s7554_s12  ;;  %v7685_v24 = vld.sshfl [vmem:[%s11715_s0 + $0x3e] sm:$0xff pattern:$0x65472103]   ;;  %v7691_v25 = vld.sshfl [vmem:[%s11715_s0 + $0x30] sm:$0xff pattern:$0xcbad8109]  }
   0xb   :  { %150 = vrot.lane.b32.xlu0 %v6634_v5, %s7554_s12  ;;  %v7697_v26 = vld.sshfl [vmem:[%s11715_s0 + $0x28] sm:$0xff pattern:$0x65472103]   ;;  %40 = vst.msk [vmem:[#allocation0 + $0x640] ss:$40 sm:$0xf0] %vm3_vm0, %v6638_v3  }
   0xc   :  { %17 = vst.msk [vmem:[#allocation0 + $0x280] ss:$40 sm:$0xf] %vm3_vm0, %v6635_v1   ;;  %v7713_v27 = vld.sshfl [vmem:[%s11715_s0 + $0x56] sm:$0xff pattern:$0x65472103]  }
   0xd   :  { %19 = vst.msk [vmem:[#allocation0 + $0x280] ss:$40 sm:$0xf0] %vm3_vm0, %v6635_v1   ;;  %v7719_v28 = vld.sshfl [vmem:[%s11715_s0 + $0x4e] sm:$0xff pattern:$0x65472103]  }
   0xe   :  { %4 = vst.msk [vmem:[#allocation0] ss:$40 sm:$0xf] %vm3_vm0, %v140_v2   ;;  %v7725_v29 = vld.sshfl [vmem:[%s11715_s0 + $0x46] sm:$0xff pattern:$0x65472103]  }
   0xf   :  { %5 = vst.msk [vmem:[#allocation0] ss:$40 sm:$0xf0] %vm3_vm0, %v140_v2   ;;  %v7738_v30 = vld.sshfl [vmem:[%s11715_s0 + $0x74] sm:$0xff pattern:$0x65472103]  }
  0x10   :  { %24 = vst.msk [vmem:[#allocation0 + $0x3c0] ss:$40 sm:$0xf] %vm3_vm0, %v6636_v4   ;;  %v7743_v31 = vld.sshfl [vmem:[%s11715_s0 + $0x66] sm:$0xff pattern:$0xcbad2103]  }
  0x11   :  { %26 = vst.msk [vmem:[#allocation0 + $0x3c0] ss:$40 sm:$0xf0] %vm3_vm0, %v6636_v4   ;;  %v7748_v32 = vld.sshfl [vmem:[%s11715_s0 + $0x5e] sm:$0xff pattern:$0x65472103]  }
  0x12   :  { %213 = vrot.lane.b32.xlu2 %v6641_v6, %s7554_s12  ;;  %204 = vrot.lane.b32.xlu1 %v6640_v7, %s7554_s12  ;;  %10 = vst.msk [vmem:[#allocation0 + $0x140] ss:$40 sm:$0xf] %vm3_vm0, %v6634_v5   ;;  %v7759_v33 = vld.sshfl [vmem:[%s11715_s0 + $0x8c] sm:$0xff pattern:$0x65472103]  }
  0x13   :  { %195 = vrot.lane.b32.xlu0 %v6639_v8, %s7554_s12  ;;  %12 = vst.msk [vmem:[#allocation0 + $0x140] ss:$40 sm:$0xf0] %vm3_vm0, %v6634_v5   ;;  %v7764_v34 = vld.sshfl [vmem:[%s11715_s0 + $0x84] sm:$0xff pattern:$0x65472103]  }
  0x14   :  { %v7769_v35 = vld.sshfl [vmem:[%s11715_s0 + $0x7c] sm:$0xff pattern:$0x65472103]   ;;  %v6622_v38 = vld [vmem:[%s11715_s0 + $0x48] sm:$0xff]  }
  0x15   :  { %v6621_v37 = vld [vmem:[%s11715_s0 + $0x40] sm:$0xff]   ;;  %v7794_v40 = vld.sshfl [vmem:[%s11715_s0 + $0x94] sm:$0xff pattern:$0x65472103]  }
  0x16   :  { %v7788_v39 = vld.sshfl [vmem:[%s11715_s0 + $0x9c] sm:$0xff pattern:$0x55542103]   ;;  %59 = vst.msk [vmem:[#allocation0 + $0x910] ss:$40 sm:$0xf0] %vm3_vm0, %v6621_v37  }
  0x17   :  { %64 = vst.msk [vmem:[#allocation0 + $0xa50] ss:$40 sm:$0xf] %vm3_vm0, %v6622_v38   ;;  %v6624_v51 = vld [vmem:[%s11715_s0 + $0x58] sm:$0xff]   ;;  %v6625_v52 = vld [vmem:[%s11715_s0 + $0x60] sm:$0xff]  }
  0x18   :  { %66 = vst.msk [vmem:[#allocation0 + $0xa50] ss:$40 sm:$0xf0] %vm3_vm0, %v6622_v38  }
  0x19   :  { %57 = vst.msk [vmem:[#allocation0 + $0x910] ss:$40 sm:$0xf] %vm3_vm0, %v6621_v37  }
  0x1a   :  { %240 = vrot.lane.b32.xlu2 %v6644_v9, %s7554_s12  ;;  %231 = vrot.lane.b32.xlu1 %v6643_v10, %s7554_s12  ;;  %80 = vst.msk [vmem:[#allocation0 + $0xcd0] ss:$40 sm:$0xf0] %vm3_vm0, %v6624_v51  }
  0x1b   :  { %222 = vrot.lane.b32.xlu0 %v6642_v11, %s7554_s12  ;;  %85 = vst.msk [vmem:[#allocation0 + $0xe10] ss:$40 sm:$0xf] %vm3_vm0, %v6625_v52  }
  0x1c   :  { %87 = vst.msk [vmem:[#allocation0 + $0xe10] ss:$40 sm:$0xf0] %vm3_vm0, %v6625_v52  }
  0x1d   :  { %78 = vst.msk [vmem:[#allocation0 + $0xcd0] ss:$40 sm:$0xf] %vm3_vm0, %v6624_v51  }
  0x22   :  { %267 = vrot.lane.b32.xlu2 %v6647_v12, %s7554_s12  ;;  %258 = vrot.lane.b32.xlu1 %v6646_v13, %s7554_s12 }
  0x23   :  { %249 = vrot.lane.b32.xlu0 %v6645_v14, %s7554_s12 }
  0x2a   :  { %294 = vrot.lane.b32.xlu2 %v6650_v15, %s7554_s12  ;;  %285 = vrot.lane.b32.xlu1 %v6649_v16, %s7554_s12 }
  0x2b   :  { %276 = vrot.lane.b32.xlu0 %v6648_v17, %s7554_s12 }
  0x32   :  { %324 = vrot.lane.b32.xlu2 %v7648_v18, %s7555_s21  ;;  %311 = vrot.lane.b32.xlu1 %v310_v19, %s7555_s21 }
  0x33   :  { %303 = vrot.lane.b32.xlu0 %v6651_v20, %s7554_s12 }
  0x3a   :  { %363 = vrot.lane.b32.xlu2 %v7663_v21, %s7555_s21  ;;  %350 = vrot.lane.b32.xlu1 %v7668_v22, %s7555_s21 }
  0x3b   :  { %337 = vrot.lane.b32.xlu0 %v7673_v23, %s7555_s21 }
  0x42   :  { %402 = vrot.lane.b32.xlu2 %v7685_v24, %s7555_s21  ;;  %389 = vrot.lane.b32.xlu1 %v7691_v25, %s7555_s21 }
  0x43   :  { %376 = vrot.lane.b32.xlu0 %v7697_v26, %s7555_s21 }
  0x4a   :  { %441 = vrot.lane.b32.xlu2 %v7713_v27, %s7555_s21  ;;  %428 = vrot.lane.b32.xlu1 %v7719_v28, %s7555_s21 }
  0x4b   :  { %415 = vrot.lane.b32.xlu0 %v7725_v29, %s7555_s21 }
  0x52   :  { %480 = vrot.lane.b32.xlu2 %v7738_v30, %s7555_s21  ;;  %467 = vrot.lane.b32.xlu1 %v7743_v31, %s7555_s21 }
  0x53   :  { %454 = vrot.lane.b32.xlu0 %v7748_v32, %s7555_s21 }
  0x5a   :  { %519 = vrot.lane.b32.xlu2 %v7759_v33, %s7555_s21  ;;  %506 = vrot.lane.b32.xlu1 %v7764_v34, %s7555_s21 }
  0x5b   :  { %493 = vrot.lane.b32.xlu0 %v7769_v35, %s7555_s21 }
  0x5c   :  { %v178_v36 = vpop.permute.xlu2 %177  }
  0x5d   :  { %181 = vst.msk [vmem:[#allocation0 + $0x501] ss:$40 sm:$0xf] %vm3_vm0, %v178_v36  }
  0x5e   :  { %183 = vst.msk [vmem:[#allocation0 + $0x501] ss:$40 sm:$0xf0] %vm3_vm0, %v178_v36   ;;  %v6629_v36 = vld [vmem:[%s11715_s0 + $0x80] sm:$0xff]  }
  0x5f   :  { %111 = vst.msk [vmem:[#allocation0 + $0x1220] ss:$40 sm:$0xf] %vm3_vm0, %v6629_v36  }
  0x60   :  { %113 = vst.msk [vmem:[#allocation0 + $0x1220] ss:$40 sm:$0xf0] %vm3_vm0, %v6629_v36  }
  0x62   :  { %555 = vrot.lane.b32.xlu2 %v310_v19, %s7556_s2  ;;  %545 = vrot.lane.b32.xlu1 %v7788_v39, %s7555_s21 }
  0x63   :  { %532 = vrot.lane.b32.xlu0 %v7794_v40, %s7555_s21  ;;  %s7557_s21 = smov 108  }
  0x64   :  { %v3075_v41 = vld [vmem:[#allocation0 + $0x500] sm:$0x3]  ;;  %v3105_v42 = vld [vmem:[#allocation0 + $0x528] sm:$0x3]  ;;  %v3135_v43 = vld [vmem:[#allocation0 + $0x550] sm:$0x3]  ;;  %v187_v44 = vpop.permute.xlu2 %186  }
  0x65   :  { %6955 = vst [vmem:[%s11716_s1 + $0x140] sm:$0x3] %v3075_v41  ;;  %v3165_v45 = vld [vmem:[#allocation0 + $0x578] sm:$0x3]  ;;  %v3195_v46 = vld [vmem:[#allocation0 + $0x5a0] sm:$0x3] }
  0x66   :  { %6960 = vst [vmem:[%s11716_s1 + $0x14a] sm:$0x3] %v3105_v42  ;;  %v3225_v47 = vld [vmem:[#allocation0 + $0x5c8] sm:$0x3]  ;;  %v3255_v48 = vld [vmem:[#allocation0 + $0x5f0] sm:$0x3] }
  0x67   :  { %6965 = vst [vmem:[%s11716_s1 + $0x154] sm:$0x3] %v3135_v43  ;;  %v3285_v49 = vld [vmem:[#allocation0 + $0x618] sm:$0x3] }
  0x68   :  { %6970 = vst [vmem:[%s11716_s1 + $0x15e] sm:$0x3] %v3165_v45 }
  0x69   :  { %6975 = vst [vmem:[%s11716_s1 + $0x168] sm:$0x3] %v3195_v46 }
  0x6a   :  { %6980 = vst [vmem:[%s11716_s1 + $0x172] sm:$0x3] %v3225_v47  ;;  %594 = vrot.lane.b32.xlu2 %v7668_v22, %s7556_s2  ;;  %581 = vrot.lane.b32.xlu1 %v7673_v23, %s7556_s2 }
  0x6b   :  { %6985 = vst [vmem:[%s11716_s1 + $0x17c] sm:$0x3] %v3255_v48  ;;  %568 = vrot.lane.b32.xlu0 %v7648_v18, %s7556_s2 }
  0x6c   :  { %6990 = vst [vmem:[%s11716_s1 + $0x186] sm:$0x3] %v3285_v49  ;;  %v214_v50 = vpop.permute.xlu2 %213  }
  0x6d   :  { %190 = vst.msk [vmem:[#allocation0 + $0x641] ss:$40 sm:$0xf] %vm3_vm0, %v187_v44  }
  0x6e   :  { %192 = vst.msk [vmem:[#allocation0 + $0x641] ss:$40 sm:$0xf0] %vm3_vm0, %v187_v44  }
  0x6f   :  { %217 = vst.msk [vmem:[#allocation0 + $0xa01] ss:$40 sm:$0xf] %vm3_vm0, %v214_v50  }
  0x70   :  { %219 = vst.msk [vmem:[#allocation0 + $0xa01] ss:$40 sm:$0xf0] %vm3_vm0, %v214_v50  }
  0x72   :  { %633 = vrot.lane.b32.xlu2 %v7691_v25, %s7556_s2  ;;  %620 = vrot.lane.b32.xlu1 %v7697_v26, %s7556_s2 }
  0x73   :  { %607 = vrot.lane.b32.xlu0 %v7663_v21, %s7556_s2 }
  0x74   :  { %v3315_v53 = vld [vmem:[#allocation0 + $0x640] sm:$0x3]  ;;  %v3345_v54 = vld [vmem:[#allocation0 + $0x668] sm:$0x3]  ;;  %v3375_v55 = vld [vmem:[#allocation0 + $0x690] sm:$0x3]  ;;  %v241_v56 = vpop.permute.xlu2 %240   ;;  %v160_v57 = vpop.permute.xlu1 %159  }
  0x75   :  { %6995 = vst [vmem:[%s11716_s1 + $0x190] sm:$0x3] %v3315_v53  ;;  %v3405_v58 = vld [vmem:[#allocation0 + $0x6b8] sm:$0x3]  ;;  %v142_v59 = vpop.permute.xlu0 %141   ;;  %v3435_v60 = vld [vmem:[#allocation0 + $0x6e0] sm:$0x3] }
  0x76   :  { %7000 = vst [vmem:[%s11716_s1 + $0x19a] sm:$0x3] %v3345_v54  ;;  %v3465_v61 = vld [vmem:[#allocation0 + $0x708] sm:$0x3]  ;;  %v3495_v62 = vld [vmem:[#allocation0 + $0x730] sm:$0x3] }
  0x77   :  { %7005 = vst [vmem:[%s11716_s1 + $0x1a4] sm:$0x3] %v3375_v55  ;;  %v3525_v63 = vld [vmem:[#allocation0 + $0x758] sm:$0x3]  ;;  %v4035_v0 = vld [vmem:[#allocation0 + $0xa00] sm:$0x3] }
  0x78   :  { %7010 = vst [vmem:[%s11716_s1 + $0x1ae] sm:$0x3] %v3405_v58  ;;  %v4065_v1 = vld [vmem:[#allocation0 + $0xa28] sm:$0x3]  ;;  %v4095_v2 = vld [vmem:[#allocation0 + $0xa50] sm:$0x3] }
  0x79   :  { %7015 = vst [vmem:[%s11716_s1 + $0x1b8] sm:$0x3] %v3435_v60  ;;  %v4125_v3 = vld [vmem:[#allocation0 + $0xa78] sm:$0x3]  ;;  %v4155_v4 = vld [vmem:[#allocation0 + $0xaa0] sm:$0x3] }
  0x7a   :  { %7020 = vst [vmem:[%s11716_s1 + $0x1c2] sm:$0x3] %v3465_v61  ;;  %672 = vrot.lane.b32.xlu2 %v7719_v28, %s7556_s2  ;;  %659 = vrot.lane.b32.xlu1 %v7725_v29, %s7556_s2  ;;  %v4185_v5 = vld [vmem:[#allocation0 + $0xac8] sm:$0x3]  ;;  %v4215_v6 = vld [vmem:[#allocation0 + $0xaf0] sm:$0x3] }
  0x7b   :  { %7025 = vst [vmem:[%s11716_s1 + $0x1cc] sm:$0x3] %v3495_v62  ;;  %646 = vrot.lane.b32.xlu0 %v7685_v24, %s7556_s2  ;;  %v4245_v7 = vld [vmem:[#allocation0 + $0xb18] sm:$0x3] }
  0x7c   :  { %7030 = vst [vmem:[%s11716_s1 + $0x1d6] sm:$0x3] %v3525_v63  ;;  %v7908_v8 = vpop.permute.xlu2 %267   ;;  %v7910_v9 = vpop.permute.xlu1 %168   ;;  %v6632_v60 = vld [vmem:[%s11715_s0 + $0x98] sm:$0xff]  }
  0x7d   :  { %7115 = vst [vmem:[%s11716_s1 + $0x280] sm:$0x3] %v4035_v0  ;;  %v7963_v22 = vpop.permute.xlu0 %150  }
  0x7e   :  { %7120 = vst [vmem:[%s11716_s1 + $0x28a] sm:$0x3] %v4065_v1 }
  0x7f   :  { %7125 = vst [vmem:[%s11716_s1 + $0x294] sm:$0x3] %v4095_v2  ;;  %v6620_v2 = vld [vmem:[%s11715_s0 + $0x38] sm:$0xff]  }
  0x80   :  { %7130 = vst [vmem:[%s11716_s1 + $0x29e] sm:$0x3] %v4125_v3 }
  0x81   :  { %7135 = vst [vmem:[%s11716_s1 + $0x2a8] sm:$0x3] %v4155_v4 }
  0x82   :  { %7140 = vst [vmem:[%s11716_s1 + $0x2b2] sm:$0x3] %v4185_v5  ;;  %711 = vrot.lane.b32.xlu2 %v7743_v31, %s7556_s2  ;;  %698 = vrot.lane.b32.xlu1 %v7748_v32, %s7556_s2 }
  0x83   :  { %7145 = vst [vmem:[%s11716_s1 + $0x2bc] sm:$0x3] %v4215_v6  ;;  %685 = vrot.lane.b32.xlu0 %v7713_v27, %s7556_s2 }
  0x84   :  { %7150 = vst [vmem:[%s11716_s1 + $0x2c6] sm:$0x3] %v4245_v7  ;;  %v295_v37 = vpop.permute.xlu2 %294   ;;  %v8023_v38 = vpop.permute.xlu1 %204  }
  0x85   :  { %244 = vst.msk [vmem:[#allocation0 + $0xdc1] ss:$40 sm:$0xf] %vm3_vm0, %v241_v56   ;;  %v196_v61 = vpop.permute.xlu0 %195  }
  0x86   :  { %246 = vst.msk [vmem:[#allocation0 + $0xdc1] ss:$40 sm:$0xf0] %vm3_vm0, %v241_v56  }
  0x87   :  { %163 = vst.msk [vmem:[#allocation0 + $0x281] ss:$40 sm:$0xf] %vm3_vm0, %v160_v57  }
  0x88   :  { %165 = vst.msk [vmem:[#allocation0 + $0x281] ss:$40 sm:$0xf0] %vm3_vm0, %v160_v57  }
  0x89   :  { %145 = vst.msk [vmem:[#allocation0 + $0x1] ss:$40 sm:$0xf] %vm3_vm0, %v142_v59  }
  0x8a   :  { %750 = vrot.lane.b32.xlu2 %v7764_v34, %s7556_s2  ;;  %737 = vrot.lane.b32.xlu1 %v7769_v35, %s7556_s2  ;;  %147 = vst.msk [vmem:[#allocation0 + $0x1] ss:$40 sm:$0xf0] %vm3_vm0, %v142_v59   ;;  %v6628_v35 = vld [vmem:[%s11715_s0 + $0x78] sm:$0xff]   ;;  %v6631_v59 = vld [vmem:[%s11715_s0 + $0x90] sm:$0xff]  }
  0x8b   :  { %724 = vrot.lane.b32.xlu0 %v7738_v30, %s7556_s2  ;;  %106 = vst.msk [vmem:[#allocation0 + $0x10e0] ss:$40 sm:$0xf0] %vm3_vm0, %v6628_v35  }
  0x8c   :  { %v4755_v10 = vld [vmem:[#allocation0 + $0xdc0] sm:$0x3]  ;;  %v4785_v11 = vld [vmem:[#allocation0 + $0xde8] sm:$0x3]  ;;  %v4815_v12 = vld [vmem:[#allocation0 + $0xe10] sm:$0x3]  ;;  %v325_v7 = vpop.permute.xlu2 %324  }
  0x8d   :  { %7235 = vst [vmem:[%s11716_s1 + $0x370] sm:$0x3] %v4755_v10  ;;  %v4845_v13 = vld [vmem:[#allocation0 + $0xe38] sm:$0x3]  ;;  %v4875_v14 = vld [vmem:[#allocation0 + $0xe60] sm:$0x3] }
  0x8e   :  { %7240 = vst [vmem:[%s11716_s1 + $0x37a] sm:$0x3] %v4785_v11  ;;  %v4905_v15 = vld [vmem:[#allocation0 + $0xe88] sm:$0x3]  ;;  %v4935_v16 = vld [vmem:[#allocation0 + $0xeb0] sm:$0x3] }
  0x8f   :  { %7245 = vst [vmem:[%s11716_s1 + $0x384] sm:$0x3] %v4815_v12  ;;  %v4965_v17 = vld [vmem:[#allocation0 + $0xed8] sm:$0x3]  ;;  %v2595_v18 = vld [vmem:[#allocation0 + $0x280] sm:$0x3] }
  0x90   :  { %7250 = vst [vmem:[%s11716_s1 + $0x38e] sm:$0x3] %v4845_v13  ;;  %v2625_v19 = vld [vmem:[#allocation0 + $0x2a8] sm:$0x3]  ;;  %v2655_v20 = vld [vmem:[#allocation0 + $0x2d0] sm:$0x3] }
  0x91   :  { %7255 = vst [vmem:[%s11716_s1 + $0x398] sm:$0x3] %v4875_v14  ;;  %v2685_v21 = vld [vmem:[#allocation0 + $0x2f8] sm:$0x3]  ;;  %v2715_v23 = vld [vmem:[#allocation0 + $0x320] sm:$0x3] }
  0x92   :  { %7260 = vst [vmem:[%s11716_s1 + $0x3a2] sm:$0x3] %v4905_v15  ;;  %789 = vrot.lane.b32.xlu2 %v7788_v39, %s7556_s2  ;;  %776 = vrot.lane.b32.xlu1 %v7794_v40, %s7556_s2  ;;  %v2745_v24 = vld [vmem:[#allocation0 + $0x348] sm:$0x3]  ;;  %v2775_v25 = vld [vmem:[#allocation0 + $0x370] sm:$0x3] }
  0x93   :  { %7265 = vst [vmem:[%s11716_s1 + $0x3ac] sm:$0x3] %v4935_v16  ;;  %763 = vrot.lane.b32.xlu0 %v7759_v33, %s7556_s2  ;;  %v2805_v26 = vld [vmem:[#allocation0 + $0x398] sm:$0x3]  ;;  %v2116_v27 = vld [vmem:[#allocation0] sm:$0x3] }
  0x94   :  { %7270 = vst [vmem:[%s11716_s1 + $0x3b6] sm:$0x3] %v4965_v17  ;;  %v2145_v28 = vld [vmem:[#allocation0 + $0x28] sm:$0x3]  ;;  %v2175_v29 = vld [vmem:[#allocation0 + $0x50] sm:$0x3]  ;;  %v223_v17 = vpop.permute.xlu0 %222  }
  0x95   :  { %6875 = vst [vmem:[%s11716_s1 + $0xa0] sm:$0x3] %v2595_v18  ;;  %v2205_v30 = vld [vmem:[#allocation0 + $0x78] sm:$0x3]  ;;  %v2235_v31 = vld [vmem:[#allocation0 + $0xa0] sm:$0x3] }
  0x96   :  { %6880 = vst [vmem:[%s11716_s1 + $0xaa] sm:$0x3] %v2625_v19  ;;  %v2265_v32 = vld [vmem:[#allocation0 + $0xc8] sm:$0x3]  ;;  %v2295_v33 = vld [vmem:[#allocation0 + $0xf0] sm:$0x3] }
  0x97   :  { %6885 = vst [vmem:[%s11716_s1 + $0xb4] sm:$0x3] %v2655_v20  ;;  %v2325_v34 = vld [vmem:[#allocation0 + $0x118] sm:$0x3] }
  0x98   :  { %6890 = vst [vmem:[%s11716_s1 + $0xbe] sm:$0x3] %v2685_v21 }
  0x99   :  { %6895 = vst [vmem:[%s11716_s1 + $0xc8] sm:$0x3] %v2715_v23  ;;  %v6623_v23 = vld [vmem:[%s11715_s0 + $0x50] sm:$0xff]  }
  0x9a   :  { %6900 = vst [vmem:[%s11716_s1 + $0xd2] sm:$0x3] %v2745_v24  ;;  %v8189_v24 = vpop.permute.xlu2 %363  }
  0x9b   :  { %6905 = vst [vmem:[%s11716_s1 + $0xdc] sm:$0x3] %v2775_v25 }
  0x9c   :  { %6910 = vst [vmem:[%s11716_s1 + $0xe6] sm:$0x3] %v2805_v26 }
  0x9d   :  { %2119 = vst [vmem:[%s11716_s1] sm:$0x3] %v2116_v27 }
  0x9e   :  { %6800 = vst [vmem:[%s11716_s1 + $0xa] sm:$0x3] %v2145_v28 }
  0x9f   :  { %6805 = vst [vmem:[%s11716_s1 + $0x14] sm:$0x3] %v2175_v29 }
  0xa0   :  { %6810 = vst [vmem:[%s11716_s1 + $0x1e] sm:$0x3] %v2205_v30 }
  0xa1   :  { %6815 = vst [vmem:[%s11716_s1 + $0x28] sm:$0x3] %v2235_v31 }
  0xa2   :  { %6820 = vst [vmem:[%s11716_s1 + $0x32] sm:$0x3] %v2265_v32 }
  0xa3   :  { %6825 = vst [vmem:[%s11716_s1 + $0x3c] sm:$0x3] %v2295_v33 }
  0xa4   :  { %6830 = vst [vmem:[%s11716_s1 + $0x46] sm:$0x3] %v2325_v34  ;;  %v250_v34 = vpop.permute.xlu0 %249  }
  0xa5   :  { %271 = vst.msk [vmem:[#allocation0 + $0x1181] ss:$40 sm:$0xf] %vm3_vm0, %v7908_v8  }
  0xa6   :  { %273 = vst.msk [vmem:[#allocation0 + $0x1181] ss:$40 sm:$0xf0] %vm3_vm0, %v7908_v8   ;;  %v232_v8 = vpop.permute.xlu1 %231  }
  0xa7   :  { %104 = vst.msk [vmem:[#allocation0 + $0x10e0] ss:$40 sm:$0xf] %vm3_vm0, %v6628_v35  }
  0xa8   :  { %172 = vst.msk [vmem:[#allocation0 + $0x3c1] ss:$40 sm:$0xf] %vm3_vm0, %v7910_v9  }
  0xa9   :  { %174 = vst.msk [vmem:[#allocation0 + $0x3c1] ss:$40 sm:$0xf0] %vm3_vm0, %v7910_v9  }
  0xaa   :  { %154 = vst.msk [vmem:[#allocation0 + $0x141] ss:$40 sm:$0xf] %vm3_vm0, %v7963_v22  }
  0xab   :  { %156 = vst.msk [vmem:[#allocation0 + $0x141] ss:$40 sm:$0xf0] %vm3_vm0, %v7963_v22   ;;  %v6619_v22 = vld [vmem:[%s11715_s0 + $0x30] sm:$0x3]  }
  0xac   :  { %v5475_v39 = vld [vmem:[#allocation0 + $0x1180] sm:$0x3]  ;;  %v5505_v40 = vld [vmem:[#allocation0 + $0x11a8] sm:$0x3]  ;;  %v5535_v41 = vld [vmem:[#allocation0 + $0x11d0] sm:$0x3] }
  0xad   :  { %7355 = vst [vmem:[%s11716_s1 + $0x460] sm:$0x3] %v5475_v39  ;;  %v5565_v42 = vld [vmem:[#allocation0 + $0x11f8] sm:$0x3]  ;;  %v5595_v43 = vld [vmem:[#allocation0 + $0x1220] sm:$0x3] }
  0xae   :  { %7360 = vst [vmem:[%s11716_s1 + $0x46a] sm:$0x3] %v5505_v40  ;;  %v5625_v44 = vld [vmem:[#allocation0 + $0x1248] sm:$0x3]  ;;  %v5655_v45 = vld [vmem:[#allocation0 + $0x1270] sm:$0x3]  ;;  %v8191_v25 = vpop.permute.xlu1 %258  }
  0xaf   :  { %7365 = vst [vmem:[%s11716_s1 + $0x474] sm:$0x3] %v5535_v41  ;;  %v5685_v46 = vld [vmem:[#allocation0 + $0x1298] sm:$0x3]  ;;  %v2835_v47 = vld [vmem:[#allocation0 + $0x3c0] sm:$0x3] }
  0xb0   :  { %7370 = vst [vmem:[%s11716_s1 + $0x47e] sm:$0x3] %v5565_v42  ;;  %v2865_v48 = vld [vmem:[#allocation0 + $0x3e8] sm:$0x3]  ;;  %v2895_v49 = vld [vmem:[#allocation0 + $0x410] sm:$0x3] }
  0xb1   :  { %7375 = vst [vmem:[%s11716_s1 + $0x488] sm:$0x3] %v5595_v43  ;;  %v2925_v50 = vld [vmem:[#allocation0 + $0x438] sm:$0x3]  ;;  %v2955_v51 = vld [vmem:[#allocation0 + $0x460] sm:$0x3] }
  0xb2   :  { %7380 = vst [vmem:[%s11716_s1 + $0x492] sm:$0x3] %v5625_v44  ;;  %v2985_v52 = vld [vmem:[#allocation0 + $0x488] sm:$0x3]  ;;  %v3015_v53 = vld [vmem:[#allocation0 + $0x4b0] sm:$0x3] }
  0xb3   :  { %7385 = vst [vmem:[%s11716_s1 + $0x49c] sm:$0x3] %v5655_v45  ;;  %v3045_v54 = vld [vmem:[#allocation0 + $0x4d8] sm:$0x3]  ;;  %v2355_v55 = vld [vmem:[#allocation0 + $0x140] sm:$0x3] }
  0xb4   :  { %7390 = vst [vmem:[%s11716_s1 + $0x4a6] sm:$0x3] %v5685_v46  ;;  %v2385_v56 = vld [vmem:[#allocation0 + $0x168] sm:$0x3]  ;;  %v2415_v57 = vld [vmem:[#allocation0 + $0x190] sm:$0x3] }
  0xb5   :  { %6915 = vst [vmem:[%s11716_s1 + $0xf0] sm:$0x3] %v2835_v47  ;;  %v2445_v58 = vld [vmem:[#allocation0 + $0x1b8] sm:$0x3]  ;;  %v2475_v62 = vld [vmem:[#allocation0 + $0x1e0] sm:$0x3] }
  0xb6   :  { %6920 = vst [vmem:[%s11716_s1 + $0xfa] sm:$0x3] %v2865_v48  ;;  %v2505_v63 = vld [vmem:[#allocation0 + $0x208] sm:$0x3]  ;;  %v2535_v0 = vld [vmem:[#allocation0 + $0x230] sm:$0x3] }
  0xb7   :  { %6925 = vst [vmem:[%s11716_s1 + $0x104] sm:$0x3] %v2895_v49  ;;  %v2565_v1 = vld [vmem:[#allocation0 + $0x258] sm:$0x3] }
  0xb8   :  { %6930 = vst [vmem:[%s11716_s1 + $0x10e] sm:$0x3] %v2925_v50  ;;  %v8253_v48 = vld.sshfl [vmem:[%s11715_s0 + $0x10] sm:$0xff pattern:$0x54761032]  }
  0xb9   :  { %6935 = vst [vmem:[%s11716_s1 + $0x118] sm:$0x3] %v2955_v51  ;;  %825 = vrot.lane.b32.xlu2 %v8253_v48, %s7557_s21  ;;  %v8263_v49 = vld.sshfl [vmem:[%s11715_s0 + $0x8] sm:$0xff pattern:$0x54761032]   ;;  %v8275_v51 = vpop.permute.xlu2 %402  }
  0xba   :  { %6940 = vst [vmem:[%s11716_s1 + $0x122] sm:$0x3] %v2985_v52  ;;  %812 = vrot.lane.b32.xlu1 %v8263_v49, %s7557_s21  ;;  %v8273_v50 = vld.sshfl [vmem:[%s11715_s0] sm:$0xff pattern:$0x54761032]   ;;  %v8277_v52 = vpop.permute.xlu1 %285  }
  0xbb   :  { %6945 = vst [vmem:[%s11716_s1 + $0x12c] sm:$0x3] %v3015_v53  ;;  %799 = vrot.lane.b32.xlu0 %v8273_v50, %s7557_s21 }
  0xbc   :  { %6950 = vst [vmem:[%s11716_s1 + $0x136] sm:$0x3] %v3045_v54 }
  0xbd   :  { %6835 = vst [vmem:[%s11716_s1 + $0x50] sm:$0x3] %v2355_v55 }
  0xbe   :  { %6840 = vst [vmem:[%s11716_s1 + $0x5a] sm:$0x3] %v2385_v56  ;;  %v6627_v56 = vld [vmem:[%s11715_s0 + $0x70] sm:$0xff]  }
  0xbf   :  { %6845 = vst [vmem:[%s11716_s1 + $0x64] sm:$0x3] %v2415_v57  ;;  %v6626_v57 = vld [vmem:[%s11715_s0 + $0x68] sm:$0x3]  }
  0xc0   :  { %6850 = vst [vmem:[%s11716_s1 + $0x6e] sm:$0x3] %v2445_v58  ;;  %v277_v58 = vpop.permute.xlu0 %276  }
  0xc1   :  { %127 = vst.msk [vmem:[#allocation0 + $0x14a0] ss:$40 sm:$0xf0] %vm3_vm0, %v6631_v59  }
  0xc2   :  { %132 = vst.msk [vmem:[#allocation0 + $0x15e0] ss:$40 sm:$0xf] %vm3_vm0, %v6632_v60  }
  0xc3   :  { %6855 = vst [vmem:[%s11716_s1 + $0x78] sm:$0x3] %v2475_v62 }
  0xc4   :  { %6860 = vst [vmem:[%s11716_s1 + $0x82] sm:$0x3] %v2505_v63 }
  0xc5   :  { %6865 = vst [vmem:[%s11716_s1 + $0x8c] sm:$0x3] %v2535_v0 }
  0xc6   :  { %6870 = vst [vmem:[%s11716_s1 + $0x96] sm:$0x3] %v2565_v1 }
  0xc7   :  { %298 = vst.msk [vmem:[#allocation0 + $0x1541] ss:$40 sm:$0xf] %vm3_vm0, %v295_v37  }
  0xc8   :  { %300 = vst.msk [vmem:[#allocation0 + $0x1541] ss:$40 sm:$0xf0] %vm3_vm0, %v295_v37  }
  0xc9   :  { %125 = vst.msk [vmem:[#allocation0 + $0x14a0] ss:$40 sm:$0xf] %vm3_vm0, %v6631_v59  }
  0xca   :  { %134 = vst.msk [vmem:[#allocation0 + $0x15e0] ss:$40 sm:$0xf0] %vm3_vm0, %v6632_v60  }
  0xcb   :  { %52 = vst.msk [vmem:[#allocation0 + $0x7d0] ss:$40 sm:$0xf0] %vm3_vm0, %v6620_v2  }
  0xcc   :  { %208 = vst.msk [vmem:[#allocation0 + $0x8c1] ss:$40 sm:$0xf] %vm3_vm0, %v8023_v38  }
  0xcd   :  { %210 = vst.msk [vmem:[#allocation0 + $0x8c1] ss:$40 sm:$0xf0] %vm3_vm0, %v8023_v38  }
  0xce   :  { %v6195_v3 = vld [vmem:[#allocation0 + $0x1540] sm:$0x3]  ;;  %v6225_v4 = vld [vmem:[#allocation0 + $0x1568] sm:$0x3]  ;;  %v6255_v5 = vld [vmem:[#allocation0 + $0x1590] sm:$0x3] }
  0xcf   :  { %7475 = vst [vmem:[%s11716_s1 + $0x550] sm:$0x3] %v6195_v3  ;;  %v6285_v6 = vld [vmem:[#allocation0 + $0x15b8] sm:$0x3]  ;;  %v6315_v9 = vld [vmem:[#allocation0 + $0x15e0] sm:$0x3] }
  0xd0   :  { %7480 = vst [vmem:[%s11716_s1 + $0x55a] sm:$0x3] %v6225_v4  ;;  %v6345_v10 = vld [vmem:[#allocation0 + $0x1608] sm:$0x3]  ;;  %v6375_v11 = vld [vmem:[#allocation0 + $0x1630] sm:$0x3] }
  0xd1   :  { %7485 = vst [vmem:[%s11716_s1 + $0x564] sm:$0x3] %v6255_v5  ;;  %v6405_v12 = vld [vmem:[#allocation0 + $0x1658] sm:$0x3] }
  0xd2   :  { %7490 = vst [vmem:[%s11716_s1 + $0x56e] sm:$0x3] %v6285_v6 }
  0xd3   :  { %7495 = vst [vmem:[%s11716_s1 + $0x578] sm:$0x3] %v6315_v9  ;;  %v3795_v13 = vld [vmem:[#allocation0 + $0x8c0] sm:$0x3]  ;;  %v3825_v14 = vld [vmem:[#allocation0 + $0x8e8] sm:$0x3] }
  0xd4   :  { %7500 = vst [vmem:[%s11716_s1 + $0x582] sm:$0x3] %v6345_v10  ;;  %v3855_v15 = vld [vmem:[#allocation0 + $0x910] sm:$0x3]  ;;  %v3885_v16 = vld [vmem:[#allocation0 + $0x938] sm:$0x3] }
  0xd5   :  { %7505 = vst [vmem:[%s11716_s1 + $0x58c] sm:$0x3] %v6375_v11  ;;  %v3915_v18 = vld [vmem:[#allocation0 + $0x960] sm:$0x3]  ;;  %v3945_v19 = vld [vmem:[#allocation0 + $0x988] sm:$0x3] }
  0xd6   :  { %7510 = vst [vmem:[%s11716_s1 + $0x596] sm:$0x3] %v6405_v12  ;;  %v3975_v20 = vld [vmem:[#allocation0 + $0x9b0] sm:$0x3]  ;;  %v4005_v21 = vld [vmem:[#allocation0 + $0x9d8] sm:$0x3]  ;;  %v8374_v12 = vpop.permute.xlu2 %441  }
  0xd7   :  { %7075 = vst [vmem:[%s11716_s1 + $0x230] sm:$0x3] %v3795_v13  ;;  %v8357_v9 = vld.sshfl [vmem:[%s11715_s0 + $0x20] sm:$0xff pattern:$0x54761032]   ;;  %v8376_v13 = vpop.permute.xlu1 %311  }
  0xd8   :  { %7080 = vst [vmem:[%s11716_s1 + $0x23a] sm:$0x3] %v3825_v14  ;;  %851 = vrot.lane.b32.xlu1 %v8357_v9, %s7557_s21  ;;  %v8367_v10 = vld.sshfl [vmem:[%s11715_s0 + $0x18] sm:$0xff pattern:$0x54761032]  }
  0xd9   :  { %7085 = vst [vmem:[%s11716_s1 + $0x244] sm:$0x3] %v3855_v15  ;;  %838 = vrot.lane.b32.xlu0 %v8367_v10, %s7557_s21 }
  0xda   :  { %7090 = vst [vmem:[%s11716_s1 + $0x24e] sm:$0x3] %v3885_v16  ;;  %v6630_v16 = vld [vmem:[%s11715_s0 + $0x88] sm:$0xff]  }
  0xdb   :  { %7095 = vst [vmem:[%s11716_s1 + $0x258] sm:$0x3] %v3915_v18 }
  0xdc   :  { %7100 = vst [vmem:[%s11716_s1 + $0x262] sm:$0x3] %v3945_v19 }
  0xdd   :  { %7105 = vst [vmem:[%s11716_s1 + $0x26c] sm:$0x3] %v3975_v20 }
  0xde   :  { %7110 = vst [vmem:[%s11716_s1 + $0x276] sm:$0x3] %v4005_v21 }
  0xdf   :  { %50 = vst.msk [vmem:[#allocation0 + $0x7d0] ss:$40 sm:$0xf] %vm3_vm0, %v6620_v2  }
  0xe0   :  { %45 = vst.msk [vmem:[#allocation0 + $0x780] ss:$40 sm:$0x3] %vm3_vm0, %v6619_v22  }
  0xe1   :  { %199 = vst.msk [vmem:[#allocation0 + $0x781] ss:$40 sm:$0xf] %vm3_vm0, %v196_v61  }
  0xe2   :  { %201 = vst.msk [vmem:[#allocation0 + $0x781] ss:$40 sm:$0xf0] %vm3_vm0, %v196_v61  }
  0xe3   :  { %328 = vst.msk [vmem:[#allocation0 + $0x1c0] ss:$-120 sm:$0x3] %vm3_vm0, %v325_v7  }
  0xe4   :  { %330 = vst.msk [vmem:[#allocation0 + $0x120] ss:$40 sm:$0xc] %vm3_vm0, %v325_v7  }
  0xe5   :  { %332 = vst.msk [vmem:[#allocation0 + $0x440] ss:$-120 sm:$0x30] %vm3_vm0, %v325_v7  }
  0xe6   :  { %334 = vst.msk [vmem:[#allocation0 + $0x120] ss:$40 sm:$0xc0] %vm3_vm0, %v325_v7  }
  0xe7   :  { %73 = vst.msk [vmem:[#allocation0 + $0xb90] ss:$40 sm:$0xf0] %vm3_vm0, %v6623_v23  }
  0xe8   :  { %v3555_v26 = vld [vmem:[#allocation0 + $0x780] sm:$0x3]  ;;  %v3585_v27 = vld [vmem:[#allocation0 + $0x7a8] sm:$0x3]  ;;  %v3615_v28 = vld [vmem:[#allocation0 + $0x7d0] sm:$0x3] }
  0xe9   :  { %7035 = vst [vmem:[%s11716_s1 + $0x1e0] sm:$0x3] %v3555_v26  ;;  %v3645_v29 = vld [vmem:[#allocation0 + $0x7f8] sm:$0x3]  ;;  %v3675_v30 = vld [vmem:[#allocation0 + $0x820] sm:$0x3]  ;;  %v8428_v26 = vpop.permute.xlu1 %350  }
  0xea   :  { %7040 = vst [vmem:[%s11716_s1 + $0x1ea] sm:$0x3] %v3585_v27  ;;  %v3705_v31 = vld [vmem:[#allocation0 + $0x848] sm:$0x3]  ;;  %v3735_v32 = vld [vmem:[#allocation0 + $0x870] sm:$0x3] }
  0xeb   :  { %7045 = vst [vmem:[%s11716_s1 + $0x1f4] sm:$0x3] %v3615_v28  ;;  %v3765_v33 = vld [vmem:[#allocation0 + $0x898] sm:$0x3] }
  0xec   :  { %7050 = vst [vmem:[%s11716_s1 + $0x1fe] sm:$0x3] %v3645_v29 }
  0xed   :  { %7055 = vst [vmem:[%s11716_s1 + $0x208] sm:$0x3] %v3675_v30 }
  0xee   :  { %7060 = vst [vmem:[%s11716_s1 + $0x212] sm:$0x3] %v3705_v31 }
  0xef   :  { %7065 = vst [vmem:[%s11716_s1 + $0x21c] sm:$0x3] %v3735_v32 }
  0xf0   :  { %7070 = vst [vmem:[%s11716_s1 + $0x226] sm:$0x3] %v3765_v33 }
  0xf1   :  { %235 = vst.msk [vmem:[#allocation0 + $0xc81] ss:$40 sm:$0xf] %vm3_vm0, %v232_v8  }
  0xf2   :  { %237 = vst.msk [vmem:[#allocation0 + $0xc81] ss:$40 sm:$0xf0] %vm3_vm0, %v232_v8   ;;  %v8347_v8 = vld.sshfl [vmem:[%s11715_s0 + $0x28] sm:$0xff pattern:$0x54761032]  }
  0xf3   :  { %71 = vst.msk [vmem:[#allocation0 + $0xb90] ss:$40 sm:$0xf] %vm3_vm0, %v6623_v23   ;;  %864 = vrot.lane.b32.xlu2 %v8347_v8, %s7557_s21 }
  0xf4   :  { %226 = vst.msk [vmem:[#allocation0 + $0xb41] ss:$40 sm:$0xf] %vm3_vm0, %v223_v17  }
  0xf5   :  { %228 = vst.msk [vmem:[#allocation0 + $0xb41] ss:$40 sm:$0xf0] %vm3_vm0, %v223_v17   ;;  %v8398_v17 = vpop.permute.xlu0 %303  }
  0xf6   :  { %367 = vst.msk [vmem:[#allocation0 + $0x580] ss:$-120 sm:$0x3] %vm3_vm0, %v8189_v24  }
  0xf7   :  { %369 = vst.msk [vmem:[#allocation0 + $0x4e0] ss:$40 sm:$0xc] %vm3_vm0, %v8189_v24  }
  0xf8   :  { %v4515_v35 = vld [vmem:[#allocation0 + $0xc80] sm:$0x3]  ;;  %v4545_v36 = vld [vmem:[#allocation0 + $0xca8] sm:$0x3]  ;;  %v4575_v37 = vld [vmem:[#allocation0 + $0xcd0] sm:$0x3] }
  0xf9   :  { %7195 = vst [vmem:[%s11716_s1 + $0x320] sm:$0x3] %v4515_v35  ;;  %v4605_v38 = vld [vmem:[#allocation0 + $0xcf8] sm:$0x3]  ;;  %v4635_v39 = vld [vmem:[#allocation0 + $0xd20] sm:$0x3] }
  0xfa   :  { %7200 = vst [vmem:[%s11716_s1 + $0x32a] sm:$0x3] %v4545_v36  ;;  %v4665_v40 = vld [vmem:[#allocation0 + $0xd48] sm:$0x3]  ;;  %v4695_v41 = vld [vmem:[#allocation0 + $0xd70] sm:$0x3] }
  0xfb   :  { %7205 = vst [vmem:[%s11716_s1 + $0x334] sm:$0x3] %v4575_v37  ;;  %v4725_v42 = vld [vmem:[#allocation0 + $0xd98] sm:$0x3]  ;;  %v4275_v43 = vld [vmem:[#allocation0 + $0xb40] sm:$0x3] }
  0xfc   :  { %7210 = vst [vmem:[%s11716_s1 + $0x33e] sm:$0x3] %v4605_v38  ;;  %v4305_v44 = vld [vmem:[#allocation0 + $0xb68] sm:$0x3]  ;;  %v4335_v45 = vld [vmem:[#allocation0 + $0xb90] sm:$0x3] }
  0xfd   :  { %7215 = vst [vmem:[%s11716_s1 + $0x348] sm:$0x3] %v4635_v39  ;;  %v4365_v46 = vld [vmem:[#allocation0 + $0xbb8] sm:$0x3]  ;;  %v4395_v47 = vld [vmem:[#allocation0 + $0xbe0] sm:$0x3]  ;;  %v8439_v32 = vpop.permute.xlu0 %337  }
  0xfe   :  { %7220 = vst [vmem:[%s11716_s1 + $0x352] sm:$0x3] %v4665_v40  ;;  %v4425_v53 = vld [vmem:[#allocation0 + $0xc08] sm:$0x3]  ;;  %v4455_v54 = vld [vmem:[#allocation0 + $0xc30] sm:$0x3] }
  0xff   :  { %7225 = vst [vmem:[%s11716_s1 + $0x35c] sm:$0x3] %v4695_v41  ;;  %v4485_v55 = vld [vmem:[#allocation0 + $0xc58] sm:$0x3] }
 0x100   :  { %7230 = vst [vmem:[%s11716_s1 + $0x366] sm:$0x3] %v4725_v42  ;;  %v8457_v35 = vld.sshfl [vmem:[%s11715_s0 + $0x3e] sm:$0xff pattern:$0x54761032]  }
 0x101   :  { %7155 = vst [vmem:[%s11716_s1 + $0x2d0] sm:$0x3] %v4275_v43  ;;  %890 = vrot.lane.b32.xlu1 %v8457_v35, %s7557_s21  ;;  %v8467_v36 = vld.sshfl [vmem:[%s11715_s0 + $0x30] sm:$0xff pattern:$0xbadc1098]  }
 0x102   :  { %7160 = vst [vmem:[%s11716_s1 + $0x2da] sm:$0x3] %v4305_v44  ;;  %877 = vrot.lane.b32.xlu0 %v8467_v36, %s7557_s21  ;;  %v8488_v41 = vld.sshfl [vmem:[%s11715_s0 + $0x5e] sm:$0xff pattern:$0x54761032]   ;;  %v390_v44 = vpop.permute.xlu1 %389  }
 0x103   :  { %7165 = vst [vmem:[%s11716_s1 + $0x2e4] sm:$0x3] %v4335_v45  ;;  %v8496_v42 = vld.sshfl [vmem:[%s11715_s0 + $0x56] sm:$0xff pattern:$0x54761032]  }
 0x104   :  { %7170 = vst [vmem:[%s11716_s1 + $0x2ee] sm:$0x3] %v4365_v46  ;;  %v8504_v43 = vld.sshfl [vmem:[%s11715_s0 + $0x4e] sm:$0xff pattern:$0x54761032]  }
 0x105   :  { %7175 = vst [vmem:[%s11716_s1 + $0x2f8] sm:$0x3] %v4395_v47  ;;  %v8518_v45 = vpop.permute.xlu0 %376   ;;  %v6633_v46 = vld [vmem:[%s11715_s0 + $0xa0] sm:$0x3]  }
 0x106   :  { %7180 = vst [vmem:[%s11716_s1 + $0x302] sm:$0x3] %v4425_v53  ;;  %v8535_v47 = vld.sshfl [vmem:[%s11715_s0 + $0x7c] sm:$0xff pattern:$0x54761032]  }
 0x107   :  { %7185 = vst [vmem:[%s11716_s1 + $0x30c] sm:$0x3] %v4455_v54  ;;  %v8552_v53 = vld.sshfl [vmem:[%s11715_s0 + $0x66] sm:$0xff pattern:$0xbadc1032]  }
 0x108   :  { %7190 = vst [vmem:[%s11716_s1 + $0x316] sm:$0x3] %v4485_v55 }
 0x109   :  { %371 = vst.msk [vmem:[#allocation0 + $0x800] ss:$-120 sm:$0x30] %vm3_vm0, %v8189_v24   ;;  %929 = vrot.lane.b32.xlu1 %v8496_v42, %s7557_s21 }
 0x10a   :  { %373 = vst.msk [vmem:[#allocation0 + $0x4e0] ss:$40 sm:$0xc0] %vm3_vm0, %v8189_v24   ;;  %916 = vrot.lane.b32.xlu0 %v8504_v43, %s7557_s21 }
 0x10b   :  { %99 = vst.msk [vmem:[#allocation0 + $0xfa0] ss:$40 sm:$0xf0] %vm3_vm0, %v6627_v56  }
 0x10c   :  { %262 = vst.msk [vmem:[#allocation0 + $0x1041] ss:$40 sm:$0xf] %vm3_vm0, %v8191_v25  }
 0x10d   :  { %264 = vst.msk [vmem:[#allocation0 + $0x1041] ss:$40 sm:$0xf0] %vm3_vm0, %v8191_v25   ;;  %v481_v25 = vpop.permute.xlu2 %480  }
 0x10e   :  { %97 = vst.msk [vmem:[#allocation0 + $0xfa0] ss:$40 sm:$0xf] %vm3_vm0, %v6627_v56  }
 0x10f   :  { %92 = vst.msk [vmem:[#allocation0 + $0xf50] ss:$40 sm:$0x3] %vm3_vm0, %v6626_v57   ;;  %v8561_v57 = vpop.permute.xlu1 %428  }
 0x110   :  { %253 = vst.msk [vmem:[#allocation0 + $0xf01] ss:$40 sm:$0xf] %vm3_vm0, %v250_v34  }
 0x111   :  { %255 = vst.msk [vmem:[#allocation0 + $0xf01] ss:$40 sm:$0xf0] %vm3_vm0, %v250_v34   ;;  %v8447_v34 = vld.sshfl [vmem:[%s11715_s0 + $0x46] sm:$0xff pattern:$0x54761032]  }
 0x112   :  { %406 = vst.msk [vmem:[#allocation0 + $0x940] ss:$-120 sm:$0x3] %vm3_vm0, %v8275_v51   ;;  %903 = vrot.lane.b32.xlu2 %v8447_v34, %s7557_s21  ;;  %955 = vrot.lane.b32.xlu0 %v8552_v53, %s7557_s21 }
 0x113   :  { %v5235_v59 = vld [vmem:[#allocation0 + $0x1040] sm:$0x3]  ;;  %v5265_v60 = vld [vmem:[#allocation0 + $0x1068] sm:$0x3]  ;;  %v5295_v61 = vld [vmem:[#allocation0 + $0x1090] sm:$0x3] }
 0x114   :  { %7315 = vst [vmem:[%s11716_s1 + $0x410] sm:$0x3] %v5235_v59  ;;  %v5325_v62 = vld [vmem:[#allocation0 + $0x10b8] sm:$0x3]  ;;  %v5355_v63 = vld [vmem:[#allocation0 + $0x10e0] sm:$0x3] }
 0x115   :  { %7320 = vst [vmem:[%s11716_s1 + $0x41a] sm:$0x3] %v5265_v60  ;;  %v5385_v0 = vld [vmem:[#allocation0 + $0x1108] sm:$0x3]  ;;  %v5415_v1 = vld [vmem:[#allocation0 + $0x1130] sm:$0x3]  ;;  %v8477_v39 = vpop.permute.xlu2 %519  }
 0x116   :  { %7325 = vst [vmem:[%s11716_s1 + $0x424] sm:$0x3] %v5295_v61  ;;  %v5445_v2 = vld [vmem:[#allocation0 + $0x1158] sm:$0x3]  ;;  %v8587_v61 = vpop.permute.xlu0 %415  }
 0x117   :  { %7330 = vst [vmem:[%s11716_s1 + $0x42e] sm:$0x3] %v5325_v62  ;;  %v4995_v3 = vld [vmem:[#allocation0 + $0xf00] sm:$0x3]  ;;  %v5025_v4 = vld [vmem:[#allocation0 + $0xf28] sm:$0x3] }
 0x118   :  { %7335 = vst [vmem:[%s11716_s1 + $0x438] sm:$0x3] %v5355_v63  ;;  %v5055_v5 = vld [vmem:[#allocation0 + $0xf50] sm:$0x3]  ;;  %v5085_v6 = vld [vmem:[#allocation0 + $0xf78] sm:$0x3] }
 0x119   :  { %7340 = vst [vmem:[%s11716_s1 + $0x442] sm:$0x3] %v5385_v0  ;;  %v5115_v7 = vld [vmem:[#allocation0 + $0xfa0] sm:$0x3]  ;;  %v5145_v11 = vld [vmem:[#allocation0 + $0xfc8] sm:$0x3] }
 0x11a   :  { %7345 = vst [vmem:[%s11716_s1 + $0x44c] sm:$0x3] %v5415_v1  ;;  %v5175_v14 = vld [vmem:[#allocation0 + $0xff0] sm:$0x3]  ;;  %v5205_v15 = vld [vmem:[#allocation0 + $0x1018] sm:$0x3]  ;;  %942 = vrot.lane.b32.xlu2 %v8488_v41, %s7557_s21 }
 0x11b   :  { %7350 = vst [vmem:[%s11716_s1 + $0x456] sm:$0x3] %v5445_v2  ;;  %v8602_v62 = vld.sshfl [vmem:[%s11715_s0 + $0x94] sm:$0xff pattern:$0x54761032]   ;;  %v8632_v2 = vpop.permute.xlu1 %467  }
 0x11c   :  { %7275 = vst [vmem:[%s11716_s1 + $0x3c0] sm:$0x3] %v4995_v3  ;;  %v8613_v0 = vld.sshfl [vmem:[%s11715_s0 + $0x8c] sm:$0xff pattern:$0x54761032]  }
 0x11d   :  { %7280 = vst [vmem:[%s11716_s1 + $0x3ca] sm:$0x3] %v5025_v4  ;;  %v8622_v1 = vld.sshfl [vmem:[%s11715_s0 + $0x84] sm:$0xff pattern:$0x54761032]  }
 0x11e   :  { %7285 = vst [vmem:[%s11716_s1 + $0x3d4] sm:$0x3] %v5055_v5  ;;  %994 = vrot.lane.b32.xlu0 %v8622_v1, %s7557_s21 }
 0x11f   :  { %7290 = vst [vmem:[%s11716_s1 + $0x3de] sm:$0x3] %v5085_v6 }
 0x120   :  { %7295 = vst [vmem:[%s11716_s1 + $0x3e8] sm:$0x3] %v5115_v7 }
 0x121   :  { %7300 = vst [vmem:[%s11716_s1 + $0x3f2] sm:$0x3] %v5145_v11  ;;  %v6705_v11 = vld.sshfl [vmem:[%s11715_s0 + $0x9c] sm:$0xff pattern:$0x55541032]  }
 0x122   :  { %7305 = vst [vmem:[%s11716_s1 + $0x3fc] sm:$0x3] %v5175_v14  ;;  %981 = vrot.lane.b32.xlu2 %v8535_v47, %s7557_s21 }
 0x123   :  { %7310 = vst [vmem:[%s11716_s1 + $0x406] sm:$0x3] %v5205_v15 }
 0x124   :  { %408 = vst.msk [vmem:[#allocation0 + $0x8a0] ss:$40 sm:$0xc] %vm3_vm0, %v8275_v51  }
 0x125   :  { %410 = vst.msk [vmem:[#allocation0 + $0xbc0] ss:$-120 sm:$0x30] %vm3_vm0, %v8275_v51  }
 0x126   :  { %412 = vst.msk [vmem:[#allocation0 + $0x8a0] ss:$40 sm:$0xc0] %vm3_vm0, %v8275_v51   ;;  %v556_v51 = vpop.permute.xlu2 %555   ;;  %1033 = vrot.lane.b32.xlu0 %v6705_v11, %s7557_s21 }
 0x127   :  { %120 = vst.msk [vmem:[#allocation0 + $0x1360] ss:$40 sm:$0xf0] %vm3_vm0, %v6630_v16  }
 0x128   :  { %289 = vst.msk [vmem:[#allocation0 + $0x1401] ss:$40 sm:$0xf] %vm3_vm0, %v8277_v52  }
 0x129   :  { %291 = vst.msk [vmem:[#allocation0 + $0x1401] ss:$40 sm:$0xf0] %vm3_vm0, %v8277_v52   ;;  %v8544_v52 = vld.sshfl [vmem:[%s11715_s0 + $0x74] sm:$0xff pattern:$0x54761032]  }
 0x12a   :  { %118 = vst.msk [vmem:[#allocation0 + $0x1360] ss:$40 sm:$0xf] %vm3_vm0, %v6630_v16   ;;  %968 = vrot.lane.b32.xlu1 %v8544_v52, %s7557_s21  ;;  %1020 = vrot.lane.b32.xlu2 %v8602_v62, %s7557_s21 }
 0x12b   :  { %280 = vst.msk [vmem:[#allocation0 + $0x12c1] ss:$40 sm:$0xf] %vm3_vm0, %v277_v58  }
 0x12c   :  { %282 = vst.msk [vmem:[#allocation0 + $0x12c1] ss:$40 sm:$0xf0] %vm3_vm0, %v277_v58  }
 0x12d   :  { %445 = vst.msk [vmem:[#allocation0 + $0xd00] ss:$-120 sm:$0x3] %vm3_vm0, %v8374_v12  }
 0x12e   :  { %447 = vst.msk [vmem:[#allocation0 + $0xc60] ss:$40 sm:$0xc] %vm3_vm0, %v8374_v12   ;;  %v8604_v63 = vpop.permute.xlu2 %594   ;;  %1069 = vrot.lane.b32.xlu0 %v8253_v48, %s7558_s23 }
 0x12f   :  { %v5955_v18 = vld [vmem:[#allocation0 + $0x1400] sm:$0x3]  ;;  %v5985_v19 = vld [vmem:[#allocation0 + $0x1428] sm:$0x3]  ;;  %v6015_v20 = vld [vmem:[#allocation0 + $0x1450] sm:$0x3] }
 0x130   :  { %7435 = vst [vmem:[%s11716_s1 + $0x500] sm:$0x3] %v5955_v18  ;;  %v6045_v21 = vld [vmem:[#allocation0 + $0x1478] sm:$0x3]  ;;  %v6075_v22 = vld [vmem:[#allocation0 + $0x14a0] sm:$0x3] }
 0x131   :  { %7440 = vst [vmem:[%s11716_s1 + $0x50a] sm:$0x3] %v5985_v19  ;;  %v6105_v23 = vld [vmem:[#allocation0 + $0x14c8] sm:$0x3]  ;;  %v6135_v24 = vld [vmem:[#allocation0 + $0x14f0] sm:$0x3] }
 0x132   :  { %7445 = vst [vmem:[%s11716_s1 + $0x514] sm:$0x3] %v6015_v20  ;;  %v6165_v27 = vld [vmem:[#allocation0 + $0x1518] sm:$0x3]  ;;  %v5715_v28 = vld [vmem:[#allocation0 + $0x12c0] sm:$0x3]  ;;  %1007 = vrot.lane.b32.xlu1 %v8613_v0, %s7557_s21  ;;  %1056 = vrot.lane.b32.xlu2 %v8263_v49, %s7558_s23  ;;  %v8652_v49 = vpop.permute.xlu0 %454  }
 0x133   :  { %7450 = vst [vmem:[%s11716_s1 + $0x51e] sm:$0x3] %v6045_v21  ;;  %v5745_v29 = vld [vmem:[#allocation0 + $0x12e8] sm:$0x3]  ;;  %v5775_v30 = vld [vmem:[#allocation0 + $0x1310] sm:$0x3] }
 0x134   :  { %7455 = vst [vmem:[%s11716_s1 + $0x528] sm:$0x3] %v6075_v22  ;;  %v5805_v31 = vld [vmem:[#allocation0 + $0x1338] sm:$0x3]  ;;  %v5835_v33 = vld [vmem:[#allocation0 + $0x1360] sm:$0x3] }
 0x135   :  { %7460 = vst [vmem:[%s11716_s1 + $0x532] sm:$0x3] %v6105_v23  ;;  %v5865_v37 = vld [vmem:[#allocation0 + $0x1388] sm:$0x3]  ;;  %v5895_v38 = vld [vmem:[#allocation0 + $0x13b0] sm:$0x3] }
 0x136   :  { %7465 = vst [vmem:[%s11716_s1 + $0x53c] sm:$0x3] %v6135_v24  ;;  %v5925_v40 = vld [vmem:[#allocation0 + $0x13d8] sm:$0x3]  ;;  %v8668_v7 = vpop.permute.xlu2 %633   ;;  %1108 = vrot.lane.b32.xlu0 %v8347_v8, %s7558_s23 }
 0x137   :  { %7470 = vst [vmem:[%s11716_s1 + $0x546] sm:$0x3] %v6165_v27 }
 0x138   :  { %7395 = vst [vmem:[%s11716_s1 + $0x4b0] sm:$0x3] %v5715_v28 }
 0x139   :  { %7400 = vst [vmem:[%s11716_s1 + $0x4ba] sm:$0x3] %v5745_v29 }
 0x13a   :  { %7405 = vst [vmem:[%s11716_s1 + $0x4c4] sm:$0x3] %v5775_v30  ;;  %1043 = vrot.lane.b32.xlu1 %v8273_v50, %s7558_s23  ;;  %1095 = vrot.lane.b32.xlu2 %v8357_v9, %s7558_s23  ;;  %v8708_v14 = vpop.permute.xlu0 %493  }
 0x13b   :  { %7410 = vst [vmem:[%s11716_s1 + $0x4ce] sm:$0x3] %v5805_v31 }
 0x13c   :  { %7415 = vst [vmem:[%s11716_s1 + $0x4d8] sm:$0x3] %v5835_v33 }
 0x13d   :  { %7420 = vst [vmem:[%s11716_s1 + $0x4e2] sm:$0x3] %v5865_v37 }
 0x13e   :  { %7425 = vst [vmem:[%s11716_s1 + $0x4ec] sm:$0x3] %v5895_v38  ;;  %v673_v18 = vpop.permute.xlu2 %672   ;;  %1147 = vrot.lane.b32.xlu0 %v8447_v34, %s7558_s23 }
 0x13f   :  { %7430 = vst [vmem:[%s11716_s1 + $0x4f6] sm:$0x3] %v5925_v40 }
 0x140   :  { %449 = vst.msk [vmem:[#allocation0 + $0xf80] ss:$-120 sm:$0x30] %vm3_vm0, %v8374_v12  }
 0x141   :  { %451 = vst.msk [vmem:[#allocation0 + $0xc60] ss:$40 sm:$0xc0] %vm3_vm0, %v8374_v12  }
 0x142   :  { %315 = vst.msk [vmem:[#allocation0 + $0x80] ss:$-120 sm:$0x3] %vm3_vm0, %v8376_v13   ;;  %1082 = vrot.lane.b32.xlu1 %v8367_v10, %s7558_s23  ;;  %1134 = vrot.lane.b32.xlu2 %v8457_v35, %s7558_s23  ;;  %v8764_v23 = vpop.permute.xlu0 %532  }
 0x143   :  { %317 = vst.msk [vmem:[#allocation0 - $0x20] ss:$40 sm:$0xc] %vm3_vm0, %v8376_v13  }
 0x144   :  { %319 = vst.msk [vmem:[#allocation0 + $0x300] ss:$-120 sm:$0x30] %vm3_vm0, %v8376_v13  }
 0x145   :  { %321 = vst.msk [vmem:[#allocation0 - $0x20] ss:$40 sm:$0xc0] %vm3_vm0, %v8376_v13   ;;  %v8698_v13 = vpop.permute.xlu1 %506  }
 0x146   :  { %139 = vst.msk [vmem:[#allocation0 + $0x1720] ss:$40 sm:$0x3] %vm3_vm0, %v6633_v46   ;;  %1186 = vrot.lane.b32.xlu0 %v8488_v41, %s7558_s23  ;;  %v712_v27 = vpop.permute.xlu2 %711  }
 0x147   :  { %307 = vst.msk [vmem:[#allocation0 + $0x1681] ss:$40 sm:$0xf] %vm3_vm0, %v8398_v17  }
 0x148   :  { %309 = vst.msk [vmem:[#allocation0 + $0x1681] ss:$40 sm:$0x30] %vm3_vm0, %v8398_v17  }
 0x149   :  { %484 = vst.msk [vmem:[#allocation0 + $0x10c0] ss:$-120 sm:$0x3] %vm3_vm0, %v481_v25  }
 0x14a   :  { %486 = vst.msk [vmem:[#allocation0 + $0x1020] ss:$40 sm:$0xc] %vm3_vm0, %v481_v25   ;;  %1121 = vrot.lane.b32.xlu1 %v8467_v36, %s7558_s23  ;;  %1173 = vrot.lane.b32.xlu2 %v8496_v42, %s7558_s23  ;;  %v8837_v34 = vpop.permute.xlu0 %568  }
 0x14b   :  { %488 = vst.msk [vmem:[#allocation0 + $0x1340] ss:$-120 sm:$0x30] %vm3_vm0, %v481_v25  }
 0x14c   :  { %490 = vst.msk [vmem:[#allocation0 + $0x1020] ss:$40 sm:$0xc0] %vm3_vm0, %v481_v25  }
 0x14d   :  { %354 = vst.msk [vmem:[#allocation0 + $0x440] ss:$-120 sm:$0x3] %vm3_vm0, %v8428_v26   ;;  %v546_v22 = vpop.permute.xlu1 %545  }
 0x14e   :  { %v6435_v54 = vld [vmem:[#allocation0 + $0x1680] sm:$0x3]  ;;  %v6465_v55 = vld [vmem:[#allocation0 + $0x16a8] sm:$0x3]  ;;  %v6495_v56 = vld [vmem:[#allocation0 + $0x16d0] sm:$0x3]  ;;  %1225 = vrot.lane.b32.xlu0 %v8535_v47, %s7558_s23 }
 0x14f   :  { %7515 = vst [vmem:[%s11716_s1 + $0x5a0] sm:$0x3] %v6435_v54  ;;  %v6525_v58 = vld [vmem:[#allocation0 + $0x16f8] sm:$0x3]  ;;  %v6555_v59 = vld [vmem:[#allocation0 + $0x1720] sm:$0x3] }
 0x150   :  { %7520 = vst [vmem:[%s11716_s1 + $0x5aa] sm:$0x3] %v6465_v55  ;;  %v6585_v60 = vld [vmem:[#allocation0 + $0x1748] sm:$0x3] }
 0x151   :  { %7525 = vst [vmem:[%s11716_s1 + $0x5b4] sm:$0x3] %v6495_v56 }
 0x152   :  { %7530 = vst [vmem:[%s11716_s1 + $0x5be] sm:$0x3] %v6525_v58  ;;  %1160 = vrot.lane.b32.xlu1 %v8504_v43, %s7558_s23  ;;  %1212 = vrot.lane.b32.xlu2 %v8544_v52, %s7558_s23 }
 0x153   :  { %7535 = vst [vmem:[%s11716_s1 + $0x5c8] sm:$0x3] %v6555_v59 }
 0x154   :  { %7540 = vst [vmem:[%s11716_s1 + $0x5d2] sm:$0x3] %v6585_v60 }
 0x155   :  { %356 = vst.msk [vmem:[#allocation0 + $0x3a0] ss:$40 sm:$0xc] %vm3_vm0, %v8428_v26   ;;  %v582_v33 = vpop.permute.xlu1 %581  }
 0x156   :  { %358 = vst.msk [vmem:[#allocation0 + $0x6c0] ss:$-120 sm:$0x30] %vm3_vm0, %v8428_v26   ;;  %1264 = vrot.lane.b32.xlu0 %v8602_v62, %s7558_s23 }
 0x157   :  { %360 = vst.msk [vmem:[#allocation0 + $0x3a0] ss:$40 sm:$0xc0] %vm3_vm0, %v8428_v26  }
 0x158   :  { %341 = vst.msk [vmem:[#allocation0 + $0x300] ss:$-120 sm:$0x3] %vm3_vm0, %v8439_v32  }
 0x159   :  { %343 = vst.msk [vmem:[#allocation0 + $0x260] ss:$40 sm:$0xc] %vm3_vm0, %v8439_v32  }
 0x15a   :  { %345 = vst.msk [vmem:[#allocation0 + $0x580] ss:$-120 sm:$0x30] %vm3_vm0, %v8439_v32   ;;  %1199 = vrot.lane.b32.xlu1 %v8552_v53, %s7558_s23  ;;  %1251 = vrot.lane.b32.xlu2 %v8613_v0, %s7558_s23 }
 0x15b   :  { %347 = vst.msk [vmem:[#allocation0 + $0x260] ss:$40 sm:$0xc0] %vm3_vm0, %v8439_v32  }
 0x15c   :  { %523 = vst.msk [vmem:[#allocation0 + $0x1480] ss:$-120 sm:$0x3] %vm3_vm0, %v8477_v39  }
 0x15d   :  { %525 = vst.msk [vmem:[#allocation0 + $0x13e0] ss:$40 sm:$0xc] %vm3_vm0, %v8477_v39   ;;  %v8887_v47 = vpop.permute.xlu1 %620  }
 0x15e   :  { %527 = vst.msk [vmem:[#allocation0 + $0x1700] ss:$-120 sm:$0x30] %vm3_vm0, %v8477_v39  }
 0x15f   :  { %529 = vst.msk [vmem:[#allocation0 + $0x13e0] ss:$40 sm:$0xc0] %vm3_vm0, %v8477_v39  }
 0x160   :  { %393 = vst.msk [vmem:[#allocation0 + $0x800] ss:$-120 sm:$0x3] %vm3_vm0, %v390_v44  }
 0x161   :  { %395 = vst.msk [vmem:[#allocation0 + $0x760] ss:$40 sm:$0xc] %vm3_vm0, %v390_v44  }
 0x162   :  { %397 = vst.msk [vmem:[#allocation0 + $0xa80] ss:$-120 sm:$0x30] %vm3_vm0, %v390_v44   ;;  %1238 = vrot.lane.b32.xlu1 %v8622_v1, %s7558_s23 }
 0x163   :  { %399 = vst.msk [vmem:[#allocation0 + $0x760] ss:$40 sm:$0xc0] %vm3_vm0, %v390_v44   ;;  %v751_v44 = vpop.permute.xlu2 %750  }
 0x164   :  { %380 = vst.msk [vmem:[#allocation0 + $0x6c0] ss:$-120 sm:$0x3] %vm3_vm0, %v8518_v45  }
 0x165   :  { %382 = vst.msk [vmem:[#allocation0 + $0x620] ss:$40 sm:$0xc] %vm3_vm0, %v8518_v45  }
 0x166   :  { %384 = vst.msk [vmem:[#allocation0 + $0x940] ss:$-120 sm:$0x30] %vm3_vm0, %v8518_v45  }
 0x167   :  { %386 = vst.msk [vmem:[#allocation0 + $0x620] ss:$40 sm:$0xc0] %vm3_vm0, %v8518_v45  }
 0x168   :  { %559 = vst.msk [vmem:[#allocation0 + $0x81] ss:$-120 sm:$0x3] %vm3_vm0, %v556_v51  }
 0x169   :  { %561 = vst.msk [vmem:[#allocation0 - $0x1f] ss:$40 sm:$0xc] %vm3_vm0, %v556_v51  }
 0x16a   :  { %563 = vst.msk [vmem:[#allocation0 + $0x301] ss:$-120 sm:$0x30] %vm3_vm0, %v556_v51   ;;  %1277 = vrot.lane.b32.xlu1 %v6705_v11, %s7558_s23 }
 0x16b   :  { %565 = vst.msk [vmem:[#allocation0 - $0x1f] ss:$40 sm:$0xc0] %vm3_vm0, %v556_v51  }
 0x16c   :  { %432 = vst.msk [vmem:[#allocation0 + $0xbc0] ss:$-120 sm:$0x3] %vm3_vm0, %v8561_v57  }
 0x16d   :  { %434 = vst.msk [vmem:[#allocation0 + $0xb20] ss:$40 sm:$0xc] %vm3_vm0, %v8561_v57  }
 0x16e   :  { %436 = vst.msk [vmem:[#allocation0 + $0xe40] ss:$-120 sm:$0x30] %vm3_vm0, %v8561_v57  }
 0x16f   :  { %v2121_v50 = vld [vmem:[#allocation0 + $0x8] sm:$0x3]  ;;  %v2211_v3 = vld [vmem:[#allocation0 + $0x80] sm:$0x3] }
 0x170   :  { %6796 = vst [vmem:[%s11716_s1 + $0x2] sm:$0x3] %v2121_v50  ;;  %v2151_v4 = vld [vmem:[#allocation0 + $0x30] sm:$0x3]  ;;  %v2181_v5 = vld [vmem:[#allocation0 + $0x58] sm:$0x3] }
 0x171   :  { %6801 = vst [vmem:[%s11716_s1 + $0xc] sm:$0x3] %v2151_v4  ;;  %v2241_v6 = vld [vmem:[#allocation0 + $0xa8] sm:$0x3]  ;;  %v2331_v12 = vld [vmem:[#allocation0 + $0x120] sm:$0x3] }
 0x172   :  { %6806 = vst [vmem:[%s11716_s1 + $0x16] sm:$0x3] %v2181_v5  ;;  %v2271_v9 = vld [vmem:[#allocation0 + $0xd0] sm:$0x3]  ;;  %v2301_v10 = vld [vmem:[#allocation0 + $0xf8] sm:$0x3] }
 0x173   :  { %6811 = vst [vmem:[%s11716_s1 + $0x20] sm:$0x3] %v2211_v3 }
 0x174   :  { %6816 = vst [vmem:[%s11716_s1 + $0x2a] sm:$0x3] %v2241_v6 }
 0x175   :  { %6821 = vst [vmem:[%s11716_s1 + $0x34] sm:$0x3] %v2271_v9 }
 0x176   :  { %6826 = vst [vmem:[%s11716_s1 + $0x3e] sm:$0x3] %v2301_v10  ;;  %v790_v10 = vpop.permute.xlu2 %789  }
 0x177   :  { %6831 = vst [vmem:[%s11716_s1 + $0x48] sm:$0x3] %v2331_v12 }
 0x178   :  { %438 = vst.msk [vmem:[#allocation0 + $0xb20] ss:$40 sm:$0xc0] %vm3_vm0, %v8561_v57  }
 0x179   :  { %419 = vst.msk [vmem:[#allocation0 + $0xa80] ss:$-120 sm:$0x3] %vm3_vm0, %v8587_v61  }
 0x17a   :  { %421 = vst.msk [vmem:[#allocation0 + $0x9e0] ss:$40 sm:$0xc] %vm3_vm0, %v8587_v61  }
 0x17b   :  { %423 = vst.msk [vmem:[#allocation0 + $0xd00] ss:$-120 sm:$0x30] %vm3_vm0, %v8587_v61  }
 0x17c   :  { %425 = vst.msk [vmem:[#allocation0 + $0x9e0] ss:$40 sm:$0xc0] %vm3_vm0, %v8587_v61  }
 0x17d   :  { %598 = vst.msk [vmem:[#allocation0 + $0x441] ss:$-120 sm:$0x3] %vm3_vm0, %v8604_v63  }
 0x17e   :  { %600 = vst.msk [vmem:[#allocation0 + $0x3a1] ss:$40 sm:$0xc] %vm3_vm0, %v8604_v63  }
 0x17f   :  { %602 = vst.msk [vmem:[#allocation0 + $0x6c1] ss:$-120 sm:$0x30] %vm3_vm0, %v8604_v63  }
 0x180   :  { %604 = vst.msk [vmem:[#allocation0 + $0x3a1] ss:$40 sm:$0xc0] %vm3_vm0, %v8604_v63   ;;  %v8920_v63 = vpop.permute.xlu0 %607  }
 0x181   :  { %471 = vst.msk [vmem:[#allocation0 + $0xf80] ss:$-120 sm:$0x3] %vm3_vm0, %v8632_v2  }
 0x182   :  { %473 = vst.msk [vmem:[#allocation0 + $0xee0] ss:$40 sm:$0xc] %vm3_vm0, %v8632_v2  }
 0x183   :  { %475 = vst.msk [vmem:[#allocation0 + $0x1200] ss:$-120 sm:$0x30] %vm3_vm0, %v8632_v2  }
 0x184   :  { %v2841_v48 = vld [vmem:[#allocation0 + $0x3c8] sm:$0x3]  ;;  %v2931_v15 = vld [vmem:[#allocation0 + $0x440] sm:$0x3] }
 0x185   :  { %6916 = vst [vmem:[%s11716_s1 + $0xf2] sm:$0x3] %v2841_v48  ;;  %v2871_v8 = vld [vmem:[#allocation0 + $0x3f0] sm:$0x3]  ;;  %v2901_v16 = vld [vmem:[#allocation0 + $0x418] sm:$0x3] }
 0x186   :  { %6921 = vst [vmem:[%s11716_s1 + $0xfc] sm:$0x3] %v2871_v8  ;;  %v2961_v17 = vld [vmem:[#allocation0 + $0x468] sm:$0x3]  ;;  %v3051_v21 = vld [vmem:[#allocation0 + $0x4e0] sm:$0x3] }
 0x187   :  { %6926 = vst [vmem:[%s11716_s1 + $0x106] sm:$0x3] %v2901_v16  ;;  %v2991_v19 = vld [vmem:[#allocation0 + $0x490] sm:$0x3]  ;;  %v3021_v20 = vld [vmem:[#allocation0 + $0x4b8] sm:$0x3] }
 0x188   :  { %6931 = vst [vmem:[%s11716_s1 + $0x110] sm:$0x3] %v2931_v15  ;;  %v8989_v8 = vpop.permute.xlu0 %646  }
 0x189   :  { %6936 = vst [vmem:[%s11716_s1 + $0x11a] sm:$0x3] %v2961_v17 }
 0x18a   :  { %6941 = vst [vmem:[%s11716_s1 + $0x124] sm:$0x3] %v2991_v19 }
 0x18b   :  { %6946 = vst [vmem:[%s11716_s1 + $0x12e] sm:$0x3] %v3021_v20 }
 0x18c   :  { %6951 = vst [vmem:[%s11716_s1 + $0x138] sm:$0x3] %v3051_v21 }
 0x18d   :  { %477 = vst.msk [vmem:[#allocation0 + $0xee0] ss:$40 sm:$0xc0] %vm3_vm0, %v8632_v2  }
 0x18e   :  { %458 = vst.msk [vmem:[#allocation0 + $0xe40] ss:$-120 sm:$0x3] %vm3_vm0, %v8652_v49  }
 0x18f   :  { %460 = vst.msk [vmem:[#allocation0 + $0xda0] ss:$40 sm:$0xc] %vm3_vm0, %v8652_v49  }
 0x190   :  { %462 = vst.msk [vmem:[#allocation0 + $0x10c0] ss:$-120 sm:$0x30] %vm3_vm0, %v8652_v49  }
 0x191   :  { %464 = vst.msk [vmem:[#allocation0 + $0xda0] ss:$40 sm:$0xc0] %vm3_vm0, %v8652_v49  }
 0x192   :  { %637 = vst.msk [vmem:[#allocation0 + $0x801] ss:$-120 sm:$0x3] %vm3_vm0, %v8668_v7  }
 0x193   :  { %639 = vst.msk [vmem:[#allocation0 + $0x761] ss:$40 sm:$0xc] %vm3_vm0, %v8668_v7  }
 0x194   :  { %641 = vst.msk [vmem:[#allocation0 + $0xa81] ss:$-120 sm:$0x30] %vm3_vm0, %v8668_v7  }
 0x195   :  { %643 = vst.msk [vmem:[#allocation0 + $0x761] ss:$40 sm:$0xc0] %vm3_vm0, %v8668_v7  }
 0x196   :  { %510 = vst.msk [vmem:[#allocation0 + $0x1340] ss:$-120 sm:$0x3] %vm3_vm0, %v8698_v13  }
 0x197   :  { %512 = vst.msk [vmem:[#allocation0 + $0x12a0] ss:$40 sm:$0xc] %vm3_vm0, %v8698_v13  }
 0x198   :  { %514 = vst.msk [vmem:[#allocation0 + $0x15c0] ss:$-120 sm:$0x30] %vm3_vm0, %v8698_v13  }
 0x199   :  { %v3561_v24 = vld [vmem:[#allocation0 + $0x788] sm:$0x3]  ;;  %v3651_v28 = vld [vmem:[#allocation0 + $0x800] sm:$0x3] }
 0x19a   :  { %v3591_v25 = vld [vmem:[#allocation0 + $0x7b0] sm:$0x3]  ;;  %v3621_v26 = vld [vmem:[#allocation0 + $0x7d8] sm:$0x3]  ;;  %7036 = vst [vmem:[%s11716_s1 + $0x1e2] sm:$0x3] %v3561_v24 }
 0x19b   :  { %7041 = vst [vmem:[%s11716_s1 + $0x1ec] sm:$0x3] %v3591_v25  ;;  %v3681_v29 = vld [vmem:[#allocation0 + $0x828] sm:$0x3]  ;;  %v3771_v32 = vld [vmem:[#allocation0 + $0x8a0] sm:$0x3] }
 0x19c   :  { %7046 = vst [vmem:[%s11716_s1 + $0x1f6] sm:$0x3] %v3621_v26  ;;  %v3711_v30 = vld [vmem:[#allocation0 + $0x850] sm:$0x3]  ;;  %v3741_v31 = vld [vmem:[#allocation0 + $0x878] sm:$0x3] }
 0x19d   :  { %516 = vst.msk [vmem:[#allocation0 + $0x12a0] ss:$40 sm:$0xc0] %vm3_vm0, %v8698_v13   ;;  %v660_v13 = vpop.permute.xlu1 %659  }
 0x19e   :  { %7051 = vst [vmem:[%s11716_s1 + $0x200] sm:$0x3] %v3651_v28 }
 0x19f   :  { %7056 = vst [vmem:[%s11716_s1 + $0x20a] sm:$0x3] %v3681_v29 }
 0x1a0   :  { %7061 = vst [vmem:[%s11716_s1 + $0x214] sm:$0x3] %v3711_v30 }
 0x1a1   :  { %7066 = vst [vmem:[%s11716_s1 + $0x21e] sm:$0x3] %v3741_v31 }
 0x1a2   :  { %7071 = vst [vmem:[%s11716_s1 + $0x228] sm:$0x3] %v3771_v32 }
 0x1a3   :  { %497 = vst.msk [vmem:[#allocation0 + $0x1200] ss:$-120 sm:$0x3] %vm3_vm0, %v8708_v14  }
 0x1a4   :  { %499 = vst.msk [vmem:[#allocation0 + $0x1160] ss:$40 sm:$0xc] %vm3_vm0, %v8708_v14  }
 0x1a5   :  { %501 = vst.msk [vmem:[#allocation0 + $0x1480] ss:$-120 sm:$0x30] %vm3_vm0, %v8708_v14  }
 0x1a6   :  { %503 = vst.msk [vmem:[#allocation0 + $0x1160] ss:$40 sm:$0xc0] %vm3_vm0, %v8708_v14  }
 0x1a7   :  { %676 = vst.msk [vmem:[#allocation0 + $0xbc1] ss:$-120 sm:$0x3] %vm3_vm0, %v673_v18  }
 0x1a8   :  { %678 = vst.msk [vmem:[#allocation0 + $0xb21] ss:$40 sm:$0xc] %vm3_vm0, %v673_v18  }
 0x1a9   :  { %680 = vst.msk [vmem:[#allocation0 + $0xe41] ss:$-120 sm:$0x30] %vm3_vm0, %v673_v18  }
 0x1aa   :  { %682 = vst.msk [vmem:[#allocation0 + $0xb21] ss:$40 sm:$0xc0] %vm3_vm0, %v673_v18  }
 0x1ab   :  { %549 = vst.msk [vmem:[#allocation0 + $0x1700] ss:$-120 sm:$0x3] %vm3_vm0, %v546_v22  }
 0x1ac   :  { %551 = vst.msk [vmem:[#allocation0 + $0x1660] ss:$40 sm:$0xc] %vm3_vm0, %v546_v22  }
 0x1ad   :  { %553 = vst.msk [vmem:[#allocation0 + $0x1688] ss:$40 sm:$0x30] %vm3_vm0, %v546_v22  }
 0x1ae   :  { %v4281_v35 = vld [vmem:[#allocation0 + $0xb48] sm:$0x3]  ;;  %v4371_v36 = vld [vmem:[#allocation0 + $0xbc0] sm:$0x3] }
 0x1af   :  { %v4311_v37 = vld [vmem:[#allocation0 + $0xb70] sm:$0x3]  ;;  %v4341_v38 = vld [vmem:[#allocation0 + $0xb98] sm:$0x3]  ;;  %7156 = vst [vmem:[%s11716_s1 + $0x2d2] sm:$0x3] %v4281_v35 }
 0x1b0   :  { %v4401_v39 = vld [vmem:[#allocation0 + $0xbe8] sm:$0x3]  ;;  %7161 = vst [vmem:[%s11716_s1 + $0x2dc] sm:$0x3] %v4311_v37  ;;  %v4491_v42 = vld [vmem:[#allocation0 + $0xc60] sm:$0x3] }
 0x1b1   :  { %v4431_v40 = vld [vmem:[#allocation0 + $0xc10] sm:$0x3]  ;;  %7166 = vst [vmem:[%s11716_s1 + $0x2e6] sm:$0x3] %v4341_v38  ;;  %v4461_v41 = vld [vmem:[#allocation0 + $0xc38] sm:$0x3] }
 0x1b2   :  { %7171 = vst [vmem:[%s11716_s1 + $0x2f0] sm:$0x3] %v4371_v36 }
 0x1b3   :  { %7176 = vst [vmem:[%s11716_s1 + $0x2fa] sm:$0x3] %v4401_v39 }
 0x1b4   :  { %7181 = vst [vmem:[%s11716_s1 + $0x304] sm:$0x3] %v4431_v40  ;;  %v9077_v40 = vpop.permute.xlu0 %685  }
 0x1b5   :  { %7186 = vst [vmem:[%s11716_s1 + $0x30e] sm:$0x3] %v4461_v41 }
 0x1b6   :  { %7191 = vst [vmem:[%s11716_s1 + $0x318] sm:$0x3] %v4491_v42 }
 0x1b7   :  { %536 = vst.msk [vmem:[#allocation0 + $0x15c0] ss:$-120 sm:$0x3] %vm3_vm0, %v8764_v23  }
 0x1b8   :  { %538 = vst.msk [vmem:[#allocation0 + $0x1520] ss:$40 sm:$0xc] %vm3_vm0, %v8764_v23  }
 0x1b9   :  { %540 = vst.msk [vmem:[#allocation0 + $0x1840] ss:$-120 sm:$0x30] %vm3_vm0, %v8764_v23  }
 0x1ba   :  { %542 = vst.msk [vmem:[#allocation0 + $0x1520] ss:$40 sm:$0xc0] %vm3_vm0, %v8764_v23  }
 0x1bb   :  { %715 = vst.msk [vmem:[#allocation0 + $0xf81] ss:$-120 sm:$0x3] %vm3_vm0, %v712_v27  }
 0x1bc   :  { %717 = vst.msk [vmem:[#allocation0 + $0xee1] ss:$40 sm:$0xc] %vm3_vm0, %v712_v27  }
 0x1bd   :  { %719 = vst.msk [vmem:[#allocation0 + $0x1201] ss:$-120 sm:$0x30] %vm3_vm0, %v712_v27  }
 0x1be   :  { %721 = vst.msk [vmem:[#allocation0 + $0xee1] ss:$40 sm:$0xc0] %vm3_vm0, %v712_v27  }
 0x1bf   :  { %585 = vst.msk [vmem:[#allocation0 + $0x301] ss:$-120 sm:$0x3] %vm3_vm0, %v582_v33  }
 0x1c0   :  { %587 = vst.msk [vmem:[#allocation0 + $0x261] ss:$40 sm:$0xc] %vm3_vm0, %v582_v33  }
 0x1c1   :  { %589 = vst.msk [vmem:[#allocation0 + $0x581] ss:$-120 sm:$0x30] %vm3_vm0, %v582_v33  }
 0x1c2   :  { %v5001_v43 = vld [vmem:[#allocation0 + $0xf08] sm:$0x3]  ;;  %591 = vst.msk [vmem:[#allocation0 + $0x261] ss:$40 sm:$0xc0] %vm3_vm0, %v582_v33   ;;  %v9061_v33 = vpop.permute.xlu2 %825  }
 0x1c3   :  { %v5031_v45 = vld [vmem:[#allocation0 + $0xf30] sm:$0x3]  ;;  %v5061_v46 = vld [vmem:[#allocation0 + $0xf58] sm:$0x3]  ;;  %7276 = vst [vmem:[%s11716_s1 + $0x3c2] sm:$0x3] %v5001_v43 }
 0x1c4   :  { %7281 = vst [vmem:[%s11716_s1 + $0x3cc] sm:$0x3] %v5031_v45  ;;  %v5091_v59 = vld [vmem:[#allocation0 + $0xf80] sm:$0x3]  ;;  %v5121_v60 = vld [vmem:[#allocation0 + $0xfa8] sm:$0x3] }
 0x1c5   :  { %v5151_v51 = vld [vmem:[#allocation0 + $0xfd0] sm:$0x3]  ;;  %v5181_v52 = vld [vmem:[#allocation0 + $0xff8] sm:$0x3]  ;;  %7286 = vst [vmem:[%s11716_s1 + $0x3d6] sm:$0x3] %v5061_v46 }
 0x1c6   :  { %7301 = vst [vmem:[%s11716_s1 + $0x3f4] sm:$0x3] %v5151_v51  ;;  %v2601_v53 = vld [vmem:[#allocation0 + $0x288] sm:$0x3]  ;;  %v2691_v56 = vld [vmem:[#allocation0 + $0x300] sm:$0x3] }
 0x1c7   :  { %7306 = vst [vmem:[%s11716_s1 + $0x3fe] sm:$0x3] %v5181_v52  ;;  %v2631_v54 = vld [vmem:[#allocation0 + $0x2b0] sm:$0x3]  ;;  %v2661_v55 = vld [vmem:[#allocation0 + $0x2d8] sm:$0x3] }
 0x1c8   :  { %6876 = vst [vmem:[%s11716_s1 + $0xa2] sm:$0x3] %v2601_v53  ;;  %v2721_v57 = vld [vmem:[#allocation0 + $0x328] sm:$0x3]  ;;  %v2811_v58 = vld [vmem:[#allocation0 + $0x3a0] sm:$0x3] }
 0x1c9   :  { %6881 = vst [vmem:[%s11716_s1 + $0xac] sm:$0x3] %v2631_v54  ;;  %v2751_v61 = vld [vmem:[#allocation0 + $0x350] sm:$0x3]  ;;  %v2781_v62 = vld [vmem:[#allocation0 + $0x378] sm:$0x3] }
 0x1ca   :  { %6886 = vst [vmem:[%s11716_s1 + $0xb6] sm:$0x3] %v2661_v55  ;;  %v5211_v0 = vld [vmem:[#allocation0 + $0x1020] sm:$0x3] }
 0x1cb   :  { %6891 = vst [vmem:[%s11716_s1 + $0xc0] sm:$0x3] %v2691_v56 }
 0x1cc   :  { %6896 = vst [vmem:[%s11716_s1 + $0xca] sm:$0x3] %v2721_v57 }
 0x1cd   :  { %6911 = vst [vmem:[%s11716_s1 + $0xe8] sm:$0x3] %v2811_v58  ;;  %v9132_v58 = vld.sshfl [vmem:[%s11715_s0] sm:$0xff pattern:$0x47650321]  }
 0x1ce   :  { %7291 = vst [vmem:[%s11716_s1 + $0x3e0] sm:$0x3] %v5091_v59  ;;  %1287 = vrot.lane.b32.xlu2 %v9132_v58, %s7559_s19 }
 0x1cf   :  { %6901 = vst [vmem:[%s11716_s1 + $0xd4] sm:$0x3] %v2751_v61  ;;  %v9142_v61 = vpop.permute.xlu2 %864  }
 0x1d0   :  { %6906 = vst [vmem:[%s11716_s1 + $0xde] sm:$0x3] %v2781_v62 }
 0x1d1   :  { %7296 = vst [vmem:[%s11716_s1 + $0x3ea] sm:$0x3] %v5121_v60 }
 0x1d2   :  { %7311 = vst [vmem:[%s11716_s1 + $0x408] sm:$0x3] %v5211_v0  ;;  %v9168_v0 = vpop.permute.xlu0 %724  }
 0x1d3   :  { %572 = vst.msk [vmem:[#allocation0 + $0x1c1] ss:$-120 sm:$0x3] %vm3_vm0, %v8837_v34  }
 0x1d4   :  { %574 = vst.msk [vmem:[#allocation0 + $0x121] ss:$40 sm:$0xc] %vm3_vm0, %v8837_v34  }
 0x1d5   :  { %576 = vst.msk [vmem:[#allocation0 + $0x441] ss:$-120 sm:$0x30] %vm3_vm0, %v8837_v34  }
 0x1d6   :  { %578 = vst.msk [vmem:[#allocation0 + $0x121] ss:$40 sm:$0xc0] %vm3_vm0, %v8837_v34   ;;  %v9063_v34 = vpop.permute.xlu1 %698  }
 0x1d7   :  { %754 = vst.msk [vmem:[#allocation0 + $0x1341] ss:$-120 sm:$0x3] %vm3_vm0, %v751_v44  }
 0x1d8   :  { %756 = vst.msk [vmem:[#allocation0 + $0x12a1] ss:$40 sm:$0xc] %vm3_vm0, %v751_v44  }
 0x1d9   :  { %758 = vst.msk [vmem:[#allocation0 + $0x15c1] ss:$-120 sm:$0x30] %vm3_vm0, %v751_v44  }
 0x1da   :  { %v2361_v1 = vld [vmem:[#allocation0 + $0x148] sm:$0x3]  ;;  %v2451_v2 = vld [vmem:[#allocation0 + $0x1c0] sm:$0x3] }
 0x1db   :  { %6836 = vst [vmem:[%s11716_s1 + $0x52] sm:$0x3] %v2361_v1  ;;  %v2391_v49 = vld [vmem:[#allocation0 + $0x170] sm:$0x3]  ;;  %v2421_v50 = vld [vmem:[#allocation0 + $0x198] sm:$0x3] }
 0x1dc   :  { %6841 = vst [vmem:[%s11716_s1 + $0x5c] sm:$0x3] %v2391_v49  ;;  %v2481_v3 = vld [vmem:[#allocation0 + $0x1e8] sm:$0x3]  ;;  %v2571_v6 = vld [vmem:[#allocation0 + $0x260] sm:$0x3] }
 0x1dd   :  { %6846 = vst [vmem:[%s11716_s1 + $0x66] sm:$0x3] %v2421_v50  ;;  %v2511_v4 = vld [vmem:[#allocation0 + $0x210] sm:$0x3]  ;;  %v2541_v5 = vld [vmem:[#allocation0 + $0x238] sm:$0x3] }
 0x1de   :  { %6851 = vst [vmem:[%s11716_s1 + $0x70] sm:$0x3] %v2451_v2  ;;  %v5721_v7 = vld [vmem:[#allocation0 + $0x12c8] sm:$0x3]  ;;  %v5811_v12 = vld [vmem:[#allocation0 + $0x1340] sm:$0x3]  ;;  %v9144_v62 = vpop.permute.xlu1 %737  }
 0x1df   :  { %6856 = vst [vmem:[%s11716_s1 + $0x7a] sm:$0x3] %v2481_v3  ;;  %v5751_v9 = vld [vmem:[#allocation0 + $0x12f0] sm:$0x3]  ;;  %v5781_v11 = vld [vmem:[#allocation0 + $0x1318] sm:$0x3] }
 0x1e0   :  { %6861 = vst [vmem:[%s11716_s1 + $0x84] sm:$0x3] %v2511_v4  ;;  %v5841_v14 = vld [vmem:[#allocation0 + $0x1368] sm:$0x3]  ;;  %v5931_v16 = vld [vmem:[#allocation0 + $0x13e0] sm:$0x3] }
 0x1e1   :  { %6866 = vst [vmem:[%s11716_s1 + $0x8e] sm:$0x3] %v2541_v5 }
 0x1e2   :  { %6871 = vst [vmem:[%s11716_s1 + $0x98] sm:$0x3] %v2571_v6 }
 0x1e3   :  { %760 = vst.msk [vmem:[#allocation0 + $0x12a1] ss:$40 sm:$0xc0] %vm3_vm0, %v751_v44  }
 0x1e4   :  { %7396 = vst [vmem:[%s11716_s1 + $0x4b2] sm:$0x3] %v5721_v7 }
 0x1e5   :  { %7401 = vst [vmem:[%s11716_s1 + $0x4bc] sm:$0x3] %v5751_v9 }
 0x1e6   :  { %7406 = vst [vmem:[%s11716_s1 + $0x4c6] sm:$0x3] %v5781_v11 }
 0x1e7   :  { %7411 = vst [vmem:[%s11716_s1 + $0x4d0] sm:$0x3] %v5811_v12 }
 0x1e8   :  { %624 = vst.msk [vmem:[#allocation0 + $0x6c1] ss:$-120 sm:$0x3] %vm3_vm0, %v8887_v47  }
 0x1e9   :  { %626 = vst.msk [vmem:[#allocation0 + $0x621] ss:$40 sm:$0xc] %vm3_vm0, %v8887_v47  }
 0x1ea   :  { %v5871_v48 = vld [vmem:[#allocation0 + $0x1390] sm:$0x3]  ;;  %v5901_v15 = vld [vmem:[#allocation0 + $0x13b8] sm:$0x3]  ;;  %7416 = vst [vmem:[%s11716_s1 + $0x4da] sm:$0x3] %v5841_v14 }
 0x1eb   :  { %7421 = vst [vmem:[%s11716_s1 + $0x4e4] sm:$0x3] %v5871_v48  ;;  %v9231_v14 = vld.sshfl [vmem:[%s11715_s0 + $0x8] sm:$0xff pattern:$0x47650321]  }
 0x1ec   :  { %7426 = vst [vmem:[%s11716_s1 + $0x4ee] sm:$0x3] %v5901_v15  ;;  %1300 = vrot.lane.b32.xlu0 %v9231_v14, %s7559_s19 }
 0x1ed   :  { %628 = vst.msk [vmem:[#allocation0 + $0x941] ss:$-120 sm:$0x30] %vm3_vm0, %v8887_v47  }
 0x1ee   :  { %630 = vst.msk [vmem:[#allocation0 + $0x621] ss:$40 sm:$0xc0] %vm3_vm0, %v8887_v47  }
 0x1ef   :  { %v3321_v17 = vld [vmem:[#allocation0 + $0x648] sm:$0x3]  ;;  %7431 = vst [vmem:[%s11716_s1 + $0x4f8] sm:$0x3] %v5931_v16  ;;  %v3411_v28 = vld [vmem:[#allocation0 + $0x6c0] sm:$0x3]  ;;  %v9241_v16 = vpop.permute.xlu2 %903  }
 0x1f0   :  { %6996 = vst [vmem:[%s11716_s1 + $0x192] sm:$0x3] %v3321_v17  ;;  %v3351_v18 = vld [vmem:[#allocation0 + $0x670] sm:$0x3]  ;;  %v3381_v19 = vld [vmem:[#allocation0 + $0x698] sm:$0x3]  ;;  %v9243_v17 = vpop.permute.xlu1 %776  }
 0x1f1   :  { %611 = vst.msk [vmem:[#allocation0 + $0x581] ss:$-120 sm:$0x3] %vm3_vm0, %v8920_v63  }
 0x1f2   :  { %613 = vst.msk [vmem:[#allocation0 + $0x4e1] ss:$40 sm:$0xc] %vm3_vm0, %v8920_v63  }
 0x1f3   :  { %615 = vst.msk [vmem:[#allocation0 + $0x801] ss:$-120 sm:$0x30] %vm3_vm0, %v8920_v63  }
 0x1f4   :  { %7001 = vst [vmem:[%s11716_s1 + $0x19c] sm:$0x3] %v3351_v18  ;;  %v3441_v29 = vld [vmem:[#allocation0 + $0x6e8] sm:$0x3]  ;;  %v3531_v32 = vld [vmem:[#allocation0 + $0x760] sm:$0x3] }
 0x1f5   :  { %v3471_v20 = vld [vmem:[#allocation0 + $0x710] sm:$0x3]  ;;  %v3501_v21 = vld [vmem:[#allocation0 + $0x738] sm:$0x3]  ;;  %7006 = vst [vmem:[%s11716_s1 + $0x1a6] sm:$0x3] %v3381_v19  ;;  %v9267_v19 = vpop.permute.xlu0 %763  }
 0x1f6   :  { %7021 = vst [vmem:[%s11716_s1 + $0x1c4] sm:$0x3] %v3471_v20 }
 0x1f7   :  { %7026 = vst [vmem:[%s11716_s1 + $0x1ce] sm:$0x3] %v3501_v21 }
 0x1f8   :  { %617 = vst.msk [vmem:[#allocation0 + $0x4e1] ss:$40 sm:$0xc0] %vm3_vm0, %v8920_v63   ;;  %v3081_v22 = vld [vmem:[#allocation0 + $0x508] sm:$0x3] }
 0x1f9   :  { %6956 = vst [vmem:[%s11716_s1 + $0x142] sm:$0x3] %v3081_v22  ;;  %v3111_v23 = vld [vmem:[#allocation0 + $0x530] sm:$0x3]  ;;  %v3141_v24 = vld [vmem:[#allocation0 + $0x558] sm:$0x3] }
 0x1fa   :  { %6961 = vst [vmem:[%s11716_s1 + $0x14c] sm:$0x3] %v3111_v23  ;;  %v3171_v25 = vld [vmem:[#allocation0 + $0x580] sm:$0x3]  ;;  %v3201_v26 = vld [vmem:[#allocation0 + $0x5a8] sm:$0x3] }
 0x1fb   :  { %6966 = vst [vmem:[%s11716_s1 + $0x156] sm:$0x3] %v3141_v24  ;;  %v3291_v27 = vld [vmem:[#allocation0 + $0x620] sm:$0x3] }
 0x1fc   :  { %6971 = vst [vmem:[%s11716_s1 + $0x160] sm:$0x3] %v3171_v25 }
 0x1fd   :  { %6976 = vst [vmem:[%s11716_s1 + $0x16a] sm:$0x3] %v3201_v26 }
 0x1fe   :  { %6991 = vst [vmem:[%s11716_s1 + $0x188] sm:$0x3] %v3291_v27 }
 0x1ff   :  { %v3231_v30 = vld [vmem:[#allocation0 + $0x5d0] sm:$0x3]  ;;  %v3261_v31 = vld [vmem:[#allocation0 + $0x5f8] sm:$0x3]  ;;  %7011 = vst [vmem:[%s11716_s1 + $0x1b0] sm:$0x3] %v3411_v28 }
 0x200   :  { %6981 = vst [vmem:[%s11716_s1 + $0x174] sm:$0x3] %v3231_v30 }
 0x201   :  { %6986 = vst [vmem:[%s11716_s1 + $0x17e] sm:$0x3] %v3261_v31  ;;  %v9307_v31 = vld.sshfl [vmem:[%s11715_s0 + $0x30] sm:$0xff pattern:$0xadcb0981]  }
 0x202   :  { %7016 = vst [vmem:[%s11716_s1 + $0x1ba] sm:$0x3] %v3441_v29 }
 0x203   :  { %7031 = vst [vmem:[%s11716_s1 + $0x1d8] sm:$0x3] %v3531_v32 }
 0x204   :  { %793 = vst.msk [vmem:[#allocation0 + $0x1701] ss:$-120 sm:$0x3] %vm3_vm0, %v790_v10  }
 0x205   :  { %795 = vst.msk [vmem:[#allocation0 + $0x1661] ss:$40 sm:$0xc] %vm3_vm0, %v790_v10  }
 0x206   :  { %797 = vst.msk [vmem:[#allocation0 + $0x1689] ss:$40 sm:$0x30] %vm3_vm0, %v790_v10   ;;  %v9208_v10 = vld.sshfl [vmem:[%s11715_s0 + $0x18] sm:$0xff pattern:$0x47650321]  }
 0x207   :  { %663 = vst.msk [vmem:[#allocation0 + $0xa81] ss:$-120 sm:$0x3] %vm3_vm0, %v660_v13   ;;  %1326 = vrot.lane.b32.xlu2 %v9208_v10, %s7559_s19 }
 0x208   :  { %665 = vst.msk [vmem:[#allocation0 + $0x9e1] ss:$40 sm:$0xc] %vm3_vm0, %v660_v13  }
 0x209   :  { %667 = vst.msk [vmem:[#allocation0 + $0xd01] ss:$-120 sm:$0x30] %vm3_vm0, %v660_v13  }
 0x20a   :  { %669 = vst.msk [vmem:[#allocation0 + $0x9e1] ss:$40 sm:$0xc0] %vm3_vm0, %v660_v13   ;;  %v9221_v13 = vld.sshfl [vmem:[%s11715_s0 + $0x10] sm:$0xff pattern:$0x47650321]  }
 0x20b   :  { %v6441_v35 = vld [vmem:[#allocation0 + $0x1688] sm:$0x3]  ;;  %v6531_v36 = vld [vmem:[#allocation0 + $0x1700] sm:$0x3]  ;;  %1313 = vrot.lane.b32.xlu1 %v9221_v13, %s7559_s19 }
 0x20c   :  { %7516 = vst [vmem:[%s11716_s1 + $0x5a2] sm:$0x3] %v6441_v35  ;;  %v6471_v37 = vld [vmem:[#allocation0 + $0x16b0] sm:$0x3]  ;;  %v6501_v41 = vld [vmem:[#allocation0 + $0x16d8] sm:$0x3] }
 0x20d   :  { %7531 = vst [vmem:[%s11716_s1 + $0x5c0] sm:$0x3] %v6531_v36  ;;  %v6561_v38 = vld [vmem:[#allocation0 + $0x1728] sm:$0x3]  ;;  %v6591_v39 = vld [vmem:[#allocation0 + $0x1750] sm:$0x3] }
 0x20e   :  { %7536 = vst [vmem:[%s11716_s1 + $0x5ca] sm:$0x3] %v6561_v38  ;;  %v4041_v44 = vld [vmem:[#allocation0 + $0xa08] sm:$0x3]  ;;  %v4131_v47 = vld [vmem:[#allocation0 + $0xa80] sm:$0x3]  ;;  %v9340_v38 = vpop.permute.xlu2 %942  }
 0x20f   :  { %7541 = vst [vmem:[%s11716_s1 + $0x5d4] sm:$0x3] %v6591_v39  ;;  %v4071_v45 = vld [vmem:[#allocation0 + $0xa30] sm:$0x3]  ;;  %v4101_v46 = vld [vmem:[#allocation0 + $0xa58] sm:$0x3]  ;;  %1365 = vrot.lane.b32.xlu2 %v9307_v31, %s7559_s19  ;;  %v9342_v39 = vpop.permute.xlu1 %812  }
 0x210   :  { %7521 = vst [vmem:[%s11716_s1 + $0x5ac] sm:$0x3] %v6471_v37  ;;  %v4161_v60 = vld [vmem:[#allocation0 + $0xaa8] sm:$0x3]  ;;  %v4251_v63 = vld [vmem:[#allocation0 + $0xb20] sm:$0x3] }
 0x211   :  { %v4191_v42 = vld [vmem:[#allocation0 + $0xad0] sm:$0x3]  ;;  %v4221_v43 = vld [vmem:[#allocation0 + $0xaf8] sm:$0x3]  ;;  %7526 = vst [vmem:[%s11716_s1 + $0x5b6] sm:$0x3] %v6501_v41  ;;  %v9364_v41 = vpop.permute.xlu0 %799  }
 0x212   :  { %7141 = vst [vmem:[%s11716_s1 + $0x2b4] sm:$0x3] %v4191_v42  ;;  %v9330_v35 = vld.sshfl [vmem:[%s11715_s0 + $0x20] sm:$0xff pattern:$0x47650321]  }
 0x213   :  { %7146 = vst [vmem:[%s11716_s1 + $0x2be] sm:$0x3] %v4221_v43  ;;  %1339 = vrot.lane.b32.xlu0 %v9330_v35, %s7559_s19  ;;  %v9379_v42 = vld.sshfl [vmem:[%s11715_s0 + $0x4e] sm:$0xff pattern:$0x47650321]  }
 0x214   :  { %650 = vst.msk [vmem:[#allocation0 + $0x941] ss:$-120 sm:$0x3] %vm3_vm0, %v8989_v8  }
 0x215   :  { %652 = vst.msk [vmem:[#allocation0 + $0x8a1] ss:$40 sm:$0xc] %vm3_vm0, %v8989_v8  }
 0x216   :  { %654 = vst.msk [vmem:[#allocation0 + $0xbc1] ss:$-120 sm:$0x30] %vm3_vm0, %v8989_v8   ;;  %v9381_v43 = vpop.permute.xlu2 %981  }
 0x217   :  { %656 = vst.msk [vmem:[#allocation0 + $0x8a1] ss:$40 sm:$0xc0] %vm3_vm0, %v8989_v8   ;;  %1404 = vrot.lane.b32.xlu2 %v9379_v42, %s7559_s19 }
 0x218   :  { %7116 = vst [vmem:[%s11716_s1 + $0x282] sm:$0x3] %v4041_v44  ;;  %v9390_v44 = vld.sshfl [vmem:[%s11715_s0 + $0x46] sm:$0xff pattern:$0x47650321]  }
 0x219   :  { %7121 = vst [vmem:[%s11716_s1 + $0x28c] sm:$0x3] %v4071_v45  ;;  %v9399_v45 = vld.sshfl [vmem:[%s11715_s0 + $0x3e] sm:$0xff pattern:$0x47650321]  }
 0x21a   :  { %7126 = vst [vmem:[%s11716_s1 + $0x296] sm:$0x3] %v4101_v46 }
 0x21b   :  { %v3801_v51 = vld [vmem:[#allocation0 + $0x8c8] sm:$0x3]  ;;  %v3891_v52 = vld [vmem:[#allocation0 + $0x940] sm:$0x3]  ;;  %7131 = vst [vmem:[%s11716_s1 + $0x2a0] sm:$0x3] %v4131_v47  ;;  %1378 = vrot.lane.b32.xlu0 %v9399_v45, %s7559_s19 }
 0x21c   :  { %7076 = vst [vmem:[%s11716_s1 + $0x232] sm:$0x3] %v3801_v51  ;;  %v3831_v53 = vld [vmem:[#allocation0 + $0x8f0] sm:$0x3]  ;;  %v3861_v54 = vld [vmem:[#allocation0 + $0x918] sm:$0x3] }
 0x21d   :  { %7081 = vst [vmem:[%s11716_s1 + $0x23c] sm:$0x3] %v3831_v53  ;;  %v3921_v55 = vld [vmem:[#allocation0 + $0x968] sm:$0x3]  ;;  %v4011_v59 = vld [vmem:[#allocation0 + $0x9e0] sm:$0x3] }
 0x21e   :  { %7086 = vst [vmem:[%s11716_s1 + $0x246] sm:$0x3] %v3861_v54  ;;  %v3951_v56 = vld [vmem:[#allocation0 + $0x990] sm:$0x3]  ;;  %v3981_v57 = vld [vmem:[#allocation0 + $0x9b8] sm:$0x3] }
 0x21f   :  { %7091 = vst [vmem:[%s11716_s1 + $0x250] sm:$0x3] %v3891_v52  ;;  %v9406_v52 = vpop.permute.xlu1 %851  }
 0x220   :  { %7096 = vst [vmem:[%s11716_s1 + $0x25a] sm:$0x3] %v3921_v55 }
 0x221   :  { %7101 = vst [vmem:[%s11716_s1 + $0x264] sm:$0x3] %v3951_v56  ;;  %v9417_v56 = vpop.permute.xlu0 %838  }
 0x222   :  { %7106 = vst [vmem:[%s11716_s1 + $0x26e] sm:$0x3] %v3981_v57 }
 0x223   :  { %7111 = vst [vmem:[%s11716_s1 + $0x278] sm:$0x3] %v4011_v59 }
 0x224   :  { %7136 = vst [vmem:[%s11716_s1 + $0x2aa] sm:$0x3] %v4161_v60 }
 0x225   :  { %7151 = vst [vmem:[%s11716_s1 + $0x2c8] sm:$0x3] %v4251_v63 }
 0x226   :  { %829 = vst.msk [vmem:[#allocation0 + $0x2e0] ss:$40 sm:$0x3] %vm3_vm0, %v9061_v33  }
 0x227   :  { %831 = vst.msk [vmem:[#allocation0 + $0x240] ss:$40 sm:$0xc] %vm3_vm0, %v9061_v33  }
 0x228   :  { %833 = vst.msk [vmem:[#allocation0 + $0x2e0] ss:$40 sm:$0x30] %vm3_vm0, %v9061_v33  }
 0x229   :  { %835 = vst.msk [vmem:[#allocation0 + $0x240] ss:$40 sm:$0xc0] %vm3_vm0, %v9061_v33  }
 0x22a   :  { %702 = vst.msk [vmem:[#allocation0 + $0xe41] ss:$-120 sm:$0x3] %vm3_vm0, %v9063_v34  }
 0x22b   :  { %704 = vst.msk [vmem:[#allocation0 + $0xda1] ss:$40 sm:$0xc] %vm3_vm0, %v9063_v34  }
 0x22c   :  { %706 = vst.msk [vmem:[#allocation0 + $0x10c1] ss:$-120 sm:$0x30] %vm3_vm0, %v9063_v34  }
 0x22d   :  { %708 = vst.msk [vmem:[#allocation0 + $0xda1] ss:$40 sm:$0xc0] %vm3_vm0, %v9063_v34   ;;  %v9320_v34 = vld.sshfl [vmem:[%s11715_s0 + $0x28] sm:$0xff pattern:$0x47650321]  }
 0x22e   :  { %689 = vst.msk [vmem:[#allocation0 + $0xd01] ss:$-120 sm:$0x3] %vm3_vm0, %v9077_v40   ;;  %1352 = vrot.lane.b32.xlu1 %v9320_v34, %s7559_s19 }
 0x22f   :  { %691 = vst.msk [vmem:[#allocation0 + $0xc61] ss:$40 sm:$0xc] %vm3_vm0, %v9077_v40  }
 0x230   :  { %693 = vst.msk [vmem:[#allocation0 + $0xf81] ss:$-120 sm:$0x30] %vm3_vm0, %v9077_v40  }
 0x231   :  { %v4761_v1 = vld [vmem:[#allocation0 + $0xdc8] sm:$0x3]  ;;  %v4851_v4 = vld [vmem:[#allocation0 + $0xe40] sm:$0x3] }
 0x232   :  { %v4791_v2 = vld [vmem:[#allocation0 + $0xdf0] sm:$0x3]  ;;  %v4821_v49 = vld [vmem:[#allocation0 + $0xe18] sm:$0x3]  ;;  %7236 = vst [vmem:[%s11716_s1 + $0x372] sm:$0x3] %v4761_v1  ;;  %v1021_v1 = vpop.permute.xlu2 %1020  }
 0x233   :  { %7241 = vst [vmem:[%s11716_s1 + $0x37c] sm:$0x3] %v4791_v2  ;;  %v4881_v5 = vld [vmem:[#allocation0 + $0xe68] sm:$0x3]  ;;  %v4971_v6 = vld [vmem:[#allocation0 + $0xee0] sm:$0x3] }
 0x234   :  { %v4911_v50 = vld [vmem:[#allocation0 + $0xe90] sm:$0x3]  ;;  %v4941_v3 = vld [vmem:[#allocation0 + $0xeb8] sm:$0x3]  ;;  %7246 = vst [vmem:[%s11716_s1 + $0x386] sm:$0x3] %v4821_v49 }
 0x235   :  { %7261 = vst [vmem:[%s11716_s1 + $0x3a4] sm:$0x3] %v4911_v50  ;;  %v4521_v7 = vld [vmem:[#allocation0 + $0xc88] sm:$0x3]  ;;  %v4611_v12 = vld [vmem:[#allocation0 + $0xd00] sm:$0x3] }
 0x236   :  { %7266 = vst [vmem:[%s11716_s1 + $0x3ae] sm:$0x3] %v4941_v3  ;;  %v4551_v9 = vld [vmem:[#allocation0 + $0xcb0] sm:$0x3]  ;;  %v4581_v11 = vld [vmem:[#allocation0 + $0xcd8] sm:$0x3]  ;;  %1391 = vrot.lane.b32.xlu1 %v9390_v44, %s7559_s19 }
 0x237   :  { %695 = vst.msk [vmem:[#allocation0 + $0xc61] ss:$40 sm:$0xc0] %vm3_vm0, %v9077_v40   ;;  %v4641_v48 = vld [vmem:[#allocation0 + $0xd28] sm:$0x3] }
 0x238   :  { %7251 = vst [vmem:[%s11716_s1 + $0x390] sm:$0x3] %v4851_v4  ;;  %v4731_v18 = vld [vmem:[#allocation0 + $0xda0] sm:$0x3] }
 0x239   :  { %7256 = vst [vmem:[%s11716_s1 + $0x39a] sm:$0x3] %v4881_v5  ;;  %v9446_v2 = vld.sshfl [vmem:[%s11715_s0 + $0x5e] sm:$0xff pattern:$0x47650321]   ;;  %v891_v5 = vpop.permute.xlu1 %890  }
 0x23a   :  { %7271 = vst [vmem:[%s11716_s1 + $0x3b8] sm:$0x3] %v4971_v6  ;;  %v9456_v49 = vld.sshfl [vmem:[%s11715_s0 + $0x56] sm:$0xff pattern:$0x47650321]  }
 0x23b   :  { %7196 = vst [vmem:[%s11716_s1 + $0x322] sm:$0x3] %v4521_v7  ;;  %1417 = vrot.lane.b32.xlu0 %v9456_v49, %s7559_s19  ;;  %v878_v7 = vpop.permute.xlu0 %877  }
 0x23c   :  { %7201 = vst [vmem:[%s11716_s1 + $0x32c] sm:$0x3] %v4551_v9  ;;  %v9489_v9 = vld.sshfl [vmem:[%s11715_s0 + $0x84] sm:$0xff pattern:$0x47650321]  }
 0x23d   :  { %7206 = vst [vmem:[%s11716_s1 + $0x336] sm:$0x3] %v4581_v11  ;;  %v1057_v11 = vpop.permute.xlu2 %1056  }
 0x23e   :  { %v4671_v15 = vld [vmem:[#allocation0 + $0xd50] sm:$0x3]  ;;  %v4701_v8 = vld [vmem:[#allocation0 + $0xd78] sm:$0x3]  ;;  %7211 = vst [vmem:[%s11716_s1 + $0x340] sm:$0x3] %v4611_v12  ;;  %1430 = vrot.lane.b32.xlu1 %v9446_v2, %s7559_s19 }
 0x23f   :  { %7221 = vst [vmem:[%s11716_s1 + $0x354] sm:$0x3] %v4671_v15  ;;  %v9498_v12 = vld.sshfl [vmem:[%s11715_s0 + $0x7c] sm:$0xff pattern:$0x47650321]  }
 0x240   :  { %7226 = vst [vmem:[%s11716_s1 + $0x35e] sm:$0x3] %v4701_v8 }
 0x241   :  { %7216 = vst [vmem:[%s11716_s1 + $0x34a] sm:$0x3] %v4641_v48  ;;  %v9507_v48 = vld.sshfl [vmem:[%s11715_s0 + $0x74] sm:$0xff pattern:$0x47650321]   ;;  %v9521_v15 = vpop.permute.xlu1 %929  }
 0x242   :  { %7231 = vst [vmem:[%s11716_s1 + $0x368] sm:$0x3] %v4731_v18  ;;  %v9565_v18 = vld.sshfl [vmem:[%s11715_s0 + $0x94] sm:$0xff pattern:$0x47650321]  }
 0x243   :  { %868 = vst.msk [vmem:[#allocation0 + $0x6a0] ss:$40 sm:$0x3] %vm3_vm0, %v9142_v61   ;;  %1456 = vrot.lane.b32.xlu0 %v9507_v48, %s7559_s19  ;;  %v9535_v8 = vpop.permute.xlu0 %916  }
 0x244   :  { %870 = vst.msk [vmem:[#allocation0 + $0x600] ss:$40 sm:$0xc] %vm3_vm0, %v9142_v61  }
 0x245   :  { %872 = vst.msk [vmem:[#allocation0 + $0x6a0] ss:$40 sm:$0x30] %vm3_vm0, %v9142_v61  }
 0x246   :  { %874 = vst.msk [vmem:[#allocation0 + $0x600] ss:$40 sm:$0xc0] %vm3_vm0, %v9142_v61   ;;  %1469 = vrot.lane.b32.xlu1 %v9498_v12, %s7559_s19 }
 0x247   :  { %741 = vst.msk [vmem:[#allocation0 + $0x1201] ss:$-120 sm:$0x3] %vm3_vm0, %v9144_v62  }
 0x248   :  { %743 = vst.msk [vmem:[#allocation0 + $0x1161] ss:$40 sm:$0xc] %vm3_vm0, %v9144_v62  }
 0x249   :  { %745 = vst.msk [vmem:[#allocation0 + $0x1481] ss:$-120 sm:$0x30] %vm3_vm0, %v9144_v62  }
 0x24a   :  { %747 = vst.msk [vmem:[#allocation0 + $0x1161] ss:$40 sm:$0xc0] %vm3_vm0, %v9144_v62  }
 0x24b   :  { %728 = vst.msk [vmem:[#allocation0 + $0x10c1] ss:$-120 sm:$0x3] %vm3_vm0, %v9168_v0  }
 0x24c   :  { %730 = vst.msk [vmem:[#allocation0 + $0x1021] ss:$40 sm:$0xc] %vm3_vm0, %v9168_v0  }
 0x24d   :  { %732 = vst.msk [vmem:[#allocation0 + $0x1341] ss:$-120 sm:$0x30] %vm3_vm0, %v9168_v0  }
 0x24e   :  { %v5481_v20 = vld [vmem:[#allocation0 + $0x1188] sm:$0x3]  ;;  %v5571_v25 = vld [vmem:[#allocation0 + $0x1200] sm:$0x3]  ;;  %1508 = vrot.lane.b32.xlu1 %v9565_v18, %s7559_s19 }
 0x24f   :  { %v5511_v21 = vld [vmem:[#allocation0 + $0x11b0] sm:$0x3]  ;;  %v5541_v22 = vld [vmem:[#allocation0 + $0x11d8] sm:$0x3]  ;;  %7356 = vst [vmem:[%s11716_s1 + $0x462] sm:$0x3] %v5481_v20  ;;  %v9582_v20 = vpop.permute.xlu1 %968  }
 0x250   :  { %7361 = vst [vmem:[%s11716_s1 + $0x46c] sm:$0x3] %v5511_v21  ;;  %v5601_v26 = vld [vmem:[#allocation0 + $0x1228] sm:$0x3]  ;;  %v5691_v27 = vld [vmem:[#allocation0 + $0x12a0] sm:$0x3] }
 0x251   :  { %v5631_v23 = vld [vmem:[#allocation0 + $0x1250] sm:$0x3]  ;;  %v5661_v24 = vld [vmem:[#allocation0 + $0x1278] sm:$0x3]  ;;  %7366 = vst [vmem:[%s11716_s1 + $0x476] sm:$0x3] %v5541_v22 }
 0x252   :  { %7381 = vst [vmem:[%s11716_s1 + $0x494] sm:$0x3] %v5631_v23  ;;  %v5241_v28 = vld [vmem:[#allocation0 + $0x1048] sm:$0x3]  ;;  %v5331_v30 = vld [vmem:[#allocation0 + $0x10c0] sm:$0x3] }
 0x253   :  { %7386 = vst [vmem:[%s11716_s1 + $0x49e] sm:$0x3] %v5661_v24  ;;  %v5271_v29 = vld [vmem:[#allocation0 + $0x1070] sm:$0x3]  ;;  %v5301_v32 = vld [vmem:[#allocation0 + $0x1098] sm:$0x3] }
 0x254   :  { %734 = vst.msk [vmem:[#allocation0 + $0x1021] ss:$40 sm:$0xc0] %vm3_vm0, %v9168_v0   ;;  %v5361_v33 = vld [vmem:[#allocation0 + $0x10e8] sm:$0x3] }
 0x255   :  { %7371 = vst [vmem:[%s11716_s1 + $0x480] sm:$0x3] %v5571_v25  ;;  %v5451_v40 = vld [vmem:[#allocation0 + $0x1160] sm:$0x3] }
 0x256   :  { %7376 = vst [vmem:[%s11716_s1 + $0x48a] sm:$0x3] %v5601_v26  ;;  %v9436_v0 = vld.sshfl [vmem:[%s11715_s0 + $0x66] sm:$0xff pattern:$0xadcb0321]  }
 0x257   :  { %7391 = vst [vmem:[%s11716_s1 + $0x4a8] sm:$0x3] %v5691_v27  ;;  %1443 = vrot.lane.b32.xlu2 %v9436_v0, %s7559_s19  ;;  %v9646_v27 = vpop.permute.xlu1 %1007  }
 0x258   :  { %7316 = vst [vmem:[%s11716_s1 + $0x412] sm:$0x3] %v5241_v28 }
 0x259   :  { %7321 = vst [vmem:[%s11716_s1 + $0x41c] sm:$0x3] %v5271_v29 }
 0x25a   :  { %7326 = vst [vmem:[%s11716_s1 + $0x426] sm:$0x3] %v5301_v32 }
 0x25b   :  { %v5391_v36 = vld [vmem:[#allocation0 + $0x1110] sm:$0x3]  ;;  %v5421_v37 = vld [vmem:[#allocation0 + $0x1138] sm:$0x3]  ;;  %7331 = vst [vmem:[%s11716_s1 + $0x430] sm:$0x3] %v5331_v30 }
 0x25c   :  { %7336 = vst [vmem:[%s11716_s1 + $0x43a] sm:$0x3] %v5361_v33 }
 0x25d   :  { %7341 = vst [vmem:[%s11716_s1 + $0x444] sm:$0x3] %v5391_v36 }
 0x25e   :  { %7346 = vst [vmem:[%s11716_s1 + $0x44e] sm:$0x3] %v5421_v37 }
 0x25f   :  { %7351 = vst [vmem:[%s11716_s1 + $0x458] sm:$0x3] %v5451_v40  ;;  %1482 = vrot.lane.b32.xlu2 %v9489_v9, %s7559_s19 }
 0x260   :  { %907 = vst.msk [vmem:[#allocation0 + $0xa60] ss:$40 sm:$0x3] %vm3_vm0, %v9241_v16  }
 0x261   :  { %909 = vst.msk [vmem:[#allocation0 + $0x9c0] ss:$40 sm:$0xc] %vm3_vm0, %v9241_v16  }
 0x262   :  { %911 = vst.msk [vmem:[#allocation0 + $0xa60] ss:$40 sm:$0x30] %vm3_vm0, %v9241_v16  }
 0x263   :  { %913 = vst.msk [vmem:[#allocation0 + $0x9c0] ss:$40 sm:$0xc0] %vm3_vm0, %v9241_v16   ;;  %v9555_v16 = vld.sshfl [vmem:[%s11715_s0 + $0x9c] sm:$0xff pattern:$0x44450321]  }
 0x264   :  { %780 = vst.msk [vmem:[#allocation0 + $0x15c1] ss:$-120 sm:$0x3] %vm3_vm0, %v9243_v17  }
 0x265   :  { %782 = vst.msk [vmem:[#allocation0 + $0x1521] ss:$40 sm:$0xc] %vm3_vm0, %v9243_v17  }
 0x266   :  { %784 = vst.msk [vmem:[#allocation0 + $0x1841] ss:$-120 sm:$0x30] %vm3_vm0, %v9243_v17  }
 0x267   :  { %786 = vst.msk [vmem:[#allocation0 + $0x1521] ss:$40 sm:$0xc0] %vm3_vm0, %v9243_v17   ;;  %v9557_v17 = vpop.permute.xlu2 %1095   ;;  %1521 = vrot.lane.b32.xlu2 %v9555_v16, %s7559_s19 }
 0x268   :  { %767 = vst.msk [vmem:[#allocation0 + $0x1481] ss:$-120 sm:$0x3] %vm3_vm0, %v9267_v19  }
 0x269   :  { %769 = vst.msk [vmem:[#allocation0 + $0x13e1] ss:$40 sm:$0xc] %vm3_vm0, %v9267_v19  }
 0x26a   :  { %771 = vst.msk [vmem:[#allocation0 + $0x1701] ss:$-120 sm:$0x30] %vm3_vm0, %v9267_v19  }
 0x26b   :  { %v6201_v46 = vld [vmem:[#allocation0 + $0x1548] sm:$0x3]  ;;  %v6291_v55 = vld [vmem:[#allocation0 + $0x15c0] sm:$0x3] }
 0x26c   :  { %v6231_v47 = vld [vmem:[#allocation0 + $0x1570] sm:$0x3]  ;;  %v6261_v51 = vld [vmem:[#allocation0 + $0x1598] sm:$0x3]  ;;  %7476 = vst [vmem:[%s11716_s1 + $0x552] sm:$0x3] %v6201_v46 }
 0x26d   :  { %7481 = vst [vmem:[%s11716_s1 + $0x55c] sm:$0x3] %v6231_v47  ;;  %v6321_v57 = vld [vmem:[#allocation0 + $0x15e8] sm:$0x3]  ;;  %v6411_v59 = vld [vmem:[#allocation0 + $0x1660] sm:$0x3] }
 0x26e   :  { %v6351_v53 = vld [vmem:[#allocation0 + $0x1610] sm:$0x3]  ;;  %v6381_v54 = vld [vmem:[#allocation0 + $0x1638] sm:$0x3]  ;;  %7486 = vst [vmem:[%s11716_s1 + $0x566] sm:$0x3] %v6261_v51 }
 0x26f   :  { %7501 = vst [vmem:[%s11716_s1 + $0x584] sm:$0x3] %v6351_v53  ;;  %v5961_v60 = vld [vmem:[#allocation0 + $0x1408] sm:$0x3]  ;;  %v6051_v63 = vld [vmem:[#allocation0 + $0x1480] sm:$0x3]  ;;  %v9618_v21 = vpop.permute.xlu2 %1134  }
 0x270   :  { %7506 = vst [vmem:[%s11716_s1 + $0x58e] sm:$0x3] %v6381_v54  ;;  %v5991_v61 = vld [vmem:[#allocation0 + $0x1430] sm:$0x3]  ;;  %v6021_v62 = vld [vmem:[#allocation0 + $0x1458] sm:$0x3] }
 0x271   :  { %773 = vst.msk [vmem:[#allocation0 + $0x13e1] ss:$40 sm:$0xc0] %vm3_vm0, %v9267_v19   ;;  %v6081_v50 = vld [vmem:[#allocation0 + $0x14a8] sm:$0x3] }
 0x272   :  { %7491 = vst [vmem:[%s11716_s1 + $0x570] sm:$0x3] %v6291_v55  ;;  %v6171_v6 = vld [vmem:[#allocation0 + $0x1520] sm:$0x3] }
 0x273   :  { %7496 = vst [vmem:[%s11716_s1 + $0x57a] sm:$0x3] %v6321_v57  ;;  %v9573_v19 = vld.sshfl [vmem:[%s11715_s0 + $0x8c] sm:$0xff pattern:$0x47650321]  }
 0x274   :  { %7511 = vst [vmem:[%s11716_s1 + $0x598] sm:$0x3] %v6411_v59  ;;  %1495 = vrot.lane.b32.xlu0 %v9573_v19, %s7559_s19  ;;  %s7560_s19 = smov 93  }
 0x275   :  { %7436 = vst [vmem:[%s11716_s1 + $0x502] sm:$0x3] %v5961_v60  ;;  %1557 = vrot.lane.b32.xlu2 %v9221_v13, %s7560_s19  ;;  %1544 = vrot.lane.b32.xlu1 %v9231_v14, %s7560_s19  ;;  %v9592_v13 = vpop.permute.xlu0 %955  }
 0x276   :  { %7441 = vst [vmem:[%s11716_s1 + $0x50c] sm:$0x3] %v5991_v61 }
 0x277   :  { %7446 = vst [vmem:[%s11716_s1 + $0x516] sm:$0x3] %v6021_v62  ;;  %v1174_v33 = vpop.permute.xlu2 %1173  }
 0x278   :  { %v6111_v3 = vld [vmem:[#allocation0 + $0x14d0] sm:$0x3]  ;;  %v6141_v4 = vld [vmem:[#allocation0 + $0x14f8] sm:$0x3]  ;;  %7451 = vst [vmem:[%s11716_s1 + $0x520] sm:$0x3] %v6051_v63 }
 0x279   :  { %7461 = vst [vmem:[%s11716_s1 + $0x534] sm:$0x3] %v6111_v3 }
 0x27a   :  { %7466 = vst [vmem:[%s11716_s1 + $0x53e] sm:$0x3] %v6141_v4 }
 0x27b   :  { %7456 = vst [vmem:[%s11716_s1 + $0x52a] sm:$0x3] %v6081_v50 }
 0x27c   :  { %7471 = vst [vmem:[%s11716_s1 + $0x548] sm:$0x3] %v6171_v6  ;;  %1531 = vrot.lane.b32.xlu0 %v9132_v58, %s7560_s19 }
 0x27d   :  { %946 = vst.msk [vmem:[#allocation0 + $0xe20] ss:$40 sm:$0x3] %vm3_vm0, %v9340_v38   ;;  %1596 = vrot.lane.b32.xlu2 %v9320_v34, %s7560_s19  ;;  %1583 = vrot.lane.b32.xlu1 %v9330_v35, %s7560_s19  ;;  %v9662_v28 = vpop.permute.xlu0 %994  }
 0x27e   :  { %948 = vst.msk [vmem:[#allocation0 + $0xd80] ss:$40 sm:$0xc] %vm3_vm0, %v9340_v38  }
 0x27f   :  { %950 = vst.msk [vmem:[#allocation0 + $0xe20] ss:$40 sm:$0x30] %vm3_vm0, %v9340_v38   ;;  %v1213_v51 = vpop.permute.xlu2 %1212  }
 0x280   :  { %952 = vst.msk [vmem:[#allocation0 + $0xd80] ss:$40 sm:$0xc0] %vm3_vm0, %v9340_v38   ;;  %v1044_v38 = vpop.permute.xlu1 %1043  }
 0x281   :  { %816 = vst.msk [vmem:[#allocation0 + $0x1a0] ss:$40 sm:$0x3] %vm3_vm0, %v9342_v39  }
 0x282   :  { %818 = vst.msk [vmem:[#allocation0 + $0x100] ss:$40 sm:$0xc] %vm3_vm0, %v9342_v39  }
 0x283   :  { %820 = vst.msk [vmem:[#allocation0 + $0x1a0] ss:$40 sm:$0x30] %vm3_vm0, %v9342_v39  }
 0x284   :  { %822 = vst.msk [vmem:[#allocation0 + $0x100] ss:$40 sm:$0xc0] %vm3_vm0, %v9342_v39   ;;  %1570 = vrot.lane.b32.xlu0 %v9208_v10, %s7560_s19 }
 0x285   :  { %803 = vst.msk [vmem:[#allocation0 + $0x60] ss:$40 sm:$0x3] %vm3_vm0, %v9364_v41   ;;  %1635 = vrot.lane.b32.xlu2 %v9390_v44, %s7560_s19  ;;  %1622 = vrot.lane.b32.xlu1 %v9399_v45, %s7560_s19  ;;  %v9724_v39 = vpop.permute.xlu0 %1033  }
 0x286   :  { %805 = vst.msk [vmem:[#allocation0 - $0x40] ss:$40 sm:$0xc] %vm3_vm0, %v9364_v41  }
 0x287   :  { %807 = vst.msk [vmem:[#allocation0 + $0x60] ss:$40 sm:$0x30] %vm3_vm0, %v9364_v41  }
 0x288   :  { %809 = vst.msk [vmem:[#allocation0 - $0x40] ss:$40 sm:$0xc0] %vm3_vm0, %v9364_v41  }
 0x289   :  { %985 = vst.msk [vmem:[#allocation0 + $0x11e0] ss:$40 sm:$0x3] %vm3_vm0, %v9381_v43  }
 0x28a   :  { %987 = vst.msk [vmem:[#allocation0 + $0x1140] ss:$40 sm:$0xc] %vm3_vm0, %v9381_v43  }
 0x28b   :  { %989 = vst.msk [vmem:[#allocation0 + $0x11e0] ss:$40 sm:$0x30] %vm3_vm0, %v9381_v43  }
 0x28c   :  { %991 = vst.msk [vmem:[#allocation0 + $0x1140] ss:$40 sm:$0xc0] %vm3_vm0, %v9381_v43   ;;  %1609 = vrot.lane.b32.xlu0 %v9307_v31, %s7560_s19 }
 0x28d   :  { %855 = vst.msk [vmem:[#allocation0 + $0x560] ss:$40 sm:$0x3] %vm3_vm0, %v9406_v52   ;;  %1674 = vrot.lane.b32.xlu2 %v9446_v2, %s7560_s19  ;;  %1661 = vrot.lane.b32.xlu1 %v9456_v49, %s7560_s19  ;;  %v9792_v57 = vpop.permute.xlu0 %1069  }
 0x28e   :  { %857 = vst.msk [vmem:[#allocation0 + $0x4c0] ss:$40 sm:$0xc] %vm3_vm0, %v9406_v52  }
 0x28f   :  { %859 = vst.msk [vmem:[#allocation0 + $0x560] ss:$40 sm:$0x30] %vm3_vm0, %v9406_v52  }
 0x290   :  { %861 = vst.msk [vmem:[#allocation0 + $0x4c0] ss:$40 sm:$0xc0] %vm3_vm0, %v9406_v52   ;;  %v1083_v52 = vpop.permute.xlu1 %1082  }
 0x291   :  { %842 = vst.msk [vmem:[#allocation0 + $0x420] ss:$40 sm:$0x3] %vm3_vm0, %v9417_v56  }
 0x292   :  { %844 = vst.msk [vmem:[#allocation0 + $0x380] ss:$40 sm:$0xc] %vm3_vm0, %v9417_v56  }
 0x293   :  { %846 = vst.msk [vmem:[#allocation0 + $0x420] ss:$40 sm:$0x30] %vm3_vm0, %v9417_v56  }
 0x294   :  { %848 = vst.msk [vmem:[#allocation0 + $0x380] ss:$40 sm:$0xc0] %vm3_vm0, %v9417_v56   ;;  %1648 = vrot.lane.b32.xlu0 %v9379_v42, %s7560_s19 }
 0x295   :  { %1024 = vst.msk [vmem:[#allocation0 + $0x15a0] ss:$40 sm:$0x3] %vm3_vm0, %v1021_v1   ;;  %1713 = vrot.lane.b32.xlu2 %v9498_v12, %s7560_s19  ;;  %1700 = vrot.lane.b32.xlu1 %v9507_v48, %s7560_s19 }
 0x296   :  { %1026 = vst.msk [vmem:[#allocation0 + $0x1500] ss:$40 sm:$0xc] %vm3_vm0, %v1021_v1  }
 0x297   :  { %1028 = vst.msk [vmem:[#allocation0 + $0x15a0] ss:$40 sm:$0x30] %vm3_vm0, %v1021_v1  }
 0x298   :  { %1030 = vst.msk [vmem:[#allocation0 + $0x1500] ss:$40 sm:$0xc0] %vm3_vm0, %v1021_v1  }
 0x299   :  { %894 = vst.msk [vmem:[#allocation0 + $0x920] ss:$40 sm:$0x3] %vm3_vm0, %v891_v5  }
 0x29a   :  { %896 = vst.msk [vmem:[#allocation0 + $0x880] ss:$40 sm:$0xc] %vm3_vm0, %v891_v5  }
 0x29b   :  { %898 = vst.msk [vmem:[#allocation0 + $0x920] ss:$40 sm:$0x30] %vm3_vm0, %v891_v5  }
 0x29c   :  { %900 = vst.msk [vmem:[#allocation0 + $0x880] ss:$40 sm:$0xc0] %vm3_vm0, %v891_v5   ;;  %1687 = vrot.lane.b32.xlu0 %v9436_v0, %s7560_s19  ;;  %v1252_v5 = vpop.permute.xlu2 %1251  }
 0x29d   :  { %881 = vst.msk [vmem:[#allocation0 + $0x7e0] ss:$40 sm:$0x3] %vm3_vm0, %v878_v7   ;;  %1752 = vrot.lane.b32.xlu2 %v9565_v18, %s7560_s19  ;;  %1739 = vrot.lane.b32.xlu1 %v9573_v19, %s7560_s19 }
 0x29e   :  { %883 = vst.msk [vmem:[#allocation0 + $0x740] ss:$40 sm:$0xc] %vm3_vm0, %v878_v7  }
 0x29f   :  { %885 = vst.msk [vmem:[#allocation0 + $0x7e0] ss:$40 sm:$0x30] %vm3_vm0, %v878_v7  }
 0x2a0   :  { %887 = vst.msk [vmem:[#allocation0 + $0x740] ss:$40 sm:$0xc0] %vm3_vm0, %v878_v7  }
 0x2a1   :  { %1060 = vst.msk [vmem:[#allocation0 + $0x1a1] ss:$40 sm:$0x3] %vm3_vm0, %v1057_v11  }
 0x2a2   :  { %1062 = vst.msk [vmem:[#allocation0 + $0x101] ss:$40 sm:$0xc] %vm3_vm0, %v1057_v11  }
 0x2a3   :  { %1064 = vst.msk [vmem:[#allocation0 + $0x1a1] ss:$40 sm:$0x30] %vm3_vm0, %v1057_v11  }
 0x2a4   :  { %1066 = vst.msk [vmem:[#allocation0 + $0x101] ss:$40 sm:$0xc0] %vm3_vm0, %v1057_v11   ;;  %1726 = vrot.lane.b32.xlu0 %v9489_v9, %s7560_s19  ;;  %v1122_v11 = vpop.permute.xlu1 %1121  }
 0x2a5   :  { %933 = vst.msk [vmem:[#allocation0 + $0xce0] ss:$40 sm:$0x3] %vm3_vm0, %v9521_v15  }
 0x2a6   :  { %935 = vst.msk [vmem:[#allocation0 + $0xc40] ss:$40 sm:$0xc] %vm3_vm0, %v9521_v15  }
 0x2a7   :  { %937 = vst.msk [vmem:[#allocation0 + $0xce0] ss:$40 sm:$0x30] %vm3_vm0, %v9521_v15  }
 0x2a8   :  { %v2427_v58 = vld [vmem:[#allocation0 + $0x1a0] sm:$0x3]  ;;  %v2457_v24 = vld [vmem:[#allocation0 + $0x1c8] sm:$0x3] }
 0x2a9   :  { %v2367_v10 = vld [vmem:[#allocation0 + $0x150] sm:$0x3]  ;;  %v2397_v14 = vld [vmem:[#allocation0 + $0x178] sm:$0x3]  ;;  %6847 = vst [vmem:[%s11716_s1 + $0x68] sm:$0x3] %v2427_v58 }
 0x2aa   :  { %6837 = vst [vmem:[%s11716_s1 + $0x54] sm:$0x3] %v2367_v10  ;;  %v2547_v25 = vld [vmem:[#allocation0 + $0x240] sm:$0x3]  ;;  %v2577_v26 = vld [vmem:[#allocation0 + $0x268] sm:$0x3] }
 0x2ab   :  { %v2487_v22 = vld [vmem:[#allocation0 + $0x1f0] sm:$0x3]  ;;  %v2517_v23 = vld [vmem:[#allocation0 + $0x218] sm:$0x3]  ;;  %6842 = vst [vmem:[%s11716_s1 + $0x5e] sm:$0x3] %v2397_v14 }
 0x2ac   :  { %6857 = vst [vmem:[%s11716_s1 + $0x7c] sm:$0x3] %v2487_v22  ;;  %1765 = vrot.lane.b32.xlu0 %v9555_v16, %s7560_s19 }
 0x2ad   :  { %6862 = vst [vmem:[%s11716_s1 + $0x86] sm:$0x3] %v2517_v23 }
 0x2ae   :  { %939 = vst.msk [vmem:[#allocation0 + $0xc40] ss:$40 sm:$0xc0] %vm3_vm0, %v9521_v15  }
 0x2af   :  { %6852 = vst [vmem:[%s11716_s1 + $0x72] sm:$0x3] %v2457_v24 }
 0x2b0   :  { %6867 = vst [vmem:[%s11716_s1 + $0x90] sm:$0x3] %v2547_v25 }
 0x2b1   :  { %6872 = vst [vmem:[%s11716_s1 + $0x9a] sm:$0x3] %v2577_v26 }
 0x2b2   :  { %920 = vst.msk [vmem:[#allocation0 + $0xba0] ss:$40 sm:$0x3] %vm3_vm0, %v9535_v8  }
 0x2b3   :  { %922 = vst.msk [vmem:[#allocation0 + $0xb00] ss:$40 sm:$0xc] %vm3_vm0, %v9535_v8  }
 0x2b4   :  { %924 = vst.msk [vmem:[#allocation0 + $0xba0] ss:$40 sm:$0x30] %vm3_vm0, %v9535_v8  }
 0x2b5   :  { %926 = vst.msk [vmem:[#allocation0 + $0xb00] ss:$40 sm:$0xc0] %vm3_vm0, %v9535_v8   ;;  %v9860_v8 = vpop.permute.xlu0 %1108  }
 0x2b6   :  { %1099 = vst.msk [vmem:[#allocation0 + $0x561] ss:$40 sm:$0x3] %vm3_vm0, %v9557_v17  }
 0x2b7   :  { %1101 = vst.msk [vmem:[#allocation0 + $0x4c1] ss:$40 sm:$0xc] %vm3_vm0, %v9557_v17  }
 0x2b8   :  { %1103 = vst.msk [vmem:[#allocation0 + $0x561] ss:$40 sm:$0x30] %vm3_vm0, %v9557_v17  }
 0x2b9   :  { %1105 = vst.msk [vmem:[#allocation0 + $0x4c1] ss:$40 sm:$0xc0] %vm3_vm0, %v9557_v17  }
 0x2ba   :  { %972 = vst.msk [vmem:[#allocation0 + $0x10a0] ss:$40 sm:$0x3] %vm3_vm0, %v9582_v20  }
 0x2bb   :  { %974 = vst.msk [vmem:[#allocation0 + $0x1000] ss:$40 sm:$0xc] %vm3_vm0, %v9582_v20  }
 0x2bc   :  { %976 = vst.msk [vmem:[#allocation0 + $0x10a0] ss:$40 sm:$0x30] %vm3_vm0, %v9582_v20  }
 0x2bd   :  { %v3147_v29 = vld [vmem:[#allocation0 + $0x560] sm:$0x3]  ;;  %v3177_v32 = vld [vmem:[#allocation0 + $0x588] sm:$0x3] }
 0x2be   :  { %v3087_v30 = vld [vmem:[#allocation0 + $0x510] sm:$0x3]  ;;  %v3117_v31 = vld [vmem:[#allocation0 + $0x538] sm:$0x3]  ;;  %6967 = vst [vmem:[%s11716_s1 + $0x158] sm:$0x3] %v3147_v29 }
 0x2bf   :  { %6957 = vst [vmem:[%s11716_s1 + $0x144] sm:$0x3] %v3087_v30  ;;  %v3267_v36 = vld [vmem:[#allocation0 + $0x600] sm:$0x3]  ;;  %v3297_v37 = vld [vmem:[#allocation0 + $0x628] sm:$0x3]  ;;  %v9933_v30 = vpop.permute.xlu2 %1287  }
 0x2c0   :  { %v3207_v34 = vld [vmem:[#allocation0 + $0x5b0] sm:$0x3]  ;;  %6962 = vst [vmem:[%s11716_s1 + $0x14e] sm:$0x3] %v3117_v31  ;;  %v3237_v35 = vld [vmem:[#allocation0 + $0x5d8] sm:$0x3]  ;;  %v9935_v31 = vpop.permute.xlu1 %1160  }
 0x2c1   :  { %978 = vst.msk [vmem:[#allocation0 + $0x1000] ss:$40 sm:$0xc0] %vm3_vm0, %v9582_v20  }
 0x2c2   :  { %6972 = vst [vmem:[%s11716_s1 + $0x162] sm:$0x3] %v3177_v32 }
 0x2c3   :  { %6977 = vst [vmem:[%s11716_s1 + $0x16c] sm:$0x3] %v3207_v34 }
 0x2c4   :  { %6982 = vst [vmem:[%s11716_s1 + $0x176] sm:$0x3] %v3237_v35 }
 0x2c5   :  { %6987 = vst [vmem:[%s11716_s1 + $0x180] sm:$0x3] %v3267_v36 }
 0x2c6   :  { %6992 = vst [vmem:[%s11716_s1 + $0x18a] sm:$0x3] %v3297_v37 }
 0x2c7   :  { %959 = vst.msk [vmem:[#allocation0 + $0xf60] ss:$40 sm:$0x3] %vm3_vm0, %v9592_v13  }
 0x2c8   :  { %961 = vst.msk [vmem:[#allocation0 + $0xec0] ss:$40 sm:$0xc] %vm3_vm0, %v9592_v13  }
 0x2c9   :  { %963 = vst.msk [vmem:[#allocation0 + $0xf60] ss:$40 sm:$0x30] %vm3_vm0, %v9592_v13  }
 0x2ca   :  { %965 = vst.msk [vmem:[#allocation0 + $0xec0] ss:$40 sm:$0xc0] %vm3_vm0, %v9592_v13  }
 0x2cb   :  { %1138 = vst.msk [vmem:[#allocation0 + $0x921] ss:$40 sm:$0x3] %vm3_vm0, %v9618_v21  }
 0x2cc   :  { %1140 = vst.msk [vmem:[#allocation0 + $0x881] ss:$40 sm:$0xc] %vm3_vm0, %v9618_v21  }
 0x2cd   :  { %1142 = vst.msk [vmem:[#allocation0 + $0x921] ss:$40 sm:$0x30] %vm3_vm0, %v9618_v21  }
 0x2ce   :  { %1144 = vst.msk [vmem:[#allocation0 + $0x881] ss:$40 sm:$0xc0] %vm3_vm0, %v9618_v21  }
 0x2cf   :  { %1011 = vst.msk [vmem:[#allocation0 + $0x1460] ss:$40 sm:$0x3] %vm3_vm0, %v9646_v27  }
 0x2d0   :  { %1013 = vst.msk [vmem:[#allocation0 + $0x13c0] ss:$40 sm:$0xc] %vm3_vm0, %v9646_v27  }
 0x2d1   :  { %1015 = vst.msk [vmem:[#allocation0 + $0x1460] ss:$40 sm:$0x30] %vm3_vm0, %v9646_v27  }
 0x2d2   :  { %v3867_v40 = vld [vmem:[#allocation0 + $0x920] sm:$0x3]  ;;  %v3897_v45 = vld [vmem:[#allocation0 + $0x948] sm:$0x3]  ;;  %1297 = vst.msk [vmem:[#allocation0 + $0xb1] sm:$0x80] %vm3_vm0, %v9933_v30  }
 0x2d3   :  { %v3807_v41 = vld [vmem:[#allocation0 + $0x8d0] sm:$0x3]  ;;  %v3837_v42 = vld [vmem:[#allocation0 + $0x8f8] sm:$0x3]  ;;  %7087 = vst [vmem:[%s11716_s1 + $0x248] sm:$0x3] %v3867_v40 }
 0x2d4   :  { %7077 = vst [vmem:[%s11716_s1 + $0x234] sm:$0x3] %v3807_v41  ;;  %v3987_v46 = vld [vmem:[#allocation0 + $0x9c0] sm:$0x3]  ;;  %v4017_v47 = vld [vmem:[#allocation0 + $0x9e8] sm:$0x3] }
 0x2d5   :  { %v3927_v43 = vld [vmem:[#allocation0 + $0x970] sm:$0x3]  ;;  %v3957_v44 = vld [vmem:[#allocation0 + $0x998] sm:$0x3]  ;;  %7082 = vst [vmem:[%s11716_s1 + $0x23e] sm:$0x3] %v3837_v42 }
 0x2d6   :  { %7097 = vst [vmem:[%s11716_s1 + $0x25c] sm:$0x3] %v3927_v43 }
 0x2d7   :  { %7102 = vst [vmem:[%s11716_s1 + $0x266] sm:$0x3] %v3957_v44 }
 0x2d8   :  { %1017 = vst.msk [vmem:[#allocation0 + $0x13c0] ss:$40 sm:$0xc0] %vm3_vm0, %v9646_v27  }
 0x2d9   :  { %7092 = vst [vmem:[%s11716_s1 + $0x252] sm:$0x3] %v3897_v45 }
 0x2da   :  { %7107 = vst [vmem:[%s11716_s1 + $0x270] sm:$0x3] %v3987_v46 }
 0x2db   :  { %7112 = vst [vmem:[%s11716_s1 + $0x27a] sm:$0x3] %v4017_v47 }
 0x2dc   :  { %998 = vst.msk [vmem:[#allocation0 + $0x1320] ss:$40 sm:$0x3] %vm3_vm0, %v9662_v28  }
 0x2dd   :  { %1000 = vst.msk [vmem:[#allocation0 + $0x1280] ss:$40 sm:$0xc] %vm3_vm0, %v9662_v28  }
 0x2de   :  { %1002 = vst.msk [vmem:[#allocation0 + $0x1320] ss:$40 sm:$0x30] %vm3_vm0, %v9662_v28  }
 0x2df   :  { %1004 = vst.msk [vmem:[#allocation0 + $0x1280] ss:$40 sm:$0xc0] %vm3_vm0, %v9662_v28  }
 0x2e0   :  { %1177 = vst.msk [vmem:[#allocation0 + $0xce1] ss:$40 sm:$0x3] %vm3_vm0, %v1174_v33  }
 0x2e1   :  { %1179 = vst.msk [vmem:[#allocation0 + $0xc41] ss:$40 sm:$0xc] %vm3_vm0, %v1174_v33  }
 0x2e2   :  { %1181 = vst.msk [vmem:[#allocation0 + $0xce1] ss:$40 sm:$0x30] %vm3_vm0, %v1174_v33  }
 0x2e3   :  { %1183 = vst.msk [vmem:[#allocation0 + $0xc41] ss:$40 sm:$0xc0] %vm3_vm0, %v1174_v33  }
 0x2e4   :  { %1047 = vst.msk [vmem:[#allocation0 + $0x61] ss:$40 sm:$0x3] %vm3_vm0, %v1044_v38  }
 0x2e5   :  { %1049 = vst.msk [vmem:[#allocation0 - $0x3f] ss:$40 sm:$0xc] %vm3_vm0, %v1044_v38  }
 0x2e6   :  { %1051 = vst.msk [vmem:[#allocation0 + $0x61] ss:$40 sm:$0x30] %vm3_vm0, %v1044_v38  }
 0x2e7   :  { %v4587_v53 = vld [vmem:[#allocation0 + $0xce0] sm:$0x3]  ;;  %v4617_v56 = vld [vmem:[#allocation0 + $0xd08] sm:$0x3] }
 0x2e8   :  { %v4527_v54 = vld [vmem:[#allocation0 + $0xc90] sm:$0x3]  ;;  %v4557_v55 = vld [vmem:[#allocation0 + $0xcb8] sm:$0x3]  ;;  %7207 = vst [vmem:[%s11716_s1 + $0x338] sm:$0x3] %v4587_v53 }
 0x2e9   :  { %7197 = vst [vmem:[%s11716_s1 + $0x324] sm:$0x3] %v4527_v54  ;;  %v4707_v61 = vld [vmem:[#allocation0 + $0xd80] sm:$0x3]  ;;  %v4737_v62 = vld [vmem:[#allocation0 + $0xda8] sm:$0x3] }
 0x2ea   :  { %7202 = vst [vmem:[%s11716_s1 + $0x32e] sm:$0x3] %v4557_v55  ;;  %v4647_v59 = vld [vmem:[#allocation0 + $0xd30] sm:$0x3]  ;;  %v4677_v60 = vld [vmem:[#allocation0 + $0xd58] sm:$0x3] }
 0x2eb   :  { %1053 = vst.msk [vmem:[#allocation0 - $0x3f] ss:$40 sm:$0xc0] %vm3_vm0, %v1044_v38   ;;  %v2187_v1 = vld [vmem:[#allocation0 + $0x60] sm:$0x3]  ;;  %v9951_v38 = vpop.permute.xlu0 %1147  }
 0x2ec   :  { %7212 = vst [vmem:[%s11716_s1 + $0x342] sm:$0x3] %v4617_v56  ;;  %v2127_v63 = vld [vmem:[#allocation0 + $0x10] sm:$0x3]  ;;  %v2157_v0 = vld [vmem:[#allocation0 + $0x38] sm:$0x3] }
 0x2ed   :  { %7217 = vst [vmem:[%s11716_s1 + $0x34c] sm:$0x3] %v4647_v59  ;;  %v2217_v2 = vld [vmem:[#allocation0 + $0x88] sm:$0x3]  ;;  %v2307_v3 = vld [vmem:[#allocation0 + $0x100] sm:$0x3] }
 0x2ee   :  { %7222 = vst [vmem:[%s11716_s1 + $0x356] sm:$0x3] %v4677_v60  ;;  %v2337_v4 = vld [vmem:[#allocation0 + $0x128] sm:$0x3]  ;;  %v1327_v60 = vpop.permute.xlu2 %1326  }
 0x2ef   :  { %7227 = vst [vmem:[%s11716_s1 + $0x360] sm:$0x3] %v4707_v61  ;;  %v10012_v61 = vpop.permute.xlu1 %1199  }
 0x2f0   :  { %7232 = vst [vmem:[%s11716_s1 + $0x36a] sm:$0x3] %v4737_v62 }
 0x2f1   :  { %6797 = vst [vmem:[%s11716_s1 + $0x4] sm:$0x3] %v2127_v63 }
 0x2f2   :  { %1037 = vst.msk [vmem:[#allocation0 + $0x16e0] ss:$40 sm:$0x3] %vm3_vm0, %v9724_v39   ;;  %v2247_v49 = vld [vmem:[#allocation0 + $0xb0] sm:$0x3] }
 0x2f3   :  { %1039 = vst.msk [vmem:[#allocation0 + $0x1640] ss:$40 sm:$0xc] %vm3_vm0, %v9724_v39   ;;  %v2277_v50 = vld [vmem:[#allocation0 + $0xd8] sm:$0x3]  ;;  %v10032_v63 = vpop.permute.xlu0 %1186  }
 0x2f4   :  { %1041 = vst.msk [vmem:[#allocation0 + $0x1690] ss:$40 sm:$0x30] %vm3_vm0, %v9724_v39  }
 0x2f5   :  { %6802 = vst [vmem:[%s11716_s1 + $0xe] sm:$0x3] %v2157_v0 }
 0x2f6   :  { %6807 = vst [vmem:[%s11716_s1 + $0x18] sm:$0x3] %v2187_v1 }
 0x2f7   :  { %6812 = vst [vmem:[%s11716_s1 + $0x22] sm:$0x3] %v2217_v2 }
 0x2f8   :  { %6817 = vst [vmem:[%s11716_s1 + $0x2c] sm:$0x3] %v2247_v49 }
 0x2f9   :  { %6822 = vst [vmem:[%s11716_s1 + $0x36] sm:$0x3] %v2277_v50  ;;  %v10065_v50 = vld [vmem:[%s11715_s0 + $0x8] sm:$0xff]  }
 0x2fa   :  { %6827 = vst [vmem:[%s11716_s1 + $0x40] sm:$0x3] %v2307_v3  ;;  %1784 = vrot.lane.b32.xlu2 %v10065_v50, %s7561_s7 }
 0x2fb   :  { %6832 = vst [vmem:[%s11716_s1 + $0x4a] sm:$0x3] %v2337_v4 }
 0x2fc   :  { %1216 = vst.msk [vmem:[#allocation0 + $0x10a1] ss:$40 sm:$0x3] %vm3_vm0, %v1213_v51  }
 0x2fd   :  { %1218 = vst.msk [vmem:[#allocation0 + $0x1001] ss:$40 sm:$0xc] %vm3_vm0, %v1213_v51  }
 0x2fe   :  { %1220 = vst.msk [vmem:[#allocation0 + $0x10a1] ss:$40 sm:$0x30] %vm3_vm0, %v1213_v51  }
 0x2ff   :  { %1222 = vst.msk [vmem:[#allocation0 + $0x1001] ss:$40 sm:$0xc0] %vm3_vm0, %v1213_v51  }
 0x300   :  { %1086 = vst.msk [vmem:[#allocation0 + $0x421] ss:$40 sm:$0x3] %vm3_vm0, %v1083_v52  }
 0x301   :  { %1088 = vst.msk [vmem:[#allocation0 + $0x381] ss:$40 sm:$0xc] %vm3_vm0, %v1083_v52  }
 0x302   :  { %1090 = vst.msk [vmem:[#allocation0 + $0x421] ss:$40 sm:$0x30] %vm3_vm0, %v1083_v52  }
 0x303   :  { %v5307_v6 = vld [vmem:[#allocation0 + $0x10a0] sm:$0x3]  ;;  %1092 = vst.msk [vmem:[#allocation0 + $0x381] ss:$40 sm:$0xc0] %vm3_vm0, %v1083_v52  }
 0x304   :  { %v5247_v7 = vld [vmem:[#allocation0 + $0x1050] sm:$0x3]  ;;  %v5277_v9 = vld [vmem:[#allocation0 + $0x1078] sm:$0x3]  ;;  %7327 = vst [vmem:[%s11716_s1 + $0x428] sm:$0x3] %v5307_v6 }
 0x305   :  { %7317 = vst [vmem:[%s11716_s1 + $0x414] sm:$0x3] %v5247_v7  ;;  %v5337_v19 = vld [vmem:[#allocation0 + $0x10c8] sm:$0x3]  ;;  %v5427_v58 = vld [vmem:[#allocation0 + $0x1140] sm:$0x3] }
 0x306   :  { %7322 = vst [vmem:[%s11716_s1 + $0x41e] sm:$0x3] %v5277_v9  ;;  %v5367_v20 = vld [vmem:[#allocation0 + $0x10f0] sm:$0x3]  ;;  %v5397_v13 = vld [vmem:[#allocation0 + $0x1118] sm:$0x3] }
 0x307   :  { %v2907_v12 = vld [vmem:[#allocation0 + $0x420] sm:$0x3]  ;;  %v2937_v16 = vld [vmem:[#allocation0 + $0x448] sm:$0x3]  ;;  %7332 = vst [vmem:[%s11716_s1 + $0x432] sm:$0x3] %v5337_v19 }
 0x308   :  { %v2847_v48 = vld [vmem:[#allocation0 + $0x3d0] sm:$0x3]  ;;  %v2877_v15 = vld [vmem:[#allocation0 + $0x3f8] sm:$0x3]  ;;  %6927 = vst [vmem:[%s11716_s1 + $0x108] sm:$0x3] %v2907_v12 }
 0x309   :  { %6917 = vst [vmem:[%s11716_s1 + $0xf4] sm:$0x3] %v2847_v48  ;;  %v3027_v17 = vld [vmem:[#allocation0 + $0x4c0] sm:$0x3]  ;;  %v3057_v18 = vld [vmem:[#allocation0 + $0x4e8] sm:$0x3] }
 0x30a   :  { %6922 = vst [vmem:[%s11716_s1 + $0xfe] sm:$0x3] %v2877_v15  ;;  %v5457_v10 = vld [vmem:[#allocation0 + $0x1168] sm:$0x3]  ;;  %v2967_v14 = vld [vmem:[#allocation0 + $0x470] sm:$0x3] }
 0x30b   :  { %6932 = vst [vmem:[%s11716_s1 + $0x112] sm:$0x3] %v2937_v16  ;;  %v2997_v21 = vld [vmem:[#allocation0 + $0x498] sm:$0x3]  ;;  %v10090_v48 = vld [vmem:[%s11715_s0] sm:$0xff]  }
 0x30c   :  { %6947 = vst [vmem:[%s11716_s1 + $0x130] sm:$0x3] %v3027_v17  ;;  %1775 = vrot.lane.b32.xlu1 %v10090_v48, %s7561_s7  ;;  %v10103_v17 = vpop.permute.xlu2 %1365  }
 0x30d   :  { %6952 = vst [vmem:[%s11716_s1 + $0x13a] sm:$0x3] %v3057_v18  ;;  %v10105_v18 = vpop.permute.xlu1 %1238  }
 0x30e   :  { %7337 = vst [vmem:[%s11716_s1 + $0x43c] sm:$0x3] %v5367_v20  ;;  %v10122_v20 = vpop.permute.xlu0 %1225  }
 0x30f   :  { %7342 = vst [vmem:[%s11716_s1 + $0x446] sm:$0x3] %v5397_v13 }
 0x310   :  { %7347 = vst [vmem:[%s11716_s1 + $0x450] sm:$0x3] %v5427_v58 }
 0x311   :  { %7352 = vst [vmem:[%s11716_s1 + $0x45a] sm:$0x3] %v5457_v10 }
 0x312   :  { %1073 = vst.msk [vmem:[#allocation0 + $0x2e1] ss:$40 sm:$0x3] %vm3_vm0, %v9792_v57  }
 0x313   :  { %1075 = vst.msk [vmem:[#allocation0 + $0x241] ss:$40 sm:$0xc] %vm3_vm0, %v9792_v57  }
 0x314   :  { %1077 = vst.msk [vmem:[#allocation0 + $0x2e1] ss:$40 sm:$0x30] %vm3_vm0, %v9792_v57  }
 0x315   :  { %1079 = vst.msk [vmem:[#allocation0 + $0x241] ss:$40 sm:$0xc0] %vm3_vm0, %v9792_v57  }
 0x316   :  { %6937 = vst [vmem:[%s11716_s1 + $0x11c] sm:$0x3] %v2967_v14 }
 0x317   :  { %6942 = vst [vmem:[%s11716_s1 + $0x126] sm:$0x3] %v2997_v21 }
 0x318   :  { %1255 = vst.msk [vmem:[#allocation0 + $0x1461] ss:$40 sm:$0x3] %vm3_vm0, %v1252_v5  }
 0x319   :  { %v2667_v22 = vld [vmem:[#allocation0 + $0x2e0] sm:$0x3]  ;;  %v2697_v23 = vld [vmem:[#allocation0 + $0x308] sm:$0x3]  ;;  %1336 = vst.msk [vmem:[#allocation0 + $0x471] sm:$0x80] %vm3_vm0, %v1327_v60  }
 0x31a   :  { %v2607_v24 = vld [vmem:[#allocation0 + $0x290] sm:$0x3]  ;;  %v2637_v25 = vld [vmem:[#allocation0 + $0x2b8] sm:$0x3]  ;;  %6887 = vst [vmem:[%s11716_s1 + $0xb8] sm:$0x3] %v2667_v22 }
 0x31b   :  { %6877 = vst [vmem:[%s11716_s1 + $0xa4] sm:$0x3] %v2607_v24  ;;  %v2787_v26 = vld [vmem:[#allocation0 + $0x380] sm:$0x3]  ;;  %v2817_v27 = vld [vmem:[#allocation0 + $0x3a8] sm:$0x3] }
 0x31c   :  { %6882 = vst [vmem:[%s11716_s1 + $0xae] sm:$0x3] %v2637_v25  ;;  %v2727_v28 = vld [vmem:[#allocation0 + $0x330] sm:$0x3]  ;;  %v2757_v29 = vld [vmem:[#allocation0 + $0x358] sm:$0x3] }
 0x31d   :  { %6892 = vst [vmem:[%s11716_s1 + $0xc2] sm:$0x3] %v2697_v23  ;;  %v10160_v25 = vld [vmem:[%s11715_s0 + $0x20] sm:$0xff]  }
 0x31e   :  { %6907 = vst [vmem:[%s11716_s1 + $0xe0] sm:$0x3] %v2787_v26  ;;  %1811 = vrot.lane.b32.xlu2 %v10160_v25, %s7561_s7 }
 0x31f   :  { %6912 = vst [vmem:[%s11716_s1 + $0xea] sm:$0x3] %v2817_v27  ;;  %v6027_v32 = vld [vmem:[#allocation0 + $0x1460] sm:$0x3]  ;;  %v6057_v33 = vld [vmem:[#allocation0 + $0x1488] sm:$0x3] }
 0x320   :  { %6897 = vst [vmem:[%s11716_s1 + $0xcc] sm:$0x3] %v2727_v28 }
 0x321   :  { %6902 = vst [vmem:[%s11716_s1 + $0xd6] sm:$0x3] %v2757_v29 }
 0x322   :  { %1257 = vst.msk [vmem:[#allocation0 + $0x13c1] ss:$40 sm:$0xc] %vm3_vm0, %v1252_v5  }
 0x323   :  { %1259 = vst.msk [vmem:[#allocation0 + $0x1461] ss:$40 sm:$0x30] %vm3_vm0, %v1252_v5  }
 0x324   :  { %1261 = vst.msk [vmem:[#allocation0 + $0x13c1] ss:$40 sm:$0xc0] %vm3_vm0, %v1252_v5  }
 0x325   :  { %1125 = vst.msk [vmem:[#allocation0 + $0x7e1] ss:$40 sm:$0x3] %vm3_vm0, %v1122_v11  }
 0x326   :  { %1127 = vst.msk [vmem:[#allocation0 + $0x741] ss:$40 sm:$0xc] %vm3_vm0, %v1122_v11  }
 0x327   :  { %1129 = vst.msk [vmem:[#allocation0 + $0x7e1] ss:$40 sm:$0x30] %vm3_vm0, %v1122_v11  }
 0x328   :  { %1131 = vst.msk [vmem:[#allocation0 + $0x741] ss:$40 sm:$0xc0] %vm3_vm0, %v1122_v11  }
 0x329   :  { %v5967_v34 = vld [vmem:[#allocation0 + $0x1410] sm:$0x3]  ;;  %v5997_v35 = vld [vmem:[#allocation0 + $0x1438] sm:$0x3]  ;;  %7447 = vst [vmem:[%s11716_s1 + $0x518] sm:$0x3] %v6027_v32 }
 0x32a   :  { %7437 = vst [vmem:[%s11716_s1 + $0x504] sm:$0x3] %v5967_v34  ;;  %v6147_v39 = vld [vmem:[#allocation0 + $0x1500] sm:$0x3]  ;;  %v6177_v40 = vld [vmem:[#allocation0 + $0x1528] sm:$0x3] }
 0x32b   :  { %v6087_v36 = vld [vmem:[#allocation0 + $0x14b0] sm:$0x3]  ;;  %v6117_v37 = vld [vmem:[#allocation0 + $0x14d8] sm:$0x3]  ;;  %7442 = vst [vmem:[%s11716_s1 + $0x50e] sm:$0x3] %v5997_v35  ;;  %v10199_v35 = vpop.permute.xlu2 %1404  }
 0x32c   :  { %7452 = vst [vmem:[%s11716_s1 + $0x522] sm:$0x3] %v6057_v33  ;;  %v3627_v43 = vld [vmem:[#allocation0 + $0x7e0] sm:$0x3]  ;;  %v3657_v44 = vld [vmem:[#allocation0 + $0x808] sm:$0x3] }
 0x32d   :  { %7457 = vst [vmem:[%s11716_s1 + $0x52c] sm:$0x3] %v6087_v36  ;;  %v3567_v41 = vld [vmem:[#allocation0 + $0x790] sm:$0x3]  ;;  %v3597_v42 = vld [vmem:[#allocation0 + $0x7b8] sm:$0x3]  ;;  %v10201_v36 = vpop.permute.xlu1 %1277  }
 0x32e   :  { %7462 = vst [vmem:[%s11716_s1 + $0x536] sm:$0x3] %v6117_v37  ;;  %v3747_v56 = vld [vmem:[#allocation0 + $0x880] sm:$0x3]  ;;  %v3777_v57 = vld [vmem:[#allocation0 + $0x8a8] sm:$0x3] }
 0x32f   :  { %7467 = vst [vmem:[%s11716_s1 + $0x540] sm:$0x3] %v6147_v39  ;;  %v3687_v54 = vld [vmem:[#allocation0 + $0x830] sm:$0x3]  ;;  %v3717_v55 = vld [vmem:[#allocation0 + $0x858] sm:$0x3] }
 0x330   :  { %7472 = vst [vmem:[%s11716_s1 + $0x54a] sm:$0x3] %v6177_v40  ;;  %v10187_v32 = vld [vmem:[%s11715_s0 + $0x10] sm:$0xff]  }
 0x331   :  { %1112 = vst.msk [vmem:[#allocation0 + $0x6a1] ss:$40 sm:$0x3] %vm3_vm0, %v9860_v8   ;;  %1793 = vrot.lane.b32.xlu0 %v10187_v32, %s7561_s7 }
 0x332   :  { %1114 = vst.msk [vmem:[#allocation0 + $0x601] ss:$40 sm:$0xc] %vm3_vm0, %v9860_v8  }
 0x333   :  { %1116 = vst.msk [vmem:[#allocation0 + $0x6a1] ss:$40 sm:$0x30] %vm3_vm0, %v9860_v8  }
 0x334   :  { %1118 = vst.msk [vmem:[#allocation0 + $0x601] ss:$40 sm:$0xc0] %vm3_vm0, %v9860_v8  }
 0x335   :  { %7037 = vst [vmem:[%s11716_s1 + $0x1e4] sm:$0x3] %v3567_v41 }
 0x336   :  { %7042 = vst [vmem:[%s11716_s1 + $0x1ee] sm:$0x3] %v3597_v42 }
 0x337   :  { %7047 = vst [vmem:[%s11716_s1 + $0x1f8] sm:$0x3] %v3627_v43 }
 0x338   :  { %v3387_v45 = vld [vmem:[#allocation0 + $0x6a0] sm:$0x3]  ;;  %v3417_v46 = vld [vmem:[#allocation0 + $0x6c8] sm:$0x3]  ;;  %7052 = vst [vmem:[%s11716_s1 + $0x202] sm:$0x3] %v3657_v44 }
 0x339   :  { %v3327_v47 = vld [vmem:[#allocation0 + $0x650] sm:$0x3]  ;;  %v3357_v51 = vld [vmem:[#allocation0 + $0x678] sm:$0x3]  ;;  %7007 = vst [vmem:[%s11716_s1 + $0x1a8] sm:$0x3] %v3387_v45 }
 0x33a   :  { %6997 = vst [vmem:[%s11716_s1 + $0x194] sm:$0x3] %v3327_v47  ;;  %v3507_v52 = vld [vmem:[#allocation0 + $0x740] sm:$0x3]  ;;  %v3537_v53 = vld [vmem:[#allocation0 + $0x768] sm:$0x3] }
 0x33b   :  { %7002 = vst [vmem:[%s11716_s1 + $0x19e] sm:$0x3] %v3357_v51  ;;  %v3447_v59 = vld [vmem:[#allocation0 + $0x6f0] sm:$0x3]  ;;  %v3477_v62 = vld [vmem:[#allocation0 + $0x718] sm:$0x3] }
 0x33c   :  { %7012 = vst [vmem:[%s11716_s1 + $0x1b2] sm:$0x3] %v3417_v46  ;;  %v10253_v44 = vld [vmem:[%s11715_s0 + $0x3e] sm:$0xff]   ;;  %v10266_v51 = vld.sshfl [vmem:[%s11715_s0 + $0x30] sm:$0xff pattern:$0xdcba9810]  }
 0x33d   :  { %7027 = vst [vmem:[%s11716_s1 + $0x1d0] sm:$0x3] %v3507_v52  ;;  %1838 = vrot.lane.b32.xlu2 %v10253_v44, %s7561_s7  ;;  %v10271_v52 = vld [vmem:[%s11715_s0 + $0x28] sm:$0xff]  }
 0x33e   :  { %7032 = vst [vmem:[%s11716_s1 + $0x1da] sm:$0x3] %v3537_v53  ;;  %1820 = vrot.lane.b32.xlu0 %v10271_v52, %s7561_s7 }
 0x33f   :  { %7057 = vst [vmem:[%s11716_s1 + $0x20c] sm:$0x3] %v3687_v54 }
 0x340   :  { %7062 = vst [vmem:[%s11716_s1 + $0x216] sm:$0x3] %v3717_v55 }
 0x341   :  { %7067 = vst [vmem:[%s11716_s1 + $0x220] sm:$0x3] %v3747_v56  ;;  %v10286_v56 = vpop.permute.xlu2 %1443  }
 0x342   :  { %7072 = vst [vmem:[%s11716_s1 + $0x22a] sm:$0x3] %v3777_v57  ;;  %v10288_v57 = vpop.permute.xlu1 %1313  }
 0x343   :  { %7017 = vst [vmem:[%s11716_s1 + $0x1bc] sm:$0x3] %v3447_v59 }
 0x344   :  { %7022 = vst [vmem:[%s11716_s1 + $0x1c6] sm:$0x3] %v3477_v62 }
 0x345   :  { %1291 = vst.msk [vmem:[#allocation0 + $0x40] ss:$40 sm:$0x7] %vm3_vm0, %v9933_v30  }
 0x346   :  { %1293 = vst.msk [vmem:[#allocation0 - $0x240] ss:$200 sm:$0x18] %vm3_vm0, %v9933_v30  }
 0x347   :  { %1295 = vst.msk [vmem:[#allocation0 + $0x40] ss:$40 sm:$0x60] %vm3_vm0, %v9933_v30  }
 0x348   :  { %1164 = vst.msk [vmem:[#allocation0 + $0xba1] ss:$40 sm:$0x3] %vm3_vm0, %v9935_v31  }
 0x349   :  { %1166 = vst.msk [vmem:[#allocation0 + $0xb01] ss:$40 sm:$0xc] %vm3_vm0, %v9935_v31  }
 0x34a   :  { %1168 = vst.msk [vmem:[#allocation0 + $0xba1] ss:$40 sm:$0x30] %vm3_vm0, %v9935_v31  }
 0x34b   :  { %1170 = vst.msk [vmem:[#allocation0 + $0xb01] ss:$40 sm:$0xc0] %vm3_vm0, %v9935_v31   ;;  %v10182_v31 = vld [vmem:[%s11715_s0 + $0x18] sm:$0xff]  }
 0x34c   :  { %1151 = vst.msk [vmem:[#allocation0 + $0xa61] ss:$40 sm:$0x3] %vm3_vm0, %v9951_v38   ;;  %1802 = vrot.lane.b32.xlu1 %v10182_v31, %s7561_s7 }
 0x34d   :  { %1153 = vst.msk [vmem:[#allocation0 + $0x9c1] ss:$40 sm:$0xc] %vm3_vm0, %v9951_v38  }
 0x34e   :  { %1155 = vst.msk [vmem:[#allocation0 + $0xa61] ss:$40 sm:$0x30] %vm3_vm0, %v9951_v38  }
 0x34f   :  { %v4347_v0 = vld [vmem:[#allocation0 + $0xba0] sm:$0x3]  ;;  %1157 = vst.msk [vmem:[#allocation0 + $0x9c1] ss:$40 sm:$0xc0] %vm3_vm0, %v9951_v38   ;;  %v10219_v38 = vpop.permute.xlu0 %1264  }
 0x350   :  { %v4287_v1 = vld [vmem:[#allocation0 + $0xb50] sm:$0x3]  ;;  %v4317_v2 = vld [vmem:[#allocation0 + $0xb78] sm:$0x3]  ;;  %7167 = vst [vmem:[%s11716_s1 + $0x2e8] sm:$0x3] %v4347_v0 }
 0x351   :  { %7157 = vst [vmem:[%s11716_s1 + $0x2d4] sm:$0x3] %v4287_v1  ;;  %v4377_v9 = vld [vmem:[#allocation0 + $0xbc8] sm:$0x3]  ;;  %v4467_v15 = vld [vmem:[#allocation0 + $0xc40] sm:$0x3] }
 0x352   :  { %7162 = vst [vmem:[%s11716_s1 + $0x2de] sm:$0x3] %v4317_v2  ;;  %v4407_v11 = vld [vmem:[#allocation0 + $0xbf0] sm:$0x3]  ;;  %v4437_v12 = vld [vmem:[#allocation0 + $0xc18] sm:$0x3] }
 0x353   :  { %v4107_v49 = vld [vmem:[#allocation0 + $0xa60] sm:$0x3]  ;;  %v4137_v5 = vld [vmem:[#allocation0 + $0xa88] sm:$0x3]  ;;  %7172 = vst [vmem:[%s11716_s1 + $0x2f2] sm:$0x3] %v4377_v9 }
 0x354   :  { %v4047_v3 = vld [vmem:[#allocation0 + $0xa10] sm:$0x3]  ;;  %v4077_v4 = vld [vmem:[#allocation0 + $0xa38] sm:$0x3]  ;;  %7127 = vst [vmem:[%s11716_s1 + $0x298] sm:$0x3] %v4107_v49  ;;  %1829 = vrot.lane.b32.xlu1 %v10266_v51, %s7561_s7 }
 0x355   :  { %7117 = vst [vmem:[%s11716_s1 + $0x284] sm:$0x3] %v4047_v3  ;;  %v4227_v6 = vld [vmem:[#allocation0 + $0xb00] sm:$0x3]  ;;  %v4257_v7 = vld [vmem:[#allocation0 + $0xb28] sm:$0x3]  ;;  %v10339_v3 = vpop.permute.xlu2 %1482  }
 0x356   :  { %7122 = vst [vmem:[%s11716_s1 + $0x28e] sm:$0x3] %v4077_v4  ;;  %v4497_v8 = vld [vmem:[#allocation0 + $0xc68] sm:$0x3]  ;;  %v4167_v16 = vld [vmem:[#allocation0 + $0xab0] sm:$0x3]  ;;  %v10355_v4 = vpop.permute.xlu1 %1352  }
 0x357   :  { %7132 = vst [vmem:[%s11716_s1 + $0x2a2] sm:$0x3] %v4137_v5  ;;  %v4197_v19 = vld [vmem:[#allocation0 + $0xad8] sm:$0x3]  ;;  %v10311_v0 = vpop.permute.xlu0 %1300   ;;  %v10332_v2 = vld [vmem:[%s11715_s0 + $0x4e] sm:$0xff]   ;;  %v10337_v49 = vld [vmem:[%s11715_s0 + $0x46] sm:$0xff]  }
 0x358   :  { %7147 = vst [vmem:[%s11716_s1 + $0x2c0] sm:$0x3] %v4227_v6  ;;  %v10327_v1 = vld [vmem:[%s11715_s0 + $0x56] sm:$0xff]   ;;  %1847 = vrot.lane.b32.xlu0 %v10337_v49, %s7561_s7 }
 0x359   :  { %7152 = vst [vmem:[%s11716_s1 + $0x2ca] sm:$0x3] %v4257_v7  ;;  %1865 = vrot.lane.b32.xlu2 %v10327_v1, %s7561_s7 }
 0x35a   :  { %7177 = vst [vmem:[%s11716_s1 + $0x2fc] sm:$0x3] %v4407_v11 }
 0x35b   :  { %7182 = vst [vmem:[%s11716_s1 + $0x306] sm:$0x3] %v4437_v12 }
 0x35c   :  { %7187 = vst [vmem:[%s11716_s1 + $0x310] sm:$0x3] %v4467_v15  ;;  %1856 = vrot.lane.b32.xlu1 %v10332_v2, %s7561_s7 }
 0x35d   :  { %7192 = vst [vmem:[%s11716_s1 + $0x31a] sm:$0x3] %v4497_v8 }
 0x35e   :  { %7137 = vst [vmem:[%s11716_s1 + $0x2ac] sm:$0x3] %v4167_v16 }
 0x35f   :  { %7142 = vst [vmem:[%s11716_s1 + $0x2b6] sm:$0x3] %v4197_v19  ;;  %v10363_v7 = vpop.permute.xlu0 %1339  }
 0x360   :  { %1330 = vst.msk [vmem:[#allocation0 + $0x400] ss:$40 sm:$0x7] %vm3_vm0, %v1327_v60  }
 0x361   :  { %1332 = vst.msk [vmem:[#allocation0 + $0x180] ss:$200 sm:$0x18] %vm3_vm0, %v1327_v60  }
 0x362   :  { %1334 = vst.msk [vmem:[#allocation0 + $0x400] ss:$40 sm:$0x60] %vm3_vm0, %v1327_v60  }
 0x363   :  { %1203 = vst.msk [vmem:[#allocation0 + $0xf61] ss:$40 sm:$0x3] %vm3_vm0, %v10012_v61  }
 0x364   :  { %1205 = vst.msk [vmem:[#allocation0 + $0xec1] ss:$40 sm:$0xc] %vm3_vm0, %v10012_v61  }
 0x365   :  { %1207 = vst.msk [vmem:[#allocation0 + $0xf61] ss:$40 sm:$0x30] %vm3_vm0, %v10012_v61  }
 0x366   :  { %1209 = vst.msk [vmem:[#allocation0 + $0xec1] ss:$40 sm:$0xc0] %vm3_vm0, %v10012_v61  }
 0x367   :  { %1190 = vst.msk [vmem:[#allocation0 + $0xe21] ss:$40 sm:$0x3] %vm3_vm0, %v10032_v63  }
 0x368   :  { %1192 = vst.msk [vmem:[#allocation0 + $0xd81] ss:$40 sm:$0xc] %vm3_vm0, %v10032_v63  }
 0x369   :  { %1194 = vst.msk [vmem:[#allocation0 + $0xe21] ss:$40 sm:$0x30] %vm3_vm0, %v10032_v63  }
 0x36a   :  { %v5067_v13 = vld [vmem:[#allocation0 + $0xf60] sm:$0x3]  ;;  %1375 = vst.msk [vmem:[#allocation0 + $0x831] sm:$0x80] %vm3_vm0, %v10103_v17   ;;  %v5097_v14 = vld [vmem:[#allocation0 + $0xf88] sm:$0x3] }
 0x36b   :  { %v5007_v58 = vld [vmem:[#allocation0 + $0xf10] sm:$0x3]  ;;  %v5037_v10 = vld [vmem:[#allocation0 + $0xf38] sm:$0x3]  ;;  %7287 = vst [vmem:[%s11716_s1 + $0x3d8] sm:$0x3] %v5067_v13 }
 0x36c   :  { %7277 = vst [vmem:[%s11716_s1 + $0x3c4] sm:$0x3] %v5007_v58  ;;  %v5187_v23 = vld [vmem:[#allocation0 + $0x1000] sm:$0x3]  ;;  %v5217_v24 = vld [vmem:[#allocation0 + $0x1028] sm:$0x3] }
 0x36d   :  { %7282 = vst [vmem:[%s11716_s1 + $0x3ce] sm:$0x3] %v5037_v10  ;;  %v5127_v21 = vld [vmem:[#allocation0 + $0xfb0] sm:$0x3]  ;;  %v5157_v22 = vld [vmem:[#allocation0 + $0xfd8] sm:$0x3] }
 0x36e   :  { %1196 = vst.msk [vmem:[#allocation0 + $0xd81] ss:$40 sm:$0xc0] %vm3_vm0, %v10032_v63   ;;  %v4827_v28 = vld [vmem:[#allocation0 + $0xe20] sm:$0x3] }
 0x36f   :  { %7292 = vst [vmem:[%s11716_s1 + $0x3e2] sm:$0x3] %v5097_v14  ;;  %v4767_v26 = vld [vmem:[#allocation0 + $0xdd0] sm:$0x3]  ;;  %v4797_v27 = vld [vmem:[#allocation0 + $0xdf8] sm:$0x3]  ;;  %v1392_v14 = vpop.permute.xlu1 %1391  }
 0x370   :  { %7297 = vst [vmem:[%s11716_s1 + $0x3ec] sm:$0x3] %v5127_v21  ;;  %v4857_v29 = vld [vmem:[#allocation0 + $0xe48] sm:$0x3]  ;;  %v4947_v34 = vld [vmem:[#allocation0 + $0xec0] sm:$0x3] }
 0x371   :  { %7302 = vst [vmem:[%s11716_s1 + $0x3f6] sm:$0x3] %v5157_v22  ;;  %v4977_v37 = vld [vmem:[#allocation0 + $0xee8] sm:$0x3]  ;;  %v10408_v10 = vld [vmem:[%s11715_s0 + $0x5e] sm:$0xff]  }
 0x372   :  { %7307 = vst [vmem:[%s11716_s1 + $0x400] sm:$0x3] %v5187_v23  ;;  %v10396_v13 = vld.sshfl [vmem:[%s11715_s0 + $0x66] sm:$0xff pattern:$0xdcba3210]   ;;  %1874 = vrot.lane.b32.xlu0 %v10408_v10, %s7561_s7 }
 0x373   :  { %7312 = vst [vmem:[%s11716_s1 + $0x40a] sm:$0x3] %v5217_v24  ;;  %1883 = vrot.lane.b32.xlu1 %v10396_v13, %s7561_s7  ;;  %v1379_v24 = vpop.permute.xlu0 %1378  }
 0x374   :  { %7237 = vst [vmem:[%s11716_s1 + $0x374] sm:$0x3] %v4767_v26  ;;  %v10437_v26 = vld [vmem:[%s11715_s0 + $0x8c] sm:$0xff]  }
 0x375   :  { %v4887_v30 = vld [vmem:[#allocation0 + $0xe70] sm:$0x3]  ;;  %7242 = vst [vmem:[%s11716_s1 + $0x37e] sm:$0x3] %v4797_v27  ;;  %v4917_v33 = vld [vmem:[#allocation0 + $0xe98] sm:$0x3] }
 0x376   :  { %7247 = vst [vmem:[%s11716_s1 + $0x388] sm:$0x3] %v4827_v28  ;;  %v10442_v27 = vld [vmem:[%s11715_s0 + $0x84] sm:$0xff]   ;;  %v10447_v28 = vld [vmem:[%s11715_s0 + $0x7c] sm:$0xff]  }
 0x377   :  { %7252 = vst [vmem:[%s11716_s1 + $0x392] sm:$0x3] %v4857_v29 }
 0x378   :  { %7257 = vst [vmem:[%s11716_s1 + $0x39c] sm:$0x3] %v4887_v30  ;;  %v10469_v30 = vpop.permute.xlu1 %1430  }
 0x379   :  { %7262 = vst [vmem:[%s11716_s1 + $0x3a6] sm:$0x3] %v4917_v33  ;;  %v10511_v33 = vld [vmem:[%s11715_s0 + $0x94] sm:$0xff]  }
 0x37a   :  { %7267 = vst [vmem:[%s11716_s1 + $0x3b0] sm:$0x3] %v4947_v34  ;;  %1901 = vrot.lane.b32.xlu0 %v10447_v28, %s7561_s7 }
 0x37b   :  { %7272 = vst [vmem:[%s11716_s1 + $0x3ba] sm:$0x3] %v4977_v37  ;;  %1910 = vrot.lane.b32.xlu1 %v10442_v27, %s7561_s7 }
 0x37c   :  { %1369 = vst.msk [vmem:[#allocation0 + $0x7c0] ss:$40 sm:$0x7] %vm3_vm0, %v10103_v17  }
 0x37d   :  { %1371 = vst.msk [vmem:[#allocation0 + $0x540] ss:$200 sm:$0x18] %vm3_vm0, %v10103_v17  }
 0x37e   :  { %1373 = vst.msk [vmem:[#allocation0 + $0x7c0] ss:$40 sm:$0x60] %vm3_vm0, %v10103_v17   ;;  %v10380_v17 = vpop.permute.xlu2 %1521  }
 0x37f   :  { %1242 = vst.msk [vmem:[#allocation0 + $0x1321] ss:$40 sm:$0x3] %vm3_vm0, %v10105_v18  }
 0x380   :  { %1244 = vst.msk [vmem:[#allocation0 + $0x1281] ss:$40 sm:$0xc] %vm3_vm0, %v10105_v18  }
 0x381   :  { %1246 = vst.msk [vmem:[#allocation0 + $0x1321] ss:$40 sm:$0x30] %vm3_vm0, %v10105_v18  }
 0x382   :  { %1248 = vst.msk [vmem:[#allocation0 + $0x1281] ss:$40 sm:$0xc0] %vm3_vm0, %v10105_v18   ;;  %1928 = vrot.lane.b32.xlu0 %v10511_v33, %s7561_s7 }
 0x383   :  { %1229 = vst.msk [vmem:[#allocation0 + $0x11e1] ss:$40 sm:$0x3] %vm3_vm0, %v10122_v20  }
 0x384   :  { %1231 = vst.msk [vmem:[#allocation0 + $0x1141] ss:$40 sm:$0xc] %vm3_vm0, %v10122_v20  }
 0x385   :  { %1233 = vst.msk [vmem:[#allocation0 + $0x11e1] ss:$40 sm:$0x30] %vm3_vm0, %v10122_v20  }
 0x386   :  { %v5787_v39 = vld [vmem:[#allocation0 + $0x1320] sm:$0x3]  ;;  %1414 = vst.msk [vmem:[#allocation0 + $0xbf1] sm:$0x80] %vm3_vm0, %v10199_v35   ;;  %v5817_v42 = vld [vmem:[#allocation0 + $0x1348] sm:$0x3]  ;;  %v1558_v29 = vpop.permute.xlu2 %1557  }
 0x387   :  { %v5727_v40 = vld [vmem:[#allocation0 + $0x12d0] sm:$0x3]  ;;  %v5757_v41 = vld [vmem:[#allocation0 + $0x12f8] sm:$0x3]  ;;  %7407 = vst [vmem:[%s11716_s1 + $0x4c8] sm:$0x3] %v5787_v39 }
 0x388   :  { %7397 = vst [vmem:[%s11716_s1 + $0x4b4] sm:$0x3] %v5727_v40  ;;  %v5907_v46 = vld [vmem:[#allocation0 + $0x13c0] sm:$0x3]  ;;  %v5937_v47 = vld [vmem:[#allocation0 + $0x13e8] sm:$0x3] }
 0x389   :  { %7402 = vst [vmem:[%s11716_s1 + $0x4be] sm:$0x3] %v5757_v41  ;;  %v5847_v43 = vld [vmem:[#allocation0 + $0x1370] sm:$0x3]  ;;  %v5877_v45 = vld [vmem:[#allocation0 + $0x1398] sm:$0x3] }
 0x38a   :  { %1235 = vst.msk [vmem:[#allocation0 + $0x1141] ss:$40 sm:$0xc0] %vm3_vm0, %v10122_v20   ;;  %v5547_v55 = vld [vmem:[#allocation0 + $0x11e0] sm:$0x3]  ;;  %v10391_v20 = vld [vmem:[%s11715_s0 + $0x74] sm:$0xff]   ;;  %1954 = vrot.lane.b32.xlu0 %v10065_v50, %s7562_s15 }
 0x38b   :  { %7412 = vst [vmem:[%s11716_s1 + $0x4d2] sm:$0x3] %v5817_v42  ;;  %v5487_v53 = vld [vmem:[#allocation0 + $0x1190] sm:$0x3]  ;;  %v5517_v54 = vld [vmem:[#allocation0 + $0x11b8] sm:$0x3]  ;;  %1892 = vrot.lane.b32.xlu2 %v10391_v20, %s7561_s7 }
 0x38c   :  { %7417 = vst [vmem:[%s11716_s1 + $0x4dc] sm:$0x3] %v5847_v43  ;;  %v5577_v59 = vld [vmem:[#allocation0 + $0x1208] sm:$0x3]  ;;  %v5667_v62 = vld [vmem:[#allocation0 + $0x1280] sm:$0x3] }
 0x38d   :  { %7422 = vst [vmem:[%s11716_s1 + $0x4e6] sm:$0x3] %v5877_v45  ;;  %v5697_v63 = vld [vmem:[#allocation0 + $0x12a8] sm:$0x3] }
 0x38e   :  { %7427 = vst [vmem:[%s11716_s1 + $0x4f0] sm:$0x3] %v5907_v46  ;;  %v1597_v34 = vpop.permute.xlu2 %1596  }
 0x38f   :  { %7432 = vst [vmem:[%s11716_s1 + $0x4fa] sm:$0x3] %v5937_v47 }
 0x390   :  { %7357 = vst [vmem:[%s11716_s1 + $0x464] sm:$0x3] %v5487_v53 }
 0x391   :  { %v5607_v60 = vld [vmem:[#allocation0 + $0x1230] sm:$0x3]  ;;  %7362 = vst [vmem:[%s11716_s1 + $0x46e] sm:$0x3] %v5517_v54  ;;  %v5637_v61 = vld [vmem:[#allocation0 + $0x1258] sm:$0x3] }
 0x392   :  { %7367 = vst [vmem:[%s11716_s1 + $0x478] sm:$0x3] %v5547_v55  ;;  %1981 = vrot.lane.b32.xlu0 %v10160_v25, %s7562_s15 }
 0x393   :  { %7372 = vst [vmem:[%s11716_s1 + $0x482] sm:$0x3] %v5577_v59  ;;  %1919 = vrot.lane.b32.xlu2 %v10437_v26, %s7561_s7 }
 0x394   :  { %7377 = vst [vmem:[%s11716_s1 + $0x48c] sm:$0x3] %v5607_v60 }
 0x395   :  { %7382 = vst [vmem:[%s11716_s1 + $0x496] sm:$0x3] %v5637_v61 }
 0x396   :  { %7387 = vst [vmem:[%s11716_s1 + $0x4a0] sm:$0x3] %v5667_v62 }
 0x397   :  { %7392 = vst [vmem:[%s11716_s1 + $0x4aa] sm:$0x3] %v5697_v63 }
 0x398   :  { %1408 = vst.msk [vmem:[#allocation0 + $0xb80] ss:$40 sm:$0x7] %vm3_vm0, %v10199_v35  }
 0x399   :  { %1410 = vst.msk [vmem:[#allocation0 + $0x900] ss:$200 sm:$0x18] %vm3_vm0, %v10199_v35  }
 0x39a   :  { %1412 = vst.msk [vmem:[#allocation0 + $0xb80] ss:$40 sm:$0x60] %vm3_vm0, %v10199_v35   ;;  %v1470_v35 = vpop.permute.xlu1 %1469   ;;  %2008 = vrot.lane.b32.xlu0 %v10253_v44, %s7562_s15 }
 0x39b   :  { %1281 = vst.msk [vmem:[#allocation0 + $0x16e1] ss:$40 sm:$0x3] %vm3_vm0, %v10201_v36   ;;  %1945 = vrot.lane.b32.xlu2 %v10090_v48, %s7562_s15  ;;  %v10487_v48 = vpop.permute.xlu0 %1417  }
 0x39c   :  { %1283 = vst.msk [vmem:[#allocation0 + $0x1641] ss:$40 sm:$0xc] %vm3_vm0, %v10201_v36  }
 0x39d   :  { %1285 = vst.msk [vmem:[#allocation0 + $0x1691] ss:$40 sm:$0x30] %vm3_vm0, %v10201_v36  }
 0x39e   :  { %1268 = vst.msk [vmem:[#allocation0 + $0x15a1] ss:$40 sm:$0x3] %vm3_vm0, %v10219_v38  }
 0x39f   :  { %1270 = vst.msk [vmem:[#allocation0 + $0x1501] ss:$40 sm:$0xc] %vm3_vm0, %v10219_v38  }
 0x3a0   :  { %1272 = vst.msk [vmem:[#allocation0 + $0x15a1] ss:$40 sm:$0x30] %vm3_vm0, %v10219_v38  }
 0x3a1   :  { %1274 = vst.msk [vmem:[#allocation0 + $0x1501] ss:$40 sm:$0xc0] %vm3_vm0, %v10219_v38   ;;  %v1636_v38 = vpop.permute.xlu2 %1635  }
 0x3a2   :  { %v6507_v5 = vld [vmem:[#allocation0 + $0x16e0] sm:$0x3]  ;;  %v6537_v6 = vld [vmem:[#allocation0 + $0x1708] sm:$0x3]  ;;  %1453 = vst.msk [vmem:[#allocation0 + $0xfb1] sm:$0x80] %vm3_vm0, %v10286_v56   ;;  %v1509_v43 = vpop.permute.xlu1 %1508   ;;  %2035 = vrot.lane.b32.xlu0 %v10327_v1, %s7562_s15 }
 0x3a3   :  { %v6447_v9 = vld [vmem:[#allocation0 + $0x1690] sm:$0x3]  ;;  %v6477_v11 = vld [vmem:[#allocation0 + $0x16b8] sm:$0x3]  ;;  %7527 = vst [vmem:[%s11716_s1 + $0x5b8] sm:$0x3] %v6507_v5  ;;  %1972 = vrot.lane.b32.xlu2 %v10182_v31, %s7562_s15  ;;  %v10529_v36 = vpop.permute.xlu0 %1456  }
 0x3a4   :  { %v6567_v12 = vld [vmem:[#allocation0 + $0x1730] sm:$0x3]  ;;  %7517 = vst [vmem:[%s11716_s1 + $0x5a4] sm:$0x3] %v6447_v9  ;;  %v6597_v15 = vld [vmem:[#allocation0 + $0x1758] sm:$0x3] }
 0x3a5   :  { %7522 = vst [vmem:[%s11716_s1 + $0x5ae] sm:$0x3] %v6477_v11  ;;  %v6267_v18 = vld [vmem:[#allocation0 + $0x15a0] sm:$0x3]  ;;  %v6297_v19 = vld [vmem:[#allocation0 + $0x15c8] sm:$0x3] }
 0x3a6   :  { %v6207_v8 = vld [vmem:[#allocation0 + $0x1550] sm:$0x3]  ;;  %7532 = vst [vmem:[%s11716_s1 + $0x5c2] sm:$0x3] %v6537_v6  ;;  %v6237_v16 = vld [vmem:[#allocation0 + $0x1578] sm:$0x3] }
 0x3a7   :  { %7537 = vst [vmem:[%s11716_s1 + $0x5cc] sm:$0x3] %v6567_v12  ;;  %v6387_v22 = vld [vmem:[#allocation0 + $0x1640] sm:$0x3]  ;;  %v6417_v23 = vld [vmem:[#allocation0 + $0x1668] sm:$0x3] }
 0x3a8   :  { %7542 = vst [vmem:[%s11716_s1 + $0x5d6] sm:$0x3] %v6597_v15  ;;  %v6327_v58 = vld [vmem:[#allocation0 + $0x15f0] sm:$0x3]  ;;  %v6357_v21 = vld [vmem:[#allocation0 + $0x1618] sm:$0x3] }
 0x3a9   :  { %7477 = vst [vmem:[%s11716_s1 + $0x554] sm:$0x3] %v6207_v8  ;;  %v6777_v31 = vld [vmem:[%s11715_s0 + $0x9c] sm:$0x3f]  }
 0x3aa   :  { %7482 = vst [vmem:[%s11716_s1 + $0x55e] sm:$0x3] %v6237_v16  ;;  %1937 = vrot.lane.b32.xlu1 %v6777_v31, %s7561_s7  ;;  %2062 = vrot.lane.b32.xlu0 %v10391_v20, %s7562_s15 }
 0x3ab   :  { %7487 = vst [vmem:[%s11716_s1 + $0x568] sm:$0x3] %v6267_v18  ;;  %1999 = vrot.lane.b32.xlu2 %v10266_v51, %s7562_s15  ;;  %v10597_v44 = vpop.permute.xlu0 %1495   ;;  %v1675_v51 = vpop.permute.xlu2 %1674  }
 0x3ac   :  { %7492 = vst [vmem:[%s11716_s1 + $0x572] sm:$0x3] %v6297_v19 }
 0x3ad   :  { %7497 = vst [vmem:[%s11716_s1 + $0x57c] sm:$0x3] %v6327_v58 }
 0x3ae   :  { %7502 = vst [vmem:[%s11716_s1 + $0x586] sm:$0x3] %v6357_v21 }
 0x3af   :  { %7507 = vst [vmem:[%s11716_s1 + $0x590] sm:$0x3] %v6387_v22 }
 0x3b0   :  { %7512 = vst [vmem:[%s11716_s1 + $0x59a] sm:$0x3] %v6417_v23 }
 0x3b1   :  { %1447 = vst.msk [vmem:[#allocation0 + $0xf40] ss:$40 sm:$0x7] %vm3_vm0, %v10286_v56  }
 0x3b2   :  { %1449 = vst.msk [vmem:[#allocation0 + $0xcc0] ss:$200 sm:$0x18] %vm3_vm0, %v10286_v56   ;;  %1963 = vrot.lane.b32.xlu1 %v10187_v32, %s7562_s15  ;;  %2089 = vrot.lane.b32.xlu0 %v10437_v26, %s7562_s15 }
 0x3b3   :  { %1451 = vst.msk [vmem:[#allocation0 + $0xf40] ss:$40 sm:$0x60] %vm3_vm0, %v10286_v56   ;;  %2026 = vrot.lane.b32.xlu2 %v10332_v2, %s7562_s15  ;;  %v10655_v59 = vpop.permute.xlu0 %1531  }
 0x3b4   :  { %1317 = vst.msk [vmem:[#allocation0 + $0x2c0] ss:$40 sm:$0x7] %vm3_vm0, %v10288_v57  }
 0x3b5   :  { %1319 = vst.msk [vmem:[#allocation0 + $0x40] ss:$200 sm:$0x18] %vm3_vm0, %v10288_v57  }
 0x3b6   :  { %1321 = vst.msk [vmem:[#allocation0 + $0x2c0] ss:$40 sm:$0x60] %vm3_vm0, %v10288_v57  }
 0x3b7   :  { %1323 = vst.msk [vmem:[#allocation0 + $0x331] sm:$0x80] %vm3_vm0, %v10288_v57   ;;  %v1545_v57 = vpop.permute.xlu1 %1544  }
 0x3b8   :  { %1304 = vst.msk [vmem:[#allocation0 + $0x180] ss:$40 sm:$0x7] %vm3_vm0, %v10311_v0  }
 0x3b9   :  { %1306 = vst.msk [vmem:[#allocation0 - $0x100] ss:$200 sm:$0x18] %vm3_vm0, %v10311_v0  }
 0x3ba   :  { %1308 = vst.msk [vmem:[#allocation0 + $0x180] ss:$40 sm:$0x60] %vm3_vm0, %v10311_v0   ;;  %1990 = vrot.lane.b32.xlu1 %v10271_v52, %s7562_s15 }
 0x3bb   :  { %1310 = vst.msk [vmem:[#allocation0 + $0x1f1] sm:$0x80] %vm3_vm0, %v10311_v0   ;;  %2053 = vrot.lane.b32.xlu2 %v10396_v13, %s7562_s15  ;;  %v10720_v16 = vpop.permute.xlu0 %1570  }
 0x3bc   :  { %1486 = vst.msk [vmem:[#allocation0 + $0x1300] ss:$40 sm:$0x7] %vm3_vm0, %v10339_v3  }
 0x3bd   :  { %1488 = vst.msk [vmem:[#allocation0 + $0x1080] ss:$200 sm:$0x18] %vm3_vm0, %v10339_v3  }
 0x3be   :  { %1490 = vst.msk [vmem:[#allocation0 + $0x1300] ss:$40 sm:$0x60] %vm3_vm0, %v10339_v3  }
 0x3bf   :  { %1492 = vst.msk [vmem:[#allocation0 + $0x1371] sm:$0x80] %vm3_vm0, %v10339_v3   ;;  %v1714_v3 = vpop.permute.xlu2 %1713   ;;  %v10700_v6 = vpop.permute.xlu1 %1583  }
 0x3c0   :  { %1356 = vst.msk [vmem:[#allocation0 + $0x680] ss:$40 sm:$0x7] %vm3_vm0, %v10355_v4  }
 0x3c1   :  { %1358 = vst.msk [vmem:[#allocation0 + $0x400] ss:$200 sm:$0x18] %vm3_vm0, %v10355_v4  }
 0x3c2   :  { %1360 = vst.msk [vmem:[#allocation0 + $0x680] ss:$40 sm:$0x60] %vm3_vm0, %v10355_v4   ;;  %2017 = vrot.lane.b32.xlu1 %v10337_v49, %s7562_s15 }
 0x3c3   :  { %1362 = vst.msk [vmem:[#allocation0 + $0x6f1] sm:$0x80] %vm3_vm0, %v10355_v4   ;;  %2080 = vrot.lane.b32.xlu2 %v10442_v27, %s7562_s15 }
 0x3c4   :  { %1343 = vst.msk [vmem:[#allocation0 + $0x540] ss:$40 sm:$0x7] %vm3_vm0, %v10363_v7  }
 0x3c5   :  { %1345 = vst.msk [vmem:[#allocation0 + $0x2c0] ss:$200 sm:$0x18] %vm3_vm0, %v10363_v7  }
 0x3c6   :  { %1347 = vst.msk [vmem:[#allocation0 + $0x540] ss:$40 sm:$0x60] %vm3_vm0, %v10363_v7  }
 0x3c7   :  { %1349 = vst.msk [vmem:[#allocation0 + $0x5b1] sm:$0x80] %vm3_vm0, %v10363_v7  }
 0x3c8   :  { %1525 = vst.msk [vmem:[#allocation0 + $0x16c0] ss:$40 sm:$0x7] %vm3_vm0, %v10380_v17  }
 0x3c9   :  { %1527 = vst.msk [vmem:[#allocation0 + $0x1440] ss:$200 sm:$0x18] %vm3_vm0, %v10380_v17  }
 0x3ca   :  { %1529 = vst.msk [vmem:[#allocation0 + $0x1733] sm:$0x20] %vm3_vm0, %v10380_v17   ;;  %2044 = vrot.lane.b32.xlu1 %v10408_v10, %s7562_s15 }
 0x3cb   :  { %1395 = vst.msk [vmem:[#allocation0 + $0xa40] ss:$40 sm:$0x7] %vm3_vm0, %v1392_v14  }
 0x3cc   :  { %1397 = vst.msk [vmem:[#allocation0 + $0x7c0] ss:$200 sm:$0x18] %vm3_vm0, %v1392_v14  }
 0x3cd   :  { %1399 = vst.msk [vmem:[#allocation0 + $0xa40] ss:$40 sm:$0x60] %vm3_vm0, %v1392_v14  }
 0x3ce   :  { %1401 = vst.msk [vmem:[#allocation0 + $0xab1] sm:$0x80] %vm3_vm0, %v1392_v14  }
 0x3cf   :  { %1382 = vst.msk [vmem:[#allocation0 + $0x900] ss:$40 sm:$0x7] %vm3_vm0, %v1379_v24  }
 0x3d0   :  { %1384 = vst.msk [vmem:[#allocation0 + $0x680] ss:$200 sm:$0x18] %vm3_vm0, %v1379_v24  }
 0x3d1   :  { %1386 = vst.msk [vmem:[#allocation0 + $0x900] ss:$40 sm:$0x60] %vm3_vm0, %v1379_v24  }
 0x3d2   :  { %1388 = vst.msk [vmem:[#allocation0 + $0x971] sm:$0x80] %vm3_vm0, %v1379_v24   ;;  %2071 = vrot.lane.b32.xlu1 %v10447_v28, %s7562_s15 }
 0x3d3   :  { %1561 = vst.msk [vmem:[#allocation0 + $0x2c1] ss:$40 sm:$0x7] %vm3_vm0, %v1558_v29  }
 0x3d4   :  { %1563 = vst.msk [vmem:[#allocation0 + $0x41] ss:$200 sm:$0x18] %vm3_vm0, %v1558_v29  }
 0x3d5   :  { %1565 = vst.msk [vmem:[#allocation0 + $0x2c1] ss:$40 sm:$0x60] %vm3_vm0, %v1558_v29  }
 0x3d6   :  { %1567 = vst.msk [vmem:[#allocation0 + $0x332] sm:$0x80] %vm3_vm0, %v1558_v29  }
 0x3d7   :  { %1434 = vst.msk [vmem:[#allocation0 + $0xe00] ss:$40 sm:$0x7] %vm3_vm0, %v10469_v30  }
 0x3d8   :  { %1436 = vst.msk [vmem:[#allocation0 + $0xb80] ss:$200 sm:$0x18] %vm3_vm0, %v10469_v30  }
 0x3d9   :  { %1438 = vst.msk [vmem:[#allocation0 + $0xe00] ss:$40 sm:$0x60] %vm3_vm0, %v10469_v30  }
 0x3da   :  { %v2643_v50 = vld [vmem:[#allocation0 + $0x2c0] sm:$0x3]  ;;  %v2673_v25 = vld [vmem:[#allocation0 + $0x2e8] sm:$0x3]  ;;  %v2703_v32 = vld [vmem:[#allocation0 + $0x310] sm:$0x3]  ;;  %2098 = vrot.lane.b32.xlu1 %v10511_v33, %s7562_s15 }
 0x3db   :  { %6883 = vst [vmem:[%s11716_s1 + $0xb0] sm:$0x3] %v2643_v50  ;;  %v2613_v41 = vld [vmem:[#allocation0 + $0x298] sm:$0x3]  ;;  %v2763_v42 = vld [vmem:[#allocation0 + $0x360] sm:$0x3] }
 0x3dc   :  { %6888 = vst [vmem:[%s11716_s1 + $0xba] sm:$0x3] %v2673_v25  ;;  %v2793_v37 = vld [vmem:[#allocation0 + $0x388] sm:$0x3]  ;;  %v2823_v40 = vld [vmem:[#allocation0 + $0x3b0] sm:$0x3] }
 0x3dd   :  { %6893 = vst [vmem:[%s11716_s1 + $0xc4] sm:$0x3] %v2703_v32  ;;  %v2733_v39 = vld [vmem:[#allocation0 + $0x338] sm:$0x3] }
 0x3de   :  { %6898 = vst [vmem:[%s11716_s1 + $0xce] sm:$0x3] %v2733_v39 }
 0x3df   :  { %6908 = vst [vmem:[%s11716_s1 + $0xe2] sm:$0x3] %v2793_v37 }
 0x3e0   :  { %6913 = vst [vmem:[%s11716_s1 + $0xec] sm:$0x3] %v2823_v40 }
 0x3e1   :  { %1440 = vst.msk [vmem:[#allocation0 + $0xe71] sm:$0x80] %vm3_vm0, %v10469_v30   ;;  %v1753_v30 = vpop.permute.xlu2 %1752  }
 0x3e2   :  { %6878 = vst [vmem:[%s11716_s1 + $0xa6] sm:$0x3] %v2613_v41 }
 0x3e3   :  { %6903 = vst [vmem:[%s11716_s1 + $0xd8] sm:$0x3] %v2763_v42 }
 0x3e4   :  { %1421 = vst.msk [vmem:[#allocation0 + $0xcc0] ss:$40 sm:$0x7] %vm3_vm0, %v10487_v48  }
 0x3e5   :  { %1423 = vst.msk [vmem:[#allocation0 + $0xa40] ss:$200 sm:$0x18] %vm3_vm0, %v10487_v48  }
 0x3e6   :  { %1425 = vst.msk [vmem:[#allocation0 + $0xcc0] ss:$40 sm:$0x60] %vm3_vm0, %v10487_v48  }
 0x3e7   :  { %1427 = vst.msk [vmem:[#allocation0 + $0xd31] sm:$0x80] %vm3_vm0, %v10487_v48  }
 0x3e8   :  { %1600 = vst.msk [vmem:[#allocation0 + $0x681] ss:$40 sm:$0x7] %vm3_vm0, %v1597_v34  }
 0x3e9   :  { %1602 = vst.msk [vmem:[#allocation0 + $0x401] ss:$200 sm:$0x18] %vm3_vm0, %v1597_v34  }
 0x3ea   :  { %1604 = vst.msk [vmem:[#allocation0 + $0x681] ss:$40 sm:$0x60] %vm3_vm0, %v1597_v34  }
 0x3eb   :  { %1606 = vst.msk [vmem:[#allocation0 + $0x6f2] sm:$0x80] %vm3_vm0, %v1597_v34   ;;  %v1623_v34 = vpop.permute.xlu1 %1622  }
 0x3ec   :  { %1473 = vst.msk [vmem:[#allocation0 + $0x11c0] ss:$40 sm:$0x7] %vm3_vm0, %v1470_v35  }
 0x3ed   :  { %1475 = vst.msk [vmem:[#allocation0 + $0xf40] ss:$200 sm:$0x18] %vm3_vm0, %v1470_v35  }
 0x3ee   :  { %1477 = vst.msk [vmem:[#allocation0 + $0x11c0] ss:$40 sm:$0x60] %vm3_vm0, %v1470_v35  }
 0x3ef   :  { %1479 = vst.msk [vmem:[#allocation0 + $0x1231] sm:$0x80] %vm3_vm0, %v1470_v35   ;;  %v3363_v53 = vld [vmem:[#allocation0 + $0x680] sm:$0x3]  ;;  %v3393_v54 = vld [vmem:[#allocation0 + $0x6a8] sm:$0x3] }
 0x3f0   :  { %v3333_v45 = vld [vmem:[#allocation0 + $0x658] sm:$0x3]  ;;  %v3423_v55 = vld [vmem:[#allocation0 + $0x6d0] sm:$0x3]  ;;  %v3483_v56 = vld [vmem:[#allocation0 + $0x720] sm:$0x3] }
 0x3f1   :  { %v3513_v46 = vld [vmem:[#allocation0 + $0x748] sm:$0x3]  ;;  %v3543_v47 = vld [vmem:[#allocation0 + $0x770] sm:$0x3]  ;;  %6998 = vst [vmem:[%s11716_s1 + $0x196] sm:$0x3] %v3333_v45 }
 0x3f2   :  { %v3453_v52 = vld [vmem:[#allocation0 + $0x6f8] sm:$0x3]  ;;  %7028 = vst [vmem:[%s11716_s1 + $0x1d2] sm:$0x3] %v3513_v46 }
 0x3f3   :  { %7018 = vst [vmem:[%s11716_s1 + $0x1be] sm:$0x3] %v3453_v52 }
 0x3f4   :  { %7033 = vst [vmem:[%s11716_s1 + $0x1dc] sm:$0x3] %v3543_v47 }
 0x3f5   :  { %7003 = vst [vmem:[%s11716_s1 + $0x1a0] sm:$0x3] %v3363_v53 }
 0x3f6   :  { %7008 = vst [vmem:[%s11716_s1 + $0x1aa] sm:$0x3] %v3393_v54 }
 0x3f7   :  { %7013 = vst [vmem:[%s11716_s1 + $0x1b4] sm:$0x3] %v3423_v55 }
 0x3f8   :  { %7023 = vst [vmem:[%s11716_s1 + $0x1c8] sm:$0x3] %v3483_v56 }
 0x3f9   :  { %1460 = vst.msk [vmem:[#allocation0 + $0x1080] ss:$40 sm:$0x7] %vm3_vm0, %v10529_v36  }
 0x3fa   :  { %1462 = vst.msk [vmem:[#allocation0 + $0xe00] ss:$200 sm:$0x18] %vm3_vm0, %v10529_v36  }
 0x3fb   :  { %1464 = vst.msk [vmem:[#allocation0 + $0x1080] ss:$40 sm:$0x60] %vm3_vm0, %v10529_v36  }
 0x3fc   :  { %1466 = vst.msk [vmem:[#allocation0 + $0x10f1] sm:$0x80] %vm3_vm0, %v10529_v36  }
 0x3fd   :  { %1639 = vst.msk [vmem:[#allocation0 + $0xa41] ss:$40 sm:$0x7] %vm3_vm0, %v1636_v38  }
 0x3fe   :  { %1641 = vst.msk [vmem:[#allocation0 + $0x7c1] ss:$200 sm:$0x18] %vm3_vm0, %v1636_v38  }
 0x3ff   :  { %1643 = vst.msk [vmem:[#allocation0 + $0xa41] ss:$40 sm:$0x60] %vm3_vm0, %v1636_v38  }
 0x400   :  { %1645 = vst.msk [vmem:[#allocation0 + $0xab2] sm:$0x80] %vm3_vm0, %v1636_v38   ;;  %v10814_v38 = vpop.permute.xlu0 %1609  }
 0x401   :  { %1512 = vst.msk [vmem:[#allocation0 + $0x1580] ss:$40 sm:$0x7] %vm3_vm0, %v1509_v43  }
 0x402   :  { %1514 = vst.msk [vmem:[#allocation0 + $0x1300] ss:$200 sm:$0x18] %vm3_vm0, %v1509_v43  }
 0x403   :  { %1516 = vst.msk [vmem:[#allocation0 + $0x1580] ss:$40 sm:$0x60] %vm3_vm0, %v1509_v43  }
 0x404   :  { %v4083_v60 = vld [vmem:[#allocation0 + $0xa40] sm:$0x3]  ;;  %v4113_v61 = vld [vmem:[#allocation0 + $0xa68] sm:$0x3]  ;;  %v4143_v62 = vld [vmem:[#allocation0 + $0xa90] sm:$0x3] }
 0x405   :  { %7123 = vst [vmem:[%s11716_s1 + $0x290] sm:$0x3] %v4083_v60  ;;  %v4053_v0 = vld [vmem:[#allocation0 + $0xa18] sm:$0x3]  ;;  %v4203_v1 = vld [vmem:[#allocation0 + $0xae0] sm:$0x3] }
 0x406   :  { %7128 = vst [vmem:[%s11716_s1 + $0x29a] sm:$0x3] %v4113_v61  ;;  %v4233_v2 = vld [vmem:[#allocation0 + $0xb08] sm:$0x3]  ;;  %v4263_v49 = vld [vmem:[#allocation0 + $0xb30] sm:$0x3] }
 0x407   :  { %7133 = vst [vmem:[%s11716_s1 + $0x2a4] sm:$0x3] %v4143_v62  ;;  %v4173_v63 = vld [vmem:[#allocation0 + $0xab8] sm:$0x3] }
 0x408   :  { %7138 = vst [vmem:[%s11716_s1 + $0x2ae] sm:$0x3] %v4173_v63 }
 0x409   :  { %1518 = vst.msk [vmem:[#allocation0 + $0x15f1] sm:$0x80] %vm3_vm0, %v1509_v43  }
 0x40a   :  { %7118 = vst [vmem:[%s11716_s1 + $0x286] sm:$0x3] %v4053_v0 }
 0x40b   :  { %7143 = vst [vmem:[%s11716_s1 + $0x2b8] sm:$0x3] %v4203_v1 }
 0x40c   :  { %7148 = vst [vmem:[%s11716_s1 + $0x2c2] sm:$0x3] %v4233_v2  ;;  %v1649_v2 = vpop.permute.xlu0 %1648  }
 0x40d   :  { %7153 = vst [vmem:[%s11716_s1 + $0x2cc] sm:$0x3] %v4263_v49 }
 0x40e   :  { %1499 = vst.msk [vmem:[#allocation0 + $0x1440] ss:$40 sm:$0x7] %vm3_vm0, %v10597_v44  }
 0x40f   :  { %1501 = vst.msk [vmem:[#allocation0 + $0x11c0] ss:$200 sm:$0x18] %vm3_vm0, %v10597_v44  }
 0x410   :  { %1503 = vst.msk [vmem:[#allocation0 + $0x1440] ss:$40 sm:$0x60] %vm3_vm0, %v10597_v44  }
 0x411   :  { %1505 = vst.msk [vmem:[#allocation0 + $0x14b1] sm:$0x80] %vm3_vm0, %v10597_v44  }
 0x412   :  { %1678 = vst.msk [vmem:[#allocation0 + $0xe01] ss:$40 sm:$0x7] %vm3_vm0, %v1675_v51  }
 0x413   :  { %1680 = vst.msk [vmem:[#allocation0 + $0xb81] ss:$200 sm:$0x18] %vm3_vm0, %v1675_v51  }
 0x414   :  { %1682 = vst.msk [vmem:[#allocation0 + $0xe01] ss:$40 sm:$0x60] %vm3_vm0, %v1675_v51  }
 0x415   :  { %1684 = vst.msk [vmem:[#allocation0 + $0xe72] sm:$0x80] %vm3_vm0, %v1675_v51  }
 0x416   :  { %1548 = vst.msk [vmem:[#allocation0 + $0x181] ss:$40 sm:$0x7] %vm3_vm0, %v1545_v57  }
 0x417   :  { %1550 = vst.msk [vmem:[#allocation0 - $0xff] ss:$200 sm:$0x18] %vm3_vm0, %v1545_v57  }
 0x418   :  { %1552 = vst.msk [vmem:[#allocation0 + $0x181] ss:$40 sm:$0x60] %vm3_vm0, %v1545_v57  }
 0x419   :  { %1554 = vst.msk [vmem:[#allocation0 + $0x1f2] sm:$0x80] %vm3_vm0, %v1545_v57   ;;  %v4803_v20 = vld [vmem:[#allocation0 + $0xe00] sm:$0x3]  ;;  %v4833_v13 = vld [vmem:[#allocation0 + $0xe28] sm:$0x3]  ;;  %v10884_v57 = vpop.permute.xlu2 %1784  }
 0x41a   :  { %v4773_v4 = vld [vmem:[#allocation0 + $0xdd8] sm:$0x3]  ;;  %v4923_v5 = vld [vmem:[#allocation0 + $0xea0] sm:$0x3]  ;;  %v4863_v58 = vld [vmem:[#allocation0 + $0xe50] sm:$0x3] }
 0x41b   :  { %7238 = vst [vmem:[%s11716_s1 + $0x376] sm:$0x3] %v4773_v4  ;;  %v4953_v10 = vld [vmem:[#allocation0 + $0xec8] sm:$0x3]  ;;  %v4983_v14 = vld [vmem:[#allocation0 + $0xef0] sm:$0x3] }
 0x41c   :  { %v4893_v7 = vld [vmem:[#allocation0 + $0xe78] sm:$0x3]  ;;  %7263 = vst [vmem:[%s11716_s1 + $0x3a8] sm:$0x3] %v4923_v5 }
 0x41d   :  { %7258 = vst [vmem:[%s11716_s1 + $0x39e] sm:$0x3] %v4893_v7  ;;  %v2403_v9 = vld [vmem:[#allocation0 + $0x180] sm:$0x3]  ;;  %v2433_v11 = vld [vmem:[#allocation0 + $0x1a8] sm:$0x3] }
 0x41e   :  { %v2373_v12 = vld [vmem:[#allocation0 + $0x158] sm:$0x3]  ;;  %6843 = vst [vmem:[%s11716_s1 + $0x60] sm:$0x3] %v2403_v9  ;;  %v2463_v15 = vld [vmem:[#allocation0 + $0x1d0] sm:$0x3] }
 0x41f   :  { %6838 = vst [vmem:[%s11716_s1 + $0x56] sm:$0x3] %v2373_v12  ;;  %v2523_v8 = vld [vmem:[#allocation0 + $0x220] sm:$0x3]  ;;  %v2553_v18 = vld [vmem:[#allocation0 + $0x248] sm:$0x3] }
 0x420   :  { %6848 = vst [vmem:[%s11716_s1 + $0x6a] sm:$0x3] %v2433_v11  ;;  %v2493_v17 = vld [vmem:[#allocation0 + $0x1f8] sm:$0x3]  ;;  %v2583_v19 = vld [vmem:[#allocation0 + $0x270] sm:$0x3] }
 0x421   :  { %6853 = vst [vmem:[%s11716_s1 + $0x74] sm:$0x3] %v2463_v15 }
 0x422   :  { %6858 = vst [vmem:[%s11716_s1 + $0x7e] sm:$0x3] %v2493_v17 }
 0x423   :  { %6863 = vst [vmem:[%s11716_s1 + $0x88] sm:$0x3] %v2523_v8 }
 0x424   :  { %6868 = vst [vmem:[%s11716_s1 + $0x92] sm:$0x3] %v2553_v18 }
 0x425   :  { %6873 = vst [vmem:[%s11716_s1 + $0x9c] sm:$0x3] %v2583_v19 }
 0x426   :  { %7243 = vst [vmem:[%s11716_s1 + $0x380] sm:$0x3] %v4803_v20 }
 0x427   :  { %7248 = vst [vmem:[%s11716_s1 + $0x38a] sm:$0x3] %v4833_v13 }
 0x428   :  { %7253 = vst [vmem:[%s11716_s1 + $0x394] sm:$0x3] %v4863_v58  ;;  %v1812_v58 = vpop.permute.xlu2 %1811  }
 0x429   :  { %7268 = vst [vmem:[%s11716_s1 + $0x3b2] sm:$0x3] %v4953_v10 }
 0x42a   :  { %7273 = vst [vmem:[%s11716_s1 + $0x3bc] sm:$0x3] %v4983_v14 }
 0x42b   :  { %1535 = vst.msk [vmem:[#allocation0 + $0x41] ss:$40 sm:$0x7] %vm3_vm0, %v10655_v59  }
 0x42c   :  { %1537 = vst.msk [vmem:[#allocation0 - $0x23f] ss:$200 sm:$0x18] %vm3_vm0, %v10655_v59  }
 0x42d   :  { %1539 = vst.msk [vmem:[#allocation0 + $0x41] ss:$40 sm:$0x60] %vm3_vm0, %v10655_v59  }
 0x42e   :  { %1541 = vst.msk [vmem:[#allocation0 + $0xb2] sm:$0x80] %vm3_vm0, %v10655_v59   ;;  %v10886_v59 = vpop.permute.xlu1 %1661  }
 0x42f   :  { %1717 = vst.msk [vmem:[#allocation0 + $0x11c1] ss:$40 sm:$0x7] %vm3_vm0, %v1714_v3  }
 0x430   :  { %1719 = vst.msk [vmem:[#allocation0 + $0xf41] ss:$200 sm:$0x18] %vm3_vm0, %v1714_v3  }
 0x431   :  { %1721 = vst.msk [vmem:[#allocation0 + $0x11c1] ss:$40 sm:$0x60] %vm3_vm0, %v1714_v3  }
 0x432   :  { %v2163_v21 = vld [vmem:[#allocation0 + $0x40] sm:$0x3]  ;;  %v2193_v22 = vld [vmem:[#allocation0 + $0x68] sm:$0x3]  ;;  %v2223_v24 = vld [vmem:[#allocation0 + $0x90] sm:$0x3] }
 0x433   :  { %v2133_v23 = vld [vmem:[#allocation0 + $0x18] sm:$0x3]  ;;  %6803 = vst [vmem:[%s11716_s1 + $0x10] sm:$0x3] %v2163_v21  ;;  %v2283_v27 = vld [vmem:[#allocation0 + $0xe0] sm:$0x3] }
 0x434   :  { %6798 = vst [vmem:[%s11716_s1 + $0x6] sm:$0x3] %v2133_v23  ;;  %v2313_v28 = vld [vmem:[#allocation0 + $0x108] sm:$0x3]  ;;  %v2343_v29 = vld [vmem:[#allocation0 + $0x130] sm:$0x3] }
 0x435   :  { %v2253_v26 = vld [vmem:[#allocation0 + $0xb8] sm:$0x3]  ;;  %6808 = vst [vmem:[%s11716_s1 + $0x1a] sm:$0x3] %v2193_v22  ;;  %v1688_v22 = vpop.permute.xlu0 %1687  }
 0x436   :  { %6818 = vst [vmem:[%s11716_s1 + $0x2e] sm:$0x3] %v2253_v26  ;;  %v5523_v31 = vld [vmem:[#allocation0 + $0x11c0] sm:$0x3]  ;;  %v5553_v33 = vld [vmem:[#allocation0 + $0x11e8] sm:$0x3]  ;;  %v1701_v10 = vpop.permute.xlu1 %1700  }
 0x437   :  { %6813 = vst [vmem:[%s11716_s1 + $0x24] sm:$0x3] %v2223_v24  ;;  %v5493_v48 = vld [vmem:[#allocation0 + $0x1198] sm:$0x3]  ;;  %v5583_v36 = vld [vmem:[#allocation0 + $0x1210] sm:$0x3] }
 0x438   :  { %6823 = vst [vmem:[%s11716_s1 + $0x38] sm:$0x3] %v2283_v27  ;;  %v5643_v50 = vld [vmem:[#allocation0 + $0x1260] sm:$0x3]  ;;  %v5673_v25 = vld [vmem:[#allocation0 + $0x1288] sm:$0x3] }
 0x439   :  { %6828 = vst [vmem:[%s11716_s1 + $0x42] sm:$0x3] %v2313_v28  ;;  %v5703_v32 = vld [vmem:[#allocation0 + $0x12b0] sm:$0x3] }
 0x43a   :  { %6833 = vst [vmem:[%s11716_s1 + $0x4c] sm:$0x3] %v2343_v29 }
 0x43b   :  { %1723 = vst.msk [vmem:[#allocation0 + $0x1232] sm:$0x80] %vm3_vm0, %v1714_v3  }
 0x43c   :  { %1587 = vst.msk [vmem:[#allocation0 + $0x541] ss:$40 sm:$0x7] %vm3_vm0, %v10700_v6  }
 0x43d   :  { %1589 = vst.msk [vmem:[#allocation0 + $0x2c1] ss:$200 sm:$0x18] %vm3_vm0, %v10700_v6  }
 0x43e   :  { %1591 = vst.msk [vmem:[#allocation0 + $0x541] ss:$40 sm:$0x60] %vm3_vm0, %v10700_v6  }
 0x43f   :  { %1593 = vst.msk [vmem:[#allocation0 + $0x5b2] sm:$0x80] %vm3_vm0, %v10700_v6  }
 0x440   :  { %7358 = vst [vmem:[%s11716_s1 + $0x466] sm:$0x3] %v5493_v48 }
 0x441   :  { %7363 = vst [vmem:[%s11716_s1 + $0x470] sm:$0x3] %v5523_v31 }
 0x442   :  { %v5613_v35 = vld [vmem:[#allocation0 + $0x1238] sm:$0x3]  ;;  %7368 = vst [vmem:[%s11716_s1 + $0x47a] sm:$0x3] %v5553_v33 }
 0x443   :  { %7378 = vst [vmem:[%s11716_s1 + $0x48e] sm:$0x3] %v5613_v35  ;;  %v3123_v40 = vld [vmem:[#allocation0 + $0x540] sm:$0x3]  ;;  %v3153_v41 = vld [vmem:[#allocation0 + $0x568] sm:$0x3] }
 0x444   :  { %7373 = vst [vmem:[%s11716_s1 + $0x484] sm:$0x3] %v5583_v36  ;;  %v3093_v39 = vld [vmem:[#allocation0 + $0x518] sm:$0x3]  ;;  %v3183_v42 = vld [vmem:[#allocation0 + $0x590] sm:$0x3] }
 0x445   :  { %7383 = vst [vmem:[%s11716_s1 + $0x498] sm:$0x3] %v5643_v50  ;;  %v3243_v43 = vld [vmem:[#allocation0 + $0x5e0] sm:$0x3]  ;;  %v3273_v44 = vld [vmem:[#allocation0 + $0x608] sm:$0x3] }
 0x446   :  { %v3213_v37 = vld [vmem:[#allocation0 + $0x5b8] sm:$0x3]  ;;  %7388 = vst [vmem:[%s11716_s1 + $0x4a2] sm:$0x3] %v5673_v25  ;;  %v3303_v45 = vld [vmem:[#allocation0 + $0x630] sm:$0x3] }
 0x447   :  { %6978 = vst [vmem:[%s11716_s1 + $0x16e] sm:$0x3] %v3213_v37 }
 0x448   :  { %7393 = vst [vmem:[%s11716_s1 + $0x4ac] sm:$0x3] %v5703_v32 }
 0x449   :  { %1574 = vst.msk [vmem:[#allocation0 + $0x401] ss:$40 sm:$0x7] %vm3_vm0, %v10720_v16  }
 0x44a   :  { %1576 = vst.msk [vmem:[#allocation0 + $0x181] ss:$200 sm:$0x18] %vm3_vm0, %v10720_v16  }
 0x44b   :  { %1578 = vst.msk [vmem:[#allocation0 + $0x401] ss:$40 sm:$0x60] %vm3_vm0, %v10720_v16  }
 0x44c   :  { %1580 = vst.msk [vmem:[#allocation0 + $0x472] sm:$0x80] %vm3_vm0, %v10720_v16   ;;  %v6795_v16 = vld [vmem:[%s11715_s0 + $0x9c] sm:$0x3f]  }
 0x44d   :  { %6958 = vst [vmem:[%s11716_s1 + $0x146] sm:$0x3] %v3093_v39  ;;  %2107 = vrot.lane.b32.xlu2 %v6795_v16, %s7562_s15  ;;  %v1727_v39 = vpop.permute.xlu0 %1726  }
 0x44e   :  { %6963 = vst [vmem:[%s11716_s1 + $0x150] sm:$0x3] %v3123_v40 }
 0x44f   :  { %6968 = vst [vmem:[%s11716_s1 + $0x15a] sm:$0x3] %v3153_v41 }
 0x450   :  { %6973 = vst [vmem:[%s11716_s1 + $0x164] sm:$0x3] %v3183_v42  ;;  %v2883_v51 = vld [vmem:[#allocation0 + $0x400] sm:$0x3]  ;;  %v2913_v52 = vld [vmem:[#allocation0 + $0x428] sm:$0x3] }
 0x451   :  { %6983 = vst [vmem:[%s11716_s1 + $0x178] sm:$0x3] %v3243_v43  ;;  %v2853_v47 = vld [vmem:[#allocation0 + $0x3d8] sm:$0x3]  ;;  %v2943_v53 = vld [vmem:[#allocation0 + $0x450] sm:$0x3] }
 0x452   :  { %6988 = vst [vmem:[%s11716_s1 + $0x182] sm:$0x3] %v3273_v44  ;;  %v3003_v54 = vld [vmem:[#allocation0 + $0x4a0] sm:$0x3]  ;;  %v3033_v55 = vld [vmem:[#allocation0 + $0x4c8] sm:$0x3] }
 0x453   :  { %v2973_v46 = vld [vmem:[#allocation0 + $0x478] sm:$0x3]  ;;  %6993 = vst [vmem:[%s11716_s1 + $0x18c] sm:$0x3] %v3303_v45  ;;  %v3063_v56 = vld [vmem:[#allocation0 + $0x4f0] sm:$0x3] }
 0x454   :  { %6938 = vst [vmem:[%s11716_s1 + $0x11e] sm:$0x3] %v2973_v46 }
 0x455   :  { %6918 = vst [vmem:[%s11716_s1 + $0xf6] sm:$0x3] %v2853_v47 }
 0x456   :  { %6923 = vst [vmem:[%s11716_s1 + $0x100] sm:$0x3] %v2883_v51 }
 0x457   :  { %6928 = vst [vmem:[%s11716_s1 + $0x10a] sm:$0x3] %v2913_v52 }
 0x458   :  { %6933 = vst [vmem:[%s11716_s1 + $0x114] sm:$0x3] %v2943_v53 }
 0x459   :  { %6943 = vst [vmem:[%s11716_s1 + $0x128] sm:$0x3] %v3003_v54 }
 0x45a   :  { %6948 = vst [vmem:[%s11716_s1 + $0x132] sm:$0x3] %v3033_v55 }
 0x45b   :  { %6953 = vst [vmem:[%s11716_s1 + $0x13c] sm:$0x3] %v3063_v56 }
 0x45c   :  { %1756 = vst.msk [vmem:[#allocation0 + $0x1581] ss:$40 sm:$0x7] %vm3_vm0, %v1753_v30  }
 0x45d   :  { %1758 = vst.msk [vmem:[#allocation0 + $0x1301] ss:$200 sm:$0x18] %vm3_vm0, %v1753_v30  }
 0x45e   :  { %1760 = vst.msk [vmem:[#allocation0 + $0x1581] ss:$40 sm:$0x60] %vm3_vm0, %v1753_v30  }
 0x45f   :  { %1762 = vst.msk [vmem:[#allocation0 + $0x15f2] sm:$0x80] %vm3_vm0, %v1753_v30   ;;  %v1839_v30 = vpop.permute.xlu2 %1838  }
 0x460   :  { %1626 = vst.msk [vmem:[#allocation0 + $0x901] ss:$40 sm:$0x7] %vm3_vm0, %v1623_v34  }
 0x461   :  { %1628 = vst.msk [vmem:[#allocation0 + $0x681] ss:$200 sm:$0x18] %vm3_vm0, %v1623_v34  }
 0x462   :  { %1630 = vst.msk [vmem:[#allocation0 + $0x901] ss:$40 sm:$0x60] %vm3_vm0, %v1623_v34  }
 0x463   :  { %v6243_v60 = vld [vmem:[#allocation0 + $0x1580] sm:$0x3]  ;;  %1632 = vst.msk [vmem:[#allocation0 + $0x972] sm:$0x80] %vm3_vm0, %v1623_v34   ;;  %v6273_v62 = vld [vmem:[#allocation0 + $0x15a8] sm:$0x3] }
 0x464   :  { %v6213_v61 = vld [vmem:[#allocation0 + $0x1558] sm:$0x3]  ;;  %v6303_v63 = vld [vmem:[#allocation0 + $0x15d0] sm:$0x3]  ;;  %7483 = vst [vmem:[%s11716_s1 + $0x560] sm:$0x3] %v6243_v60 }
 0x465   :  { %7478 = vst [vmem:[%s11716_s1 + $0x556] sm:$0x3] %v6213_v61  ;;  %v6363_v1 = vld [vmem:[#allocation0 + $0x1620] sm:$0x3]  ;;  %v6393_v49 = vld [vmem:[#allocation0 + $0x1648] sm:$0x3] }
 0x466   :  { %v6333_v0 = vld [vmem:[#allocation0 + $0x15f8] sm:$0x3]  ;;  %7488 = vst [vmem:[%s11716_s1 + $0x56a] sm:$0x3] %v6273_v62  ;;  %v6423_v3 = vld [vmem:[#allocation0 + $0x1670] sm:$0x3]  ;;  %v1766_v62 = vpop.permute.xlu0 %1765  }
 0x467   :  { %7493 = vst [vmem:[%s11716_s1 + $0x574] sm:$0x3] %v6303_v63  ;;  %v3843_v5 = vld [vmem:[#allocation0 + $0x900] sm:$0x3]  ;;  %v3873_v6 = vld [vmem:[#allocation0 + $0x928] sm:$0x3]  ;;  %v11060_v46 = vpop.permute.xlu2 %1865  }
 0x468   :  { %7498 = vst [vmem:[%s11716_s1 + $0x57e] sm:$0x3] %v6333_v0  ;;  %v3813_v4 = vld [vmem:[#allocation0 + $0x8d8] sm:$0x3]  ;;  %v3903_v7 = vld [vmem:[#allocation0 + $0x950] sm:$0x3] }
 0x469   :  { %7503 = vst [vmem:[%s11716_s1 + $0x588] sm:$0x3] %v6363_v1  ;;  %v3963_v15 = vld [vmem:[#allocation0 + $0x9a0] sm:$0x3]  ;;  %v3993_v17 = vld [vmem:[#allocation0 + $0x9c8] sm:$0x3] }
 0x46a   :  { %7508 = vst [vmem:[%s11716_s1 + $0x592] sm:$0x3] %v6393_v49  ;;  %v3933_v12 = vld [vmem:[#allocation0 + $0x978] sm:$0x3]  ;;  %v4023_v18 = vld [vmem:[#allocation0 + $0x9f0] sm:$0x3] }
 0x46b   :  { %7513 = vst [vmem:[%s11716_s1 + $0x59c] sm:$0x3] %v6423_v3 }
 0x46c   :  { %1613 = vst.msk [vmem:[#allocation0 + $0x7c1] ss:$40 sm:$0x7] %vm3_vm0, %v10814_v38  }
 0x46d   :  { %1615 = vst.msk [vmem:[#allocation0 + $0x541] ss:$200 sm:$0x18] %vm3_vm0, %v10814_v38  }
 0x46e   :  { %1617 = vst.msk [vmem:[#allocation0 + $0x7c1] ss:$40 sm:$0x60] %vm3_vm0, %v10814_v38  }
 0x46f   :  { %1619 = vst.msk [vmem:[#allocation0 + $0x832] sm:$0x80] %vm3_vm0, %v10814_v38   ;;  %v1740_v38 = vpop.permute.xlu1 %1739   ;;  %v1893_v0 = vpop.permute.xlu2 %1892  }
 0x470   :  { %7078 = vst [vmem:[%s11716_s1 + $0x236] sm:$0x3] %v3813_v4  ;;  %v1794_v4 = vpop.permute.xlu0 %1793  }
 0x471   :  { %7083 = vst [vmem:[%s11716_s1 + $0x240] sm:$0x3] %v3843_v5 }
 0x472   :  { %7088 = vst [vmem:[%s11716_s1 + $0x24a] sm:$0x3] %v3873_v6 }
 0x473   :  { %7093 = vst [vmem:[%s11716_s1 + $0x254] sm:$0x3] %v3903_v7  ;;  %v3603_v19 = vld [vmem:[#allocation0 + $0x7c0] sm:$0x3]  ;;  %v3633_v20 = vld [vmem:[#allocation0 + $0x7e8] sm:$0x3] }
 0x474   :  { %v3573_v9 = vld [vmem:[#allocation0 + $0x798] sm:$0x3]  ;;  %v3723_v11 = vld [vmem:[#allocation0 + $0x860] sm:$0x3]  ;;  %7098 = vst [vmem:[%s11716_s1 + $0x25e] sm:$0x3] %v3933_v12 }
 0x475   :  { %7038 = vst [vmem:[%s11716_s1 + $0x1e6] sm:$0x3] %v3573_v9  ;;  %v3663_v13 = vld [vmem:[#allocation0 + $0x810] sm:$0x3]  ;;  %v3753_v14 = vld [vmem:[#allocation0 + $0x888] sm:$0x3] }
 0x476   :  { %v3693_v8 = vld [vmem:[#allocation0 + $0x838] sm:$0x3]  ;;  %7063 = vst [vmem:[%s11716_s1 + $0x218] sm:$0x3] %v3723_v11  ;;  %v3783_v21 = vld [vmem:[#allocation0 + $0x8b0] sm:$0x3] }
 0x477   :  { %7058 = vst [vmem:[%s11716_s1 + $0x20e] sm:$0x3] %v3693_v8  ;;  %v1920_v12 = vpop.permute.xlu2 %1919  }
 0x478   :  { %7103 = vst [vmem:[%s11716_s1 + $0x268] sm:$0x3] %v3963_v15  ;;  %v1821_v16 = vpop.permute.xlu0 %1820  }
 0x479   :  { %7108 = vst [vmem:[%s11716_s1 + $0x272] sm:$0x3] %v3993_v17 }
 0x47a   :  { %7113 = vst [vmem:[%s11716_s1 + $0x27c] sm:$0x3] %v4023_v18 }
 0x47b   :  { %7043 = vst [vmem:[%s11716_s1 + $0x1f0] sm:$0x3] %v3603_v19 }
 0x47c   :  { %7048 = vst [vmem:[%s11716_s1 + $0x1fa] sm:$0x3] %v3633_v20 }
 0x47d   :  { %7053 = vst [vmem:[%s11716_s1 + $0x204] sm:$0x3] %v3663_v13 }
 0x47e   :  { %7068 = vst [vmem:[%s11716_s1 + $0x222] sm:$0x3] %v3753_v14 }
 0x47f   :  { %7073 = vst [vmem:[%s11716_s1 + $0x22c] sm:$0x3] %v3783_v21 }
 0x480   :  { %1788 = vst.msk [vmem:[#allocation0 + $0x160] ss:$40 sm:$0xf] %vm3_vm0, %v10884_v57   ;;  %v1848_v21 = vpop.permute.xlu0 %1847  }
 0x481   :  { %1790 = vst.msk [vmem:[#allocation0 + $0x160] ss:$40 sm:$0xf0] %vm3_vm0, %v10884_v57  }
 0x482   :  { %1665 = vst.msk [vmem:[#allocation0 + $0xcc1] ss:$40 sm:$0x7] %vm3_vm0, %v10886_v59  }
 0x483   :  { %1667 = vst.msk [vmem:[#allocation0 + $0xa41] ss:$200 sm:$0x18] %vm3_vm0, %v10886_v59  }
 0x484   :  { %1669 = vst.msk [vmem:[#allocation0 + $0xcc1] ss:$40 sm:$0x60] %vm3_vm0, %v10886_v59  }
 0x485   :  { %1671 = vst.msk [vmem:[#allocation0 + $0xd32] sm:$0x80] %vm3_vm0, %v10886_v59   ;;  %v1776_v59 = vpop.permute.xlu1 %1775  }
 0x486   :  { %1652 = vst.msk [vmem:[#allocation0 + $0xb81] ss:$40 sm:$0x7] %vm3_vm0, %v1649_v2  }
 0x487   :  { %1654 = vst.msk [vmem:[#allocation0 + $0x901] ss:$200 sm:$0x18] %vm3_vm0, %v1649_v2  }
 0x488   :  { %1656 = vst.msk [vmem:[#allocation0 + $0xb81] ss:$40 sm:$0x60] %vm3_vm0, %v1649_v2  }
 0x489   :  { %1658 = vst.msk [vmem:[#allocation0 + $0xbf2] sm:$0x80] %vm3_vm0, %v1649_v2   ;;  %v4563_v48 = vld [vmem:[#allocation0 + $0xcc0] sm:$0x3]  ;;  %v4593_v31 = vld [vmem:[#allocation0 + $0xce8] sm:$0x3] }
 0x48a   :  { %v4533_v23 = vld [vmem:[#allocation0 + $0xc98] sm:$0x3]  ;;  %v4623_v34 = vld [vmem:[#allocation0 + $0xd10] sm:$0x3]  ;;  %v4683_v35 = vld [vmem:[#allocation0 + $0xd60] sm:$0x3] }
 0x48b   :  { %v4713_v24 = vld [vmem:[#allocation0 + $0xd88] sm:$0x3]  ;;  %v4743_v26 = vld [vmem:[#allocation0 + $0xdb0] sm:$0x3]  ;;  %7198 = vst [vmem:[%s11716_s1 + $0x326] sm:$0x3] %v4533_v23 }
 0x48c   :  { %v4653_v27 = vld [vmem:[#allocation0 + $0xd38] sm:$0x3]  ;;  %7228 = vst [vmem:[%s11716_s1 + $0x362] sm:$0x3] %v4713_v24 }
 0x48d   :  { %7218 = vst [vmem:[%s11716_s1 + $0x34e] sm:$0x3] %v4653_v27  ;;  %v4323_v50 = vld [vmem:[#allocation0 + $0xb80] sm:$0x3]  ;;  %v4353_v25 = vld [vmem:[#allocation0 + $0xba8] sm:$0x3]  ;;  %v1803_v3 = vpop.permute.xlu1 %1802  }
 0x48e   :  { %7233 = vst [vmem:[%s11716_s1 + $0x36c] sm:$0x3] %v4743_v26  ;;  %v4293_v36 = vld [vmem:[#allocation0 + $0xb58] sm:$0x3]  ;;  %v4383_v32 = vld [vmem:[#allocation0 + $0xbd0] sm:$0x3] }
 0x48f   :  { %v4473_v28 = vld [vmem:[#allocation0 + $0xc48] sm:$0x3]  ;;  %v4503_v29 = vld [vmem:[#allocation0 + $0xc70] sm:$0x3]  ;;  %7203 = vst [vmem:[%s11716_s1 + $0x330] sm:$0x3] %v4563_v48 }
 0x490   :  { %7188 = vst [vmem:[%s11716_s1 + $0x312] sm:$0x3] %v4473_v28  ;;  %v4413_v33 = vld [vmem:[#allocation0 + $0xbf8] sm:$0x3]  ;;  %v4443_v37 = vld [vmem:[#allocation0 + $0xc20] sm:$0x3] }
 0x491   :  { %7193 = vst [vmem:[%s11716_s1 + $0x31c] sm:$0x3] %v4503_v29 }
 0x492   :  { %7178 = vst [vmem:[%s11716_s1 + $0x2fe] sm:$0x3] %v4413_v33 }
 0x493   :  { %7208 = vst [vmem:[%s11716_s1 + $0x33a] sm:$0x3] %v4593_v31 }
 0x494   :  { %7213 = vst [vmem:[%s11716_s1 + $0x344] sm:$0x3] %v4623_v34 }
 0x495   :  { %7223 = vst [vmem:[%s11716_s1 + $0x358] sm:$0x3] %v4683_v35  ;;  %v1830_v8 = vpop.permute.xlu1 %1829  }
 0x496   :  { %7158 = vst [vmem:[%s11716_s1 + $0x2d6] sm:$0x3] %v4293_v36 }
 0x497   :  { %7163 = vst [vmem:[%s11716_s1 + $0x2e0] sm:$0x3] %v4323_v50 }
 0x498   :  { %7168 = vst [vmem:[%s11716_s1 + $0x2ea] sm:$0x3] %v4353_v25 }
 0x499   :  { %7173 = vst [vmem:[%s11716_s1 + $0x2f4] sm:$0x3] %v4383_v32 }
 0x49a   :  { %7183 = vst [vmem:[%s11716_s1 + $0x308] sm:$0x3] %v4443_v37 }
 0x49b   :  { %1815 = vst.msk [vmem:[#allocation0 + $0x520] ss:$40 sm:$0xf] %vm3_vm0, %v1812_v58  }
 0x49c   :  { %1817 = vst.msk [vmem:[#allocation0 + $0x520] ss:$40 sm:$0xf0] %vm3_vm0, %v1812_v58   ;;  %v1946_v58 = vpop.permute.xlu2 %1945  }
 0x49d   :  { %1704 = vst.msk [vmem:[#allocation0 + $0x1081] ss:$40 sm:$0x7] %vm3_vm0, %v1701_v10   ;;  %v1857_v14 = vpop.permute.xlu1 %1856  }
 0x49e   :  { %1706 = vst.msk [vmem:[#allocation0 + $0xe01] ss:$200 sm:$0x18] %vm3_vm0, %v1701_v10  }
 0x49f   :  { %1708 = vst.msk [vmem:[#allocation0 + $0x1081] ss:$40 sm:$0x60] %vm3_vm0, %v1701_v10  }
 0x4a0   :  { %1710 = vst.msk [vmem:[#allocation0 + $0x10f2] sm:$0x80] %vm3_vm0, %v1701_v10  }
 0x4a1   :  { %1691 = vst.msk [vmem:[#allocation0 + $0xf41] ss:$40 sm:$0x7] %vm3_vm0, %v1688_v22  }
 0x4a2   :  { %1693 = vst.msk [vmem:[#allocation0 + $0xcc1] ss:$200 sm:$0x18] %vm3_vm0, %v1688_v22  }
 0x4a3   :  { %1695 = vst.msk [vmem:[#allocation0 + $0xf41] ss:$40 sm:$0x60] %vm3_vm0, %v1688_v22  }
 0x4a4   :  { %v5283_v40 = vld [vmem:[#allocation0 + $0x1080] sm:$0x3]  ;;  %1697 = vst.msk [vmem:[#allocation0 + $0xfb2] sm:$0x80] %vm3_vm0, %v1688_v22   ;;  %v5313_v43 = vld [vmem:[#allocation0 + $0x10a8] sm:$0x3]  ;;  %v1973_v22 = vpop.permute.xlu2 %1972  }
 0x4a5   :  { %v5253_v41 = vld [vmem:[#allocation0 + $0x1058] sm:$0x3]  ;;  %7323 = vst [vmem:[%s11716_s1 + $0x420] sm:$0x3] %v5283_v40  ;;  %v5343_v44 = vld [vmem:[#allocation0 + $0x10d0] sm:$0x3]  ;;  %v1884_v24 = vpop.permute.xlu1 %1883  }
 0x4a6   :  { %7318 = vst [vmem:[%s11716_s1 + $0x416] sm:$0x3] %v5253_v41  ;;  %v5403_v45 = vld [vmem:[#allocation0 + $0x1120] sm:$0x3]  ;;  %v5433_v47 = vld [vmem:[#allocation0 + $0x1148] sm:$0x3] }
 0x4a7   :  { %v5373_v42 = vld [vmem:[#allocation0 + $0x10f8] sm:$0x3]  ;;  %7328 = vst [vmem:[%s11716_s1 + $0x42a] sm:$0x3] %v5313_v43  ;;  %v5463_v51 = vld [vmem:[#allocation0 + $0x1170] sm:$0x3] }
 0x4a8   :  { %7338 = vst [vmem:[%s11716_s1 + $0x43e] sm:$0x3] %v5373_v42  ;;  %v5043_v54 = vld [vmem:[#allocation0 + $0xf40] sm:$0x3]  ;;  %v5073_v55 = vld [vmem:[#allocation0 + $0xf68] sm:$0x3] }
 0x4a9   :  { %7333 = vst [vmem:[%s11716_s1 + $0x434] sm:$0x3] %v5343_v44  ;;  %v5013_v53 = vld [vmem:[#allocation0 + $0xf18] sm:$0x3]  ;;  %v5103_v56 = vld [vmem:[#allocation0 + $0xf90] sm:$0x3] }
 0x4aa   :  { %7343 = vst [vmem:[%s11716_s1 + $0x448] sm:$0x3] %v5403_v45  ;;  %v5163_v57 = vld [vmem:[#allocation0 + $0xfe0] sm:$0x3]  ;;  %v5193_v60 = vld [vmem:[#allocation0 + $0x1008] sm:$0x3] }
 0x4ab   :  { %v5133_v52 = vld [vmem:[#allocation0 + $0xfb8] sm:$0x3]  ;;  %7348 = vst [vmem:[%s11716_s1 + $0x452] sm:$0x3] %v5433_v47  ;;  %v5223_v61 = vld [vmem:[#allocation0 + $0x1030] sm:$0x3] }
 0x4ac   :  { %7298 = vst [vmem:[%s11716_s1 + $0x3ee] sm:$0x3] %v5133_v52  ;;  %v2000_v31 = vpop.permute.xlu2 %1999  }
 0x4ad   :  { %7353 = vst [vmem:[%s11716_s1 + $0x45c] sm:$0x3] %v5463_v51  ;;  %v1911_v33 = vpop.permute.xlu1 %1910  }
 0x4ae   :  { %1842 = vst.msk [vmem:[#allocation0 + $0x8e0] ss:$40 sm:$0xf] %vm3_vm0, %v1839_v30  }
 0x4af   :  { %1844 = vst.msk [vmem:[#allocation0 + $0x8e0] ss:$40 sm:$0xf0] %vm3_vm0, %v1839_v30   ;;  %v11175_v30 = vpop.permute.xlu0 %1874  }
 0x4b0   :  { %7278 = vst [vmem:[%s11716_s1 + $0x3c6] sm:$0x3] %v5013_v53 }
 0x4b1   :  { %7283 = vst [vmem:[%s11716_s1 + $0x3d0] sm:$0x3] %v5043_v54 }
 0x4b2   :  { %7288 = vst [vmem:[%s11716_s1 + $0x3da] sm:$0x3] %v5073_v55 }
 0x4b3   :  { %7293 = vst [vmem:[%s11716_s1 + $0x3e4] sm:$0x3] %v5103_v56 }
 0x4b4   :  { %7303 = vst [vmem:[%s11716_s1 + $0x3f8] sm:$0x3] %v5163_v57  ;;  %v2027_v40 = vpop.permute.xlu2 %2026  }
 0x4b5   :  { %7308 = vst [vmem:[%s11716_s1 + $0x402] sm:$0x3] %v5193_v60  ;;  %v1938_v43 = vpop.permute.xlu1 %1937  }
 0x4b6   :  { %7313 = vst [vmem:[%s11716_s1 + $0x40c] sm:$0x3] %v5223_v61 }
 0x4b7   :  { %1743 = vst.msk [vmem:[#allocation0 + $0x1441] ss:$40 sm:$0x7] %vm3_vm0, %v1740_v38   ;;  %v1902_v34 = vpop.permute.xlu0 %1901  }
 0x4b8   :  { %1745 = vst.msk [vmem:[#allocation0 + $0x11c1] ss:$200 sm:$0x18] %vm3_vm0, %v1740_v38  }
 0x4b9   :  { %1747 = vst.msk [vmem:[#allocation0 + $0x1441] ss:$40 sm:$0x60] %vm3_vm0, %v1740_v38  }
 0x4ba   :  { %1749 = vst.msk [vmem:[#allocation0 + $0x14b2] sm:$0x80] %vm3_vm0, %v1740_v38  }
 0x4bb   :  { %1730 = vst.msk [vmem:[#allocation0 + $0x1301] ss:$40 sm:$0x7] %vm3_vm0, %v1727_v39  }
 0x4bc   :  { %1732 = vst.msk [vmem:[#allocation0 + $0x1081] ss:$200 sm:$0x18] %vm3_vm0, %v1727_v39   ;;  %v2054_v54 = vpop.permute.xlu2 %2053  }
 0x4bd   :  { %1734 = vst.msk [vmem:[#allocation0 + $0x1301] ss:$40 sm:$0x60] %vm3_vm0, %v1727_v39   ;;  %v1964_v55 = vpop.permute.xlu1 %1963  }
 0x4be   :  { %v6003_v63 = vld [vmem:[#allocation0 + $0x1440] sm:$0x3]  ;;  %1736 = vst.msk [vmem:[#allocation0 + $0x1372] sm:$0x80] %vm3_vm0, %v1727_v39   ;;  %v6033_v2 = vld [vmem:[#allocation0 + $0x1468] sm:$0x3] }
 0x4bf   :  { %v5973_v1 = vld [vmem:[#allocation0 + $0x1418] sm:$0x3]  ;;  %v6063_v49 = vld [vmem:[#allocation0 + $0x1490] sm:$0x3]  ;;  %7443 = vst [vmem:[%s11716_s1 + $0x510] sm:$0x3] %v6003_v63 }
 0x4c0   :  { %7438 = vst [vmem:[%s11716_s1 + $0x506] sm:$0x3] %v5973_v1  ;;  %v6123_v6 = vld [vmem:[#allocation0 + $0x14e0] sm:$0x3]  ;;  %v6153_v7 = vld [vmem:[#allocation0 + $0x1508] sm:$0x3] }
 0x4c1   :  { %v6093_v5 = vld [vmem:[#allocation0 + $0x14b8] sm:$0x3]  ;;  %7448 = vst [vmem:[%s11716_s1 + $0x51a] sm:$0x3] %v6033_v2  ;;  %v6183_v9 = vld [vmem:[#allocation0 + $0x1530] sm:$0x3] }
 0x4c2   :  { %7453 = vst [vmem:[%s11716_s1 + $0x524] sm:$0x3] %v6063_v49  ;;  %v5763_v17 = vld [vmem:[#allocation0 + $0x1300] sm:$0x3]  ;;  %v5793_v18 = vld [vmem:[#allocation0 + $0x1328] sm:$0x3] }
 0x4c3   :  { %7458 = vst [vmem:[%s11716_s1 + $0x52e] sm:$0x3] %v6093_v5  ;;  %v5733_v15 = vld [vmem:[#allocation0 + $0x12d8] sm:$0x3]  ;;  %v5823_v19 = vld [vmem:[#allocation0 + $0x1350] sm:$0x3] }
 0x4c4   :  { %7463 = vst [vmem:[%s11716_s1 + $0x538] sm:$0x3] %v6123_v6  ;;  %v5883_v20 = vld [vmem:[#allocation0 + $0x13a0] sm:$0x3]  ;;  %v5913_v13 = vld [vmem:[#allocation0 + $0x13c8] sm:$0x3] }
 0x4c5   :  { %v5853_v11 = vld [vmem:[#allocation0 + $0x1378] sm:$0x3]  ;;  %7468 = vst [vmem:[%s11716_s1 + $0x542] sm:$0x3] %v6153_v7  ;;  %v5943_v10 = vld [vmem:[#allocation0 + $0x13f0] sm:$0x3] }
 0x4c6   :  { %7418 = vst [vmem:[%s11716_s1 + $0x4de] sm:$0x3] %v5853_v11  ;;  %v2081_v11 = vpop.permute.xlu2 %2080  }
 0x4c7   :  { %7473 = vst [vmem:[%s11716_s1 + $0x54c] sm:$0x3] %v6183_v9 }
 0x4c8   :  { %1869 = vst.msk [vmem:[#allocation0 + $0xca0] ss:$40 sm:$0xf] %vm3_vm0, %v11060_v46  }
 0x4c9   :  { %1871 = vst.msk [vmem:[#allocation0 + $0xca0] ss:$40 sm:$0xf0] %vm3_vm0, %v11060_v46   ;;  %v1929_v46 = vpop.permute.xlu0 %1928  }
 0x4ca   :  { %7398 = vst [vmem:[%s11716_s1 + $0x4b6] sm:$0x3] %v5733_v15 }
 0x4cb   :  { %7403 = vst [vmem:[%s11716_s1 + $0x4c0] sm:$0x3] %v5763_v17 }
 0x4cc   :  { %7408 = vst [vmem:[%s11716_s1 + $0x4ca] sm:$0x3] %v5793_v18 }
 0x4cd   :  { %7413 = vst [vmem:[%s11716_s1 + $0x4d4] sm:$0x3] %v5823_v19 }
 0x4ce   :  { %7423 = vst [vmem:[%s11716_s1 + $0x4e8] sm:$0x3] %v5883_v20 }
 0x4cf   :  { %7428 = vst [vmem:[%s11716_s1 + $0x4f2] sm:$0x3] %v5913_v13 }
 0x4d0   :  { %7433 = vst [vmem:[%s11716_s1 + $0x4fc] sm:$0x3] %v5943_v10 }
 0x4d1   :  { %1779 = vst.msk [vmem:[#allocation0 + $0x20] ss:$40 sm:$0xf] %vm3_vm0, %v1776_v59   ;;  %v1955_v1 = vpop.permute.xlu0 %1954  }
 0x4d2   :  { %1781 = vst.msk [vmem:[#allocation0 + $0x20] ss:$40 sm:$0xf0] %vm3_vm0, %v1776_v59  }
 0x4d3   :  { %1769 = vst.msk [vmem:[#allocation0 + $0x16c1] ss:$40 sm:$0x7] %vm3_vm0, %v1766_v62  }
 0x4d4   :  { %1771 = vst.msk [vmem:[#allocation0 + $0x1441] ss:$200 sm:$0x18] %vm3_vm0, %v1766_v62  }
 0x4d5   :  { %1773 = vst.msk [vmem:[#allocation0 + $0x1734] sm:$0x20] %vm3_vm0, %v1766_v62  }
 0x4d6   :  { %1896 = vst.msk [vmem:[#allocation0 + $0x1060] ss:$40 sm:$0xf] %vm3_vm0, %v1893_v0  }
 0x4d7   :  { %1898 = vst.msk [vmem:[#allocation0 + $0x1060] ss:$40 sm:$0xf0] %vm3_vm0, %v1893_v0  }
 0x4d8   :  { %1806 = vst.msk [vmem:[#allocation0 + $0x3e0] ss:$40 sm:$0xf] %vm3_vm0, %v1803_v3  }
 0x4d9   :  { %1808 = vst.msk [vmem:[#allocation0 + $0x3e0] ss:$40 sm:$0xf0] %vm3_vm0, %v1803_v3   ;;  %v11328_v17 = vpop.permute.xlu0 %1981  }
 0x4da   :  { %v6483_v23 = vld [vmem:[#allocation0 + $0x16c0] sm:$0x3]  ;;  %v6513_v27 = vld [vmem:[#allocation0 + $0x16e8] sm:$0x3]  ;;  %v6543_v29 = vld [vmem:[#allocation0 + $0x1710] sm:$0x3] }
 0x4db   :  { %v6453_v26 = vld [vmem:[#allocation0 + $0x1698] sm:$0x3]  ;;  %7523 = vst [vmem:[%s11716_s1 + $0x5b0] sm:$0x3] %v6483_v23  ;;  %v6603_v48 = vld [vmem:[#allocation0 + $0x1760] sm:$0x3] }
 0x4dc   :  { %v6573_v28 = vld [vmem:[#allocation0 + $0x1738] sm:$0x3]  ;;  %7518 = vst [vmem:[%s11716_s1 + $0x5a6] sm:$0x3] %v6453_v26 }
 0x4dd   :  { %7538 = vst [vmem:[%s11716_s1 + $0x5ce] sm:$0x3] %v6573_v28 }
 0x4de   :  { %7528 = vst [vmem:[%s11716_s1 + $0x5ba] sm:$0x3] %v6513_v27 }
 0x4df   :  { %7533 = vst [vmem:[%s11716_s1 + $0x5c4] sm:$0x3] %v6543_v29 }
 0x4e0   :  { %7543 = vst [vmem:[%s11716_s1 + $0x5d8] sm:$0x3] %v6603_v48 }
 0x4e1   :  { %1797 = vst.msk [vmem:[#allocation0 + $0x2a0] ss:$40 sm:$0xf] %vm3_vm0, %v1794_v4  }
 0x4e2   :  { %1799 = vst.msk [vmem:[#allocation0 + $0x2a0] ss:$40 sm:$0xf0] %vm3_vm0, %v1794_v4  }
 0x4e3   :  { %1923 = vst.msk [vmem:[#allocation0 + $0x1420] ss:$40 sm:$0xf] %vm3_vm0, %v1920_v12  }
 0x4e4   :  { %1925 = vst.msk [vmem:[#allocation0 + $0x1420] ss:$40 sm:$0xf0] %vm3_vm0, %v1920_v12   ;;  %v11322_v12 = vpop.permute.xlu1 %1990  }
 0x4e5   :  { %1833 = vst.msk [vmem:[#allocation0 + $0x7a0] ss:$40 sm:$0xf] %vm3_vm0, %v1830_v8  }
 0x4e6   :  { %1835 = vst.msk [vmem:[#allocation0 + $0x7a0] ss:$40 sm:$0xf0] %vm3_vm0, %v1830_v8  }
 0x4e7   :  { %1824 = vst.msk [vmem:[#allocation0 + $0x660] ss:$40 sm:$0xf] %vm3_vm0, %v1821_v16  }
 0x4e8   :  { %1826 = vst.msk [vmem:[#allocation0 + $0x660] ss:$40 sm:$0xf0] %vm3_vm0, %v1821_v16  }
 0x4e9   :  { %1949 = vst.msk [vmem:[#allocation0 + $0x21] ss:$40 sm:$0xf] %vm3_vm0, %v1946_v58  }
 0x4ea   :  { %1951 = vst.msk [vmem:[#allocation0 + $0x21] ss:$40 sm:$0xf0] %vm3_vm0, %v1946_v58  }
 0x4eb   :  { %1860 = vst.msk [vmem:[#allocation0 + $0xb60] ss:$40 sm:$0xf] %vm3_vm0, %v1857_v14  }
 0x4ec   :  { %1862 = vst.msk [vmem:[#allocation0 + $0xb60] ss:$40 sm:$0xf0] %vm3_vm0, %v1857_v14  }
 0x4ed   :  { %1851 = vst.msk [vmem:[#allocation0 + $0xa20] ss:$40 sm:$0xf] %vm3_vm0, %v1848_v21  }
 0x4ee   :  { %1853 = vst.msk [vmem:[#allocation0 + $0xa20] ss:$40 sm:$0xf0] %vm3_vm0, %v1848_v21  }
 0x4ef   :  { %1976 = vst.msk [vmem:[#allocation0 + $0x3e1] ss:$40 sm:$0xf] %vm3_vm0, %v1973_v22  }
 0x4f0   :  { %v2139_v35 = vld [vmem:[#allocation0 + $0x20] sm:$0x3]  ;;  %v2169_v36 = vld [vmem:[#allocation0 + $0x48] sm:$0x3]  ;;  %v2199_v50 = vld [vmem:[#allocation0 + $0x70] sm:$0x3] }
 0x4f1   :  { %v2229_v25 = vld [vmem:[#allocation0 + $0x98] sm:$0x3]  ;;  %6799 = vst [vmem:[%s11716_s1 + $0x8] sm:$0x3] %v2139_v35  ;;  %v2259_v32 = vld [vmem:[#allocation0 + $0xc0] sm:$0x3]  ;;  %v2108_v35 = vpop.permute.xlu2 %2107  }
 0x4f2   :  { %6804 = vst [vmem:[%s11716_s1 + $0x12] sm:$0x3] %v2169_v36  ;;  %v2289_v37 = vld [vmem:[#allocation0 + $0xe8] sm:$0x3]  ;;  %v2319_v38 = vld [vmem:[#allocation0 + $0x110] sm:$0x3] }
 0x4f3   :  { %6809 = vst [vmem:[%s11716_s1 + $0x1c] sm:$0x3] %v2199_v50  ;;  %v2349_v39 = vld [vmem:[#allocation0 + $0x138] sm:$0x3] }
 0x4f4   :  { %6814 = vst [vmem:[%s11716_s1 + $0x26] sm:$0x3] %v2229_v25 }
 0x4f5   :  { %6819 = vst [vmem:[%s11716_s1 + $0x30] sm:$0x3] %v2259_v32 }
 0x4f6   :  { %6824 = vst [vmem:[%s11716_s1 + $0x3a] sm:$0x3] %v2289_v37  ;;  %v2859_v41 = vld [vmem:[#allocation0 + $0x3e0] sm:$0x3]  ;;  %v2889_v42 = vld [vmem:[#allocation0 + $0x408] sm:$0x3] }
 0x4f7   :  { %6829 = vst [vmem:[%s11716_s1 + $0x44] sm:$0x3] %v2319_v38  ;;  %v2919_v44 = vld [vmem:[#allocation0 + $0x430] sm:$0x3]  ;;  %v2949_v45 = vld [vmem:[#allocation0 + $0x458] sm:$0x3] }
 0x4f8   :  { %6834 = vst [vmem:[%s11716_s1 + $0x4e] sm:$0x3] %v2349_v39 }
 0x4f9   :  { %1978 = vst.msk [vmem:[#allocation0 + $0x3e1] ss:$40 sm:$0xf0] %vm3_vm0, %v1973_v22  }
 0x4fa   :  { %1887 = vst.msk [vmem:[#allocation0 + $0xf20] ss:$40 sm:$0xf] %vm3_vm0, %v1884_v24  }
 0x4fb   :  { %1889 = vst.msk [vmem:[#allocation0 + $0xf20] ss:$40 sm:$0xf0] %vm3_vm0, %v1884_v24  }
 0x4fc   :  { %6919 = vst [vmem:[%s11716_s1 + $0xf8] sm:$0x3] %v2859_v41  ;;  %v2018_v41 = vpop.permute.xlu1 %2017  }
 0x4fd   :  { %6924 = vst [vmem:[%s11716_s1 + $0x102] sm:$0x3] %v2889_v42 }
 0x4fe   :  { %6929 = vst [vmem:[%s11716_s1 + $0x10c] sm:$0x3] %v2919_v44 }
 0x4ff   :  { %6934 = vst [vmem:[%s11716_s1 + $0x116] sm:$0x3] %v2949_v45 }
 0x500   :  { %v2979_v47 = vld [vmem:[#allocation0 + $0x480] sm:$0x3]  ;;  %v3009_v51 = vld [vmem:[#allocation0 + $0x4a8] sm:$0x3]  ;;  %v3039_v52 = vld [vmem:[#allocation0 + $0x4d0] sm:$0x3] }
 0x501   :  { %v3069_v53 = vld [vmem:[#allocation0 + $0x4f8] sm:$0x3]  ;;  %6939 = vst [vmem:[%s11716_s1 + $0x120] sm:$0x3] %v2979_v47  ;;  %v2009_v47 = vpop.permute.xlu0 %2008  }
 0x502   :  { %6944 = vst [vmem:[%s11716_s1 + $0x12a] sm:$0x3] %v3009_v51 }
 0x503   :  { %6949 = vst [vmem:[%s11716_s1 + $0x134] sm:$0x3] %v3039_v52 }
 0x504   :  { %6954 = vst [vmem:[%s11716_s1 + $0x13e] sm:$0x3] %v3069_v53 }
 0x505   :  { %1878 = vst.msk [vmem:[#allocation0 + $0xde0] ss:$40 sm:$0xf] %vm3_vm0, %v11175_v30  }
 0x506   :  { %1880 = vst.msk [vmem:[#allocation0 + $0xde0] ss:$40 sm:$0xf0] %vm3_vm0, %v11175_v30  }
 0x507   :  { %2003 = vst.msk [vmem:[#allocation0 + $0x7a1] ss:$40 sm:$0xf] %vm3_vm0, %v2000_v31  }
 0x508   :  { %2005 = vst.msk [vmem:[#allocation0 + $0x7a1] ss:$40 sm:$0xf0] %vm3_vm0, %v2000_v31  }
 0x509   :  { %1914 = vst.msk [vmem:[#allocation0 + $0x12e0] ss:$40 sm:$0xf] %vm3_vm0, %v1911_v33  }
 0x50a   :  { %1916 = vst.msk [vmem:[#allocation0 + $0x12e0] ss:$40 sm:$0xf0] %vm3_vm0, %v1911_v33  }
 0x50b   :  { %1905 = vst.msk [vmem:[#allocation0 + $0x11a0] ss:$40 sm:$0xf] %vm3_vm0, %v1902_v34  }
 0x50c   :  { %1907 = vst.msk [vmem:[#allocation0 + $0x11a0] ss:$40 sm:$0xf0] %vm3_vm0, %v1902_v34  }
 0x50d   :  { %2030 = vst.msk [vmem:[#allocation0 + $0xb61] ss:$40 sm:$0xf] %vm3_vm0, %v2027_v40  }
 0x50e   :  { %v3579_v56 = vld [vmem:[#allocation0 + $0x7a0] sm:$0x3]  ;;  %v3609_v57 = vld [vmem:[#allocation0 + $0x7c8] sm:$0x3]  ;;  %v3639_v59 = vld [vmem:[#allocation0 + $0x7f0] sm:$0x3] }
 0x50f   :  { %v3669_v60 = vld [vmem:[#allocation0 + $0x818] sm:$0x3]  ;;  %7039 = vst [vmem:[%s11716_s1 + $0x1e8] sm:$0x3] %v3579_v56  ;;  %v3699_v61 = vld [vmem:[#allocation0 + $0x840] sm:$0x3] }
 0x510   :  { %7044 = vst [vmem:[%s11716_s1 + $0x1f2] sm:$0x3] %v3609_v57  ;;  %v3729_v62 = vld [vmem:[#allocation0 + $0x868] sm:$0x3]  ;;  %v3759_v63 = vld [vmem:[#allocation0 + $0x890] sm:$0x3] }
 0x511   :  { %7049 = vst [vmem:[%s11716_s1 + $0x1fc] sm:$0x3] %v3639_v59  ;;  %v3789_v0 = vld [vmem:[#allocation0 + $0x8b8] sm:$0x3] }
 0x512   :  { %7054 = vst [vmem:[%s11716_s1 + $0x206] sm:$0x3] %v3669_v60  ;;  %v2045_v60 = vpop.permute.xlu1 %2044  }
 0x513   :  { %7059 = vst [vmem:[%s11716_s1 + $0x210] sm:$0x3] %v3699_v61 }
 0x514   :  { %7064 = vst [vmem:[%s11716_s1 + $0x21a] sm:$0x3] %v3729_v62  ;;  %v4299_v2 = vld [vmem:[#allocation0 + $0xb60] sm:$0x3]  ;;  %v4329_v49 = vld [vmem:[#allocation0 + $0xb88] sm:$0x3] }
 0x515   :  { %7069 = vst [vmem:[%s11716_s1 + $0x224] sm:$0x3] %v3759_v63  ;;  %v4359_v3 = vld [vmem:[#allocation0 + $0xbb0] sm:$0x3]  ;;  %v4389_v4 = vld [vmem:[#allocation0 + $0xbd8] sm:$0x3] }
 0x516   :  { %7074 = vst [vmem:[%s11716_s1 + $0x22e] sm:$0x3] %v3789_v0 }
 0x517   :  { %2032 = vst.msk [vmem:[#allocation0 + $0xb61] ss:$40 sm:$0xf0] %vm3_vm0, %v2027_v40  }
 0x518   :  { %7159 = vst [vmem:[%s11716_s1 + $0x2d8] sm:$0x3] %v4299_v2 }
 0x519   :  { %7164 = vst [vmem:[%s11716_s1 + $0x2e2] sm:$0x3] %v4329_v49 }
 0x51a   :  { %7169 = vst [vmem:[%s11716_s1 + $0x2ec] sm:$0x3] %v4359_v3 }
 0x51b   :  { %7174 = vst [vmem:[%s11716_s1 + $0x2f6] sm:$0x3] %v4389_v4 }
 0x51c   :  { %1941 = vst.msk [vmem:[#allocation0 + $0x16a0] ss:$40 sm:$0xf] %vm3_vm0, %v1938_v43  }
 0x51d   :  { %1943 = vst.msk [vmem:[#allocation0 + $0x16a0] ss:$40 sm:$0x30] %vm3_vm0, %v1938_v43  }
 0x51e   :  { %v4419_v5 = vld [vmem:[#allocation0 + $0xc00] sm:$0x3]  ;;  %v4449_v6 = vld [vmem:[#allocation0 + $0xc28] sm:$0x3]  ;;  %v4479_v7 = vld [vmem:[#allocation0 + $0xc50] sm:$0x3] }
 0x51f   :  { %7179 = vst [vmem:[%s11716_s1 + $0x300] sm:$0x3] %v4419_v5  ;;  %v4509_v9 = vld [vmem:[#allocation0 + $0xc78] sm:$0x3] }
 0x520   :  { %7184 = vst [vmem:[%s11716_s1 + $0x30a] sm:$0x3] %v4449_v6  ;;  %v2036_v6 = vpop.permute.xlu0 %2035  }
 0x521   :  { %7189 = vst [vmem:[%s11716_s1 + $0x314] sm:$0x3] %v4479_v7 }
 0x522   :  { %7194 = vst [vmem:[%s11716_s1 + $0x31e] sm:$0x3] %v4509_v9 }
 0x523   :  { %1932 = vst.msk [vmem:[#allocation0 + $0x1560] ss:$40 sm:$0xf] %vm3_vm0, %v1929_v46  }
 0x524   :  { %1934 = vst.msk [vmem:[#allocation0 + $0x1560] ss:$40 sm:$0xf0] %vm3_vm0, %v1929_v46  }
 0x525   :  { %2057 = vst.msk [vmem:[#allocation0 + $0xf21] ss:$40 sm:$0xf] %vm3_vm0, %v2054_v54  }
 0x526   :  { %2059 = vst.msk [vmem:[#allocation0 + $0xf21] ss:$40 sm:$0xf0] %vm3_vm0, %v2054_v54  }
 0x527   :  { %1967 = vst.msk [vmem:[#allocation0 + $0x2a1] ss:$40 sm:$0xf] %vm3_vm0, %v1964_v55  }
 0x528   :  { %1969 = vst.msk [vmem:[#allocation0 + $0x2a1] ss:$40 sm:$0xf0] %vm3_vm0, %v1964_v55  }
 0x529   :  { %1958 = vst.msk [vmem:[#allocation0 + $0x161] ss:$40 sm:$0xf] %vm3_vm0, %v1955_v1  }
 0x52a   :  { %1960 = vst.msk [vmem:[#allocation0 + $0x161] ss:$40 sm:$0xf0] %vm3_vm0, %v1955_v1  }
 0x52b   :  { %2084 = vst.msk [vmem:[#allocation0 + $0x12e1] ss:$40 sm:$0xf] %vm3_vm0, %v2081_v11  }
 0x52c   :  { %v5019_v15 = vld [vmem:[#allocation0 + $0xf20] sm:$0x3]  ;;  %v5049_v8 = vld [vmem:[#allocation0 + $0xf48] sm:$0x3]  ;;  %v5079_v16 = vld [vmem:[#allocation0 + $0xf70] sm:$0x3] }
 0x52d   :  { %7279 = vst [vmem:[%s11716_s1 + $0x3c8] sm:$0x3] %v5019_v15  ;;  %v5109_v18 = vld [vmem:[#allocation0 + $0xf98] sm:$0x3]  ;;  %v5139_v19 = vld [vmem:[#allocation0 + $0xfc0] sm:$0x3]  ;;  %v2072_v15 = vpop.permute.xlu1 %2071  }
 0x52e   :  { %7284 = vst [vmem:[%s11716_s1 + $0x3d2] sm:$0x3] %v5049_v8  ;;  %v5169_v20 = vld [vmem:[#allocation0 + $0xfe8] sm:$0x3]  ;;  %v5199_v13 = vld [vmem:[#allocation0 + $0x1010] sm:$0x3] }
 0x52f   :  { %7289 = vst [vmem:[%s11716_s1 + $0x3dc] sm:$0x3] %v5079_v16  ;;  %v5229_v58 = vld [vmem:[#allocation0 + $0x1038] sm:$0x3]  ;;  %v2619_v10 = vld [vmem:[#allocation0 + $0x2a0] sm:$0x3] }
 0x530   :  { %7294 = vst [vmem:[%s11716_s1 + $0x3e6] sm:$0x3] %v5109_v18  ;;  %v2649_v14 = vld [vmem:[#allocation0 + $0x2c8] sm:$0x3]  ;;  %v2679_v21 = vld [vmem:[#allocation0 + $0x2f0] sm:$0x3] }
 0x531   :  { %7299 = vst [vmem:[%s11716_s1 + $0x3f0] sm:$0x3] %v5139_v19  ;;  %v2709_v22 = vld [vmem:[#allocation0 + $0x318] sm:$0x3]  ;;  %v2739_v23 = vld [vmem:[#allocation0 + $0x340] sm:$0x3] }
 0x532   :  { %7304 = vst [vmem:[%s11716_s1 + $0x3fa] sm:$0x3] %v5169_v20  ;;  %v2769_v24 = vld [vmem:[#allocation0 + $0x368] sm:$0x3]  ;;  %v2799_v26 = vld [vmem:[#allocation0 + $0x390] sm:$0x3] }
 0x533   :  { %7309 = vst [vmem:[%s11716_s1 + $0x404] sm:$0x3] %v5199_v13  ;;  %v2829_v27 = vld [vmem:[#allocation0 + $0x3b8] sm:$0x3]  ;;  %v2379_v28 = vld [vmem:[#allocation0 + $0x160] sm:$0x3] }
 0x534   :  { %7314 = vst [vmem:[%s11716_s1 + $0x40e] sm:$0x3] %v5229_v58  ;;  %v2409_v29 = vld [vmem:[#allocation0 + $0x188] sm:$0x3]  ;;  %v2439_v30 = vld [vmem:[#allocation0 + $0x1b0] sm:$0x3] }
 0x535   :  { %6879 = vst [vmem:[%s11716_s1 + $0xa8] sm:$0x3] %v2619_v10  ;;  %v2469_v48 = vld [vmem:[#allocation0 + $0x1d8] sm:$0x3]  ;;  %v2499_v31 = vld [vmem:[#allocation0 + $0x200] sm:$0x3] }
 0x536   :  { %6884 = vst [vmem:[%s11716_s1 + $0xb2] sm:$0x3] %v2649_v14  ;;  %v2529_v33 = vld [vmem:[#allocation0 + $0x228] sm:$0x3]  ;;  %v2559_v34 = vld [vmem:[#allocation0 + $0x250] sm:$0x3] }
 0x537   :  { %6889 = vst [vmem:[%s11716_s1 + $0xbc] sm:$0x3] %v2679_v21  ;;  %v2589_v36 = vld [vmem:[#allocation0 + $0x278] sm:$0x3]  ;;  %v5739_v50 = vld [vmem:[#allocation0 + $0x12e0] sm:$0x3] }
 0x538   :  { %6894 = vst [vmem:[%s11716_s1 + $0xc6] sm:$0x3] %v2709_v22  ;;  %v5769_v25 = vld [vmem:[#allocation0 + $0x1308] sm:$0x3]  ;;  %v5799_v32 = vld [vmem:[#allocation0 + $0x1330] sm:$0x3] }
 0x539   :  { %6899 = vst [vmem:[%s11716_s1 + $0xd0] sm:$0x3] %v2739_v23  ;;  %v5829_v37 = vld [vmem:[#allocation0 + $0x1358] sm:$0x3] }
 0x53a   :  { %6904 = vst [vmem:[%s11716_s1 + $0xda] sm:$0x3] %v2769_v24 }
 0x53b   :  { %6909 = vst [vmem:[%s11716_s1 + $0xe4] sm:$0x3] %v2799_v26 }
 0x53c   :  { %6914 = vst [vmem:[%s11716_s1 + $0xee] sm:$0x3] %v2829_v27 }
 0x53d   :  { %6839 = vst [vmem:[%s11716_s1 + $0x58] sm:$0x3] %v2379_v28 }
 0x53e   :  { %6844 = vst [vmem:[%s11716_s1 + $0x62] sm:$0x3] %v2409_v29 }
 0x53f   :  { %6849 = vst [vmem:[%s11716_s1 + $0x6c] sm:$0x3] %v2439_v30 }
 0x540   :  { %6854 = vst [vmem:[%s11716_s1 + $0x76] sm:$0x3] %v2469_v48 }
 0x541   :  { %6859 = vst [vmem:[%s11716_s1 + $0x80] sm:$0x3] %v2499_v31 }
 0x542   :  { %6864 = vst [vmem:[%s11716_s1 + $0x8a] sm:$0x3] %v2529_v33 }
 0x543   :  { %6869 = vst [vmem:[%s11716_s1 + $0x94] sm:$0x3] %v2559_v34 }
 0x544   :  { %6874 = vst [vmem:[%s11716_s1 + $0x9e] sm:$0x3] %v2589_v36 }
 0x545   :  { %2086 = vst.msk [vmem:[#allocation0 + $0x12e1] ss:$40 sm:$0xf0] %vm3_vm0, %v2081_v11  }
 0x546   :  { %7399 = vst [vmem:[%s11716_s1 + $0x4b8] sm:$0x3] %v5739_v50 }
 0x547   :  { %7404 = vst [vmem:[%s11716_s1 + $0x4c2] sm:$0x3] %v5769_v25 }
 0x548   :  { %7409 = vst [vmem:[%s11716_s1 + $0x4cc] sm:$0x3] %v5799_v32 }
 0x549   :  { %7414 = vst [vmem:[%s11716_s1 + $0x4d6] sm:$0x3] %v5829_v37 }
 0x54a   :  { %1994 = vst.msk [vmem:[#allocation0 + $0x661] ss:$40 sm:$0xf] %vm3_vm0, %v11322_v12  }
 0x54b   :  { %1996 = vst.msk [vmem:[#allocation0 + $0x661] ss:$40 sm:$0xf0] %vm3_vm0, %v11322_v12  }
 0x54c   :  { %v5859_v38 = vld [vmem:[#allocation0 + $0x1380] sm:$0x3]  ;;  %v5889_v39 = vld [vmem:[#allocation0 + $0x13a8] sm:$0x3]  ;;  %v5919_v40 = vld [vmem:[#allocation0 + $0x13d0] sm:$0x3] }
 0x54d   :  { %7419 = vst [vmem:[%s11716_s1 + $0x4e0] sm:$0x3] %v5859_v38  ;;  %v5949_v42 = vld [vmem:[#allocation0 + $0x13f8] sm:$0x3] }
 0x54e   :  { %7424 = vst [vmem:[%s11716_s1 + $0x4ea] sm:$0x3] %v5889_v39 }
 0x54f   :  { %7429 = vst [vmem:[%s11716_s1 + $0x4f4] sm:$0x3] %v5919_v40 }
 0x550   :  { %7434 = vst [vmem:[%s11716_s1 + $0x4fe] sm:$0x3] %v5949_v42 }
 0x551   :  { %v3339_v43 = vld [vmem:[#allocation0 + $0x660] sm:$0x3]  ;;  %v3369_v44 = vld [vmem:[#allocation0 + $0x688] sm:$0x3]  ;;  %v3399_v45 = vld [vmem:[#allocation0 + $0x6b0] sm:$0x3] }
 0x552   :  { %6999 = vst [vmem:[%s11716_s1 + $0x198] sm:$0x3] %v3339_v43  ;;  %v3429_v46 = vld [vmem:[#allocation0 + $0x6d8] sm:$0x3]  ;;  %v3459_v51 = vld [vmem:[#allocation0 + $0x700] sm:$0x3] }
 0x553   :  { %7004 = vst [vmem:[%s11716_s1 + $0x1a2] sm:$0x3] %v3369_v44  ;;  %v3489_v52 = vld [vmem:[#allocation0 + $0x728] sm:$0x3]  ;;  %v3519_v53 = vld [vmem:[#allocation0 + $0x750] sm:$0x3] }
 0x554   :  { %7009 = vst [vmem:[%s11716_s1 + $0x1ac] sm:$0x3] %v3399_v45  ;;  %v3549_v54 = vld [vmem:[#allocation0 + $0x778] sm:$0x3] }
 0x555   :  { %7014 = vst [vmem:[%s11716_s1 + $0x1b6] sm:$0x3] %v3429_v46 }
 0x556   :  { %1985 = vst.msk [vmem:[#allocation0 + $0x521] ss:$40 sm:$0xf] %vm3_vm0, %v11328_v17  }
 0x557   :  { %1987 = vst.msk [vmem:[#allocation0 + $0x521] ss:$40 sm:$0xf0] %vm3_vm0, %v11328_v17   ;;  %v11519_v17 = vpop.permute.xlu0 %2062  }
 0x558   :  { %7019 = vst [vmem:[%s11716_s1 + $0x1c0] sm:$0x3] %v3459_v51 }
 0x559   :  { %7024 = vst [vmem:[%s11716_s1 + $0x1ca] sm:$0x3] %v3489_v52 }
 0x55a   :  { %7029 = vst [vmem:[%s11716_s1 + $0x1d4] sm:$0x3] %v3519_v53 }
 0x55b   :  { %7034 = vst [vmem:[%s11716_s1 + $0x1de] sm:$0x3] %v3549_v54 }
 0x55c   :  { %2111 = vst.msk [vmem:[#allocation0 + $0x16a1] ss:$40 sm:$0xf] %vm3_vm0, %v2108_v35  }
 0x55d   :  { %v3099_v55 = vld [vmem:[#allocation0 + $0x520] sm:$0x3]  ;;  %v3129_v56 = vld [vmem:[#allocation0 + $0x548] sm:$0x3]  ;;  %v3159_v57 = vld [vmem:[#allocation0 + $0x570] sm:$0x3] }
 0x55e   :  { %6959 = vst [vmem:[%s11716_s1 + $0x148] sm:$0x3] %v3099_v55  ;;  %v3189_v59 = vld [vmem:[#allocation0 + $0x598] sm:$0x3]  ;;  %v3219_v1 = vld [vmem:[#allocation0 + $0x5c0] sm:$0x3] }
 0x55f   :  { %6964 = vst [vmem:[%s11716_s1 + $0x152] sm:$0x3] %v3129_v56  ;;  %v3249_v2 = vld [vmem:[#allocation0 + $0x5e8] sm:$0x3]  ;;  %v3279_v49 = vld [vmem:[#allocation0 + $0x610] sm:$0x3]  ;;  %v2090_v25 = vpop.permute.xlu0 %2089  }
 0x560   :  { %6969 = vst [vmem:[%s11716_s1 + $0x15c] sm:$0x3] %v3159_v57  ;;  %v3309_v5 = vld [vmem:[#allocation0 + $0x638] sm:$0x3] }
 0x561   :  { %6974 = vst [vmem:[%s11716_s1 + $0x166] sm:$0x3] %v3189_v59 }
 0x562   :  { %2113 = vst.msk [vmem:[#allocation0 + $0x16a1] ss:$40 sm:$0x30] %vm3_vm0, %v2108_v35   ;;  %v2099_v35 = vpop.permute.xlu1 %2098  }
 0x563   :  { %v6459_v61 = vld [vmem:[#allocation0 + $0x16a0] sm:$0x3]  ;;  %v6489_v62 = vld [vmem:[#allocation0 + $0x16c8] sm:$0x3]  ;;  %v6519_v63 = vld [vmem:[#allocation0 + $0x16f0] sm:$0x3] }
 0x564   :  { %7519 = vst [vmem:[%s11716_s1 + $0x5a8] sm:$0x3] %v6459_v61  ;;  %v6549_v0 = vld [vmem:[#allocation0 + $0x1718] sm:$0x3] }
 0x565   :  { %7524 = vst [vmem:[%s11716_s1 + $0x5b2] sm:$0x3] %v6489_v62 }
 0x566   :  { %7529 = vst [vmem:[%s11716_s1 + $0x5bc] sm:$0x3] %v6519_v63 }
 0x567   :  { %7534 = vst [vmem:[%s11716_s1 + $0x5c6] sm:$0x3] %v6549_v0 }
 0x568   :  { %6979 = vst [vmem:[%s11716_s1 + $0x170] sm:$0x3] %v3219_v1 }
 0x569   :  { %v6579_v3 = vld [vmem:[#allocation0 + $0x1740] sm:$0x3]  ;;  %v6609_v4 = vld [vmem:[#allocation0 + $0x1768] sm:$0x3]  ;;  %6984 = vst [vmem:[%s11716_s1 + $0x17a] sm:$0x3] %v3249_v2 }
 0x56a   :  { %7539 = vst [vmem:[%s11716_s1 + $0x5d0] sm:$0x3] %v6579_v3 }
 0x56b   :  { %7544 = vst [vmem:[%s11716_s1 + $0x5da] sm:$0x3] %v6609_v4 }
 0x56c   :  { %6989 = vst [vmem:[%s11716_s1 + $0x184] sm:$0x3] %v3279_v49 }
 0x56d   :  { %6994 = vst [vmem:[%s11716_s1 + $0x18e] sm:$0x3] %v3309_v5 }
 0x56e   :  { %2021 = vst.msk [vmem:[#allocation0 + $0xa21] ss:$40 sm:$0xf] %vm3_vm0, %v2018_v41  }
 0x56f   :  { %2023 = vst.msk [vmem:[#allocation0 + $0xa21] ss:$40 sm:$0xf0] %vm3_vm0, %v2018_v41  }
 0x570   :  { %2012 = vst.msk [vmem:[#allocation0 + $0x8e1] ss:$40 sm:$0xf] %vm3_vm0, %v2009_v47  }
 0x571   :  { %2014 = vst.msk [vmem:[#allocation0 + $0x8e1] ss:$40 sm:$0xf0] %vm3_vm0, %v2009_v47  }
 0x572   :  { %2048 = vst.msk [vmem:[#allocation0 + $0xde1] ss:$40 sm:$0xf] %vm3_vm0, %v2045_v60  }
 0x573   :  { %2050 = vst.msk [vmem:[#allocation0 + $0xde1] ss:$40 sm:$0xf0] %vm3_vm0, %v2045_v60  }
 0x574   :  { %2039 = vst.msk [vmem:[#allocation0 + $0xca1] ss:$40 sm:$0xf] %vm3_vm0, %v2036_v6  }
 0x575   :  { %v4059_v7 = vld [vmem:[#allocation0 + $0xa20] sm:$0x3]  ;;  %v4089_v9 = vld [vmem:[#allocation0 + $0xa48] sm:$0x3]  ;;  %v4119_v11 = vld [vmem:[#allocation0 + $0xa70] sm:$0x3] }
 0x576   :  { %7119 = vst [vmem:[%s11716_s1 + $0x288] sm:$0x3] %v4059_v7  ;;  %v4149_v12 = vld [vmem:[#allocation0 + $0xa98] sm:$0x3]  ;;  %v4179_v8 = vld [vmem:[#allocation0 + $0xac0] sm:$0x3] }
 0x577   :  { %7124 = vst [vmem:[%s11716_s1 + $0x292] sm:$0x3] %v4089_v9  ;;  %v4209_v16 = vld [vmem:[#allocation0 + $0xae8] sm:$0x3]  ;;  %v4239_v18 = vld [vmem:[#allocation0 + $0xb10] sm:$0x3] }
 0x578   :  { %7129 = vst [vmem:[%s11716_s1 + $0x29c] sm:$0x3] %v4119_v11  ;;  %v4269_v19 = vld [vmem:[#allocation0 + $0xb38] sm:$0x3]  ;;  %v3819_v20 = vld [vmem:[#allocation0 + $0x8e0] sm:$0x3] }
 0x579   :  { %7134 = vst [vmem:[%s11716_s1 + $0x2a6] sm:$0x3] %v4149_v12  ;;  %v3849_v13 = vld [vmem:[#allocation0 + $0x908] sm:$0x3]  ;;  %v3879_v58 = vld [vmem:[#allocation0 + $0x930] sm:$0x3] }
 0x57a   :  { %7139 = vst [vmem:[%s11716_s1 + $0x2b0] sm:$0x3] %v4179_v8  ;;  %v3909_v10 = vld [vmem:[#allocation0 + $0x958] sm:$0x3]  ;;  %v4779_v14 = vld [vmem:[#allocation0 + $0xde0] sm:$0x3] }
 0x57b   :  { %7144 = vst [vmem:[%s11716_s1 + $0x2ba] sm:$0x3] %v4209_v16  ;;  %v4809_v21 = vld [vmem:[#allocation0 + $0xe08] sm:$0x3]  ;;  %v4839_v22 = vld [vmem:[#allocation0 + $0xe30] sm:$0x3] }
 0x57c   :  { %7149 = vst [vmem:[%s11716_s1 + $0x2c4] sm:$0x3] %v4239_v18  ;;  %v4869_v23 = vld [vmem:[#allocation0 + $0xe58] sm:$0x3]  ;;  %v4899_v24 = vld [vmem:[#allocation0 + $0xe80] sm:$0x3] }
 0x57d   :  { %7154 = vst [vmem:[%s11716_s1 + $0x2ce] sm:$0x3] %v4269_v19  ;;  %v4929_v26 = vld [vmem:[#allocation0 + $0xea8] sm:$0x3]  ;;  %v4959_v27 = vld [vmem:[#allocation0 + $0xed0] sm:$0x3] }
 0x57e   :  { %7079 = vst [vmem:[%s11716_s1 + $0x238] sm:$0x3] %v3819_v20  ;;  %v4989_v28 = vld [vmem:[#allocation0 + $0xef8] sm:$0x3]  ;;  %v3939_v29 = vld [vmem:[#allocation0 + $0x980] sm:$0x3] }
 0x57f   :  { %7084 = vst [vmem:[%s11716_s1 + $0x242] sm:$0x3] %v3849_v13  ;;  %v3969_v30 = vld [vmem:[#allocation0 + $0x9a8] sm:$0x3]  ;;  %v3999_v48 = vld [vmem:[#allocation0 + $0x9d0] sm:$0x3] }
 0x580   :  { %7089 = vst [vmem:[%s11716_s1 + $0x24c] sm:$0x3] %v3879_v58  ;;  %v4029_v31 = vld [vmem:[#allocation0 + $0x9f8] sm:$0x3]  ;;  %v4539_v33 = vld [vmem:[#allocation0 + $0xca0] sm:$0x3] }
 0x581   :  { %7094 = vst [vmem:[%s11716_s1 + $0x256] sm:$0x3] %v3909_v10  ;;  %v4569_v34 = vld [vmem:[#allocation0 + $0xcc8] sm:$0x3]  ;;  %v4599_v36 = vld [vmem:[#allocation0 + $0xcf0] sm:$0x3] }
 0x582   :  { %7239 = vst [vmem:[%s11716_s1 + $0x378] sm:$0x3] %v4779_v14  ;;  %v4629_v50 = vld [vmem:[#allocation0 + $0xd18] sm:$0x3] }
 0x583   :  { %7244 = vst [vmem:[%s11716_s1 + $0x382] sm:$0x3] %v4809_v21 }
 0x584   :  { %7249 = vst [vmem:[%s11716_s1 + $0x38c] sm:$0x3] %v4839_v22 }
 0x585   :  { %7254 = vst [vmem:[%s11716_s1 + $0x396] sm:$0x3] %v4869_v23 }
 0x586   :  { %7259 = vst [vmem:[%s11716_s1 + $0x3a0] sm:$0x3] %v4899_v24 }
 0x587   :  { %7264 = vst [vmem:[%s11716_s1 + $0x3aa] sm:$0x3] %v4929_v26 }
 0x588   :  { %7269 = vst [vmem:[%s11716_s1 + $0x3b4] sm:$0x3] %v4959_v27 }
 0x589   :  { %7274 = vst [vmem:[%s11716_s1 + $0x3be] sm:$0x3] %v4989_v28 }
 0x58a   :  { %7099 = vst [vmem:[%s11716_s1 + $0x260] sm:$0x3] %v3939_v29 }
 0x58b   :  { %7104 = vst [vmem:[%s11716_s1 + $0x26a] sm:$0x3] %v3969_v30 }
 0x58c   :  { %7109 = vst [vmem:[%s11716_s1 + $0x274] sm:$0x3] %v3999_v48 }
 0x58d   :  { %7114 = vst [vmem:[%s11716_s1 + $0x27e] sm:$0x3] %v4029_v31 }
 0x58e   :  { %2041 = vst.msk [vmem:[#allocation0 + $0xca1] ss:$40 sm:$0xf0] %vm3_vm0, %v2036_v6  }
 0x58f   :  { %7199 = vst [vmem:[%s11716_s1 + $0x328] sm:$0x3] %v4539_v33 }
 0x590   :  { %7204 = vst [vmem:[%s11716_s1 + $0x332] sm:$0x3] %v4569_v34 }
 0x591   :  { %7209 = vst [vmem:[%s11716_s1 + $0x33c] sm:$0x3] %v4599_v36 }
 0x592   :  { %7214 = vst [vmem:[%s11716_s1 + $0x346] sm:$0x3] %v4629_v50 }
 0x593   :  { %2075 = vst.msk [vmem:[#allocation0 + $0x11a1] ss:$40 sm:$0xf] %vm3_vm0, %v2072_v15  }
 0x594   :  { %2077 = vst.msk [vmem:[#allocation0 + $0x11a1] ss:$40 sm:$0xf0] %vm3_vm0, %v2072_v15  }
 0x595   :  { %v4659_v32 = vld [vmem:[#allocation0 + $0xd40] sm:$0x3]  ;;  %v4689_v37 = vld [vmem:[#allocation0 + $0xd68] sm:$0x3]  ;;  %v4719_v38 = vld [vmem:[#allocation0 + $0xd90] sm:$0x3] }
 0x596   :  { %v4749_v39 = vld [vmem:[#allocation0 + $0xdb8] sm:$0x3]  ;;  %7219 = vst [vmem:[%s11716_s1 + $0x350] sm:$0x3] %v4659_v32 }
 0x597   :  { %7224 = vst [vmem:[%s11716_s1 + $0x35a] sm:$0x3] %v4689_v37 }
 0x598   :  { %7229 = vst [vmem:[%s11716_s1 + $0x364] sm:$0x3] %v4719_v38 }
 0x599   :  { %7234 = vst [vmem:[%s11716_s1 + $0x36e] sm:$0x3] %v4749_v39 }
 0x59a   :  { %v5499_v40 = vld [vmem:[#allocation0 + $0x11a0] sm:$0x3]  ;;  %v5529_v41 = vld [vmem:[#allocation0 + $0x11c8] sm:$0x3]  ;;  %v5559_v42 = vld [vmem:[#allocation0 + $0x11f0] sm:$0x3] }
 0x59b   :  { %7359 = vst [vmem:[%s11716_s1 + $0x468] sm:$0x3] %v5499_v40  ;;  %v5589_v43 = vld [vmem:[#allocation0 + $0x1218] sm:$0x3]  ;;  %v5619_v44 = vld [vmem:[#allocation0 + $0x1240] sm:$0x3] }
 0x59c   :  { %7364 = vst [vmem:[%s11716_s1 + $0x472] sm:$0x3] %v5529_v41  ;;  %v5649_v45 = vld [vmem:[#allocation0 + $0x1268] sm:$0x3]  ;;  %v5679_v46 = vld [vmem:[#allocation0 + $0x1290] sm:$0x3] }
 0x59d   :  { %7369 = vst [vmem:[%s11716_s1 + $0x47c] sm:$0x3] %v5559_v42  ;;  %v5709_v47 = vld [vmem:[#allocation0 + $0x12b8] sm:$0x3] }
 0x59e   :  { %7374 = vst [vmem:[%s11716_s1 + $0x486] sm:$0x3] %v5589_v43 }
 0x59f   :  { %2066 = vst.msk [vmem:[#allocation0 + $0x1061] ss:$40 sm:$0xf] %vm3_vm0, %v11519_v17  }
 0x5a0   :  { %2068 = vst.msk [vmem:[#allocation0 + $0x1061] ss:$40 sm:$0xf0] %vm3_vm0, %v11519_v17  }
 0x5a1   :  { %7379 = vst [vmem:[%s11716_s1 + $0x490] sm:$0x3] %v5619_v44 }
 0x5a2   :  { %7384 = vst [vmem:[%s11716_s1 + $0x49a] sm:$0x3] %v5649_v45 }
 0x5a3   :  { %7389 = vst [vmem:[%s11716_s1 + $0x4a4] sm:$0x3] %v5679_v46 }
 0x5a4   :  { %7394 = vst [vmem:[%s11716_s1 + $0x4ae] sm:$0x3] %v5709_v47 }
 0x5a5   :  { %2102 = vst.msk [vmem:[#allocation0 + $0x1561] ss:$40 sm:$0xf] %vm3_vm0, %v2099_v35  }
 0x5a6   :  { %v5259_v51 = vld [vmem:[#allocation0 + $0x1060] sm:$0x3]  ;;  %v5289_v52 = vld [vmem:[#allocation0 + $0x1088] sm:$0x3]  ;;  %v5319_v53 = vld [vmem:[#allocation0 + $0x10b0] sm:$0x3] }
 0x5a7   :  { %7319 = vst [vmem:[%s11716_s1 + $0x418] sm:$0x3] %v5259_v51  ;;  %v5349_v54 = vld [vmem:[#allocation0 + $0x10d8] sm:$0x3]  ;;  %v5379_v55 = vld [vmem:[#allocation0 + $0x1100] sm:$0x3] }
 0x5a8   :  { %7324 = vst [vmem:[%s11716_s1 + $0x422] sm:$0x3] %v5289_v52  ;;  %v5409_v56 = vld [vmem:[#allocation0 + $0x1128] sm:$0x3]  ;;  %v5439_v57 = vld [vmem:[#allocation0 + $0x1150] sm:$0x3] }
 0x5a9   :  { %7329 = vst [vmem:[%s11716_s1 + $0x42c] sm:$0x3] %v5319_v53  ;;  %v5469_v59 = vld [vmem:[#allocation0 + $0x1178] sm:$0x3] }
 0x5aa   :  { %7334 = vst [vmem:[%s11716_s1 + $0x436] sm:$0x3] %v5349_v54 }
 0x5ab   :  { %7339 = vst [vmem:[%s11716_s1 + $0x440] sm:$0x3] %v5379_v55 }
 0x5ac   :  { %7344 = vst [vmem:[%s11716_s1 + $0x44a] sm:$0x3] %v5409_v56  ;;  %v6219_v60 = vld [vmem:[#allocation0 + $0x1560] sm:$0x3]  ;;  %v6249_v61 = vld [vmem:[#allocation0 + $0x1588] sm:$0x3] }
 0x5ad   :  { %7349 = vst [vmem:[%s11716_s1 + $0x454] sm:$0x3] %v5439_v57  ;;  %v6279_v62 = vld [vmem:[#allocation0 + $0x15b0] sm:$0x3]  ;;  %v6309_v63 = vld [vmem:[#allocation0 + $0x15d8] sm:$0x3] }
 0x5ae   :  { %7354 = vst [vmem:[%s11716_s1 + $0x45e] sm:$0x3] %v5469_v59 }
 0x5af   :  { %2104 = vst.msk [vmem:[#allocation0 + $0x1561] ss:$40 sm:$0xf0] %vm3_vm0, %v2099_v35  }
 0x5b0   :  { %7479 = vst [vmem:[%s11716_s1 + $0x558] sm:$0x3] %v6219_v60 }
 0x5b1   :  { %7484 = vst [vmem:[%s11716_s1 + $0x562] sm:$0x3] %v6249_v61 }
 0x5b2   :  { %7489 = vst [vmem:[%s11716_s1 + $0x56c] sm:$0x3] %v6279_v62 }
 0x5b3   :  { %7494 = vst [vmem:[%s11716_s1 + $0x576] sm:$0x3] %v6309_v63 }
 0x5b4   :  { %2093 = vst.msk [vmem:[#allocation0 + $0x1421] ss:$40 sm:$0xf] %vm3_vm0, %v2090_v25  }
 0x5b5   :  { %2095 = vst.msk [vmem:[#allocation0 + $0x1421] ss:$40 sm:$0xf0] %vm3_vm0, %v2090_v25  }
 0x5b6   :  { %v6339_v0 = vld [vmem:[#allocation0 + $0x1600] sm:$0x3]  ;;  %v6369_v1 = vld [vmem:[#allocation0 + $0x1628] sm:$0x3]  ;;  %v6399_v2 = vld [vmem:[#allocation0 + $0x1650] sm:$0x3] }
 0x5b7   :  { %7499 = vst [vmem:[%s11716_s1 + $0x580] sm:$0x3] %v6339_v0  ;;  %v6429_v49 = vld [vmem:[#allocation0 + $0x1678] sm:$0x3] }
 0x5b8   :  { %7504 = vst [vmem:[%s11716_s1 + $0x58a] sm:$0x3] %v6369_v1 }
 0x5b9   :  { %7509 = vst [vmem:[%s11716_s1 + $0x594] sm:$0x3] %v6399_v2 }
 0x5ba   :  { %7514 = vst [vmem:[%s11716_s1 + $0x59e] sm:$0x3] %v6429_v49 }
 0x5bb   :  { %v5979_v3 = vld [vmem:[#allocation0 + $0x1420] sm:$0x3]  ;;  %v6009_v4 = vld [vmem:[#allocation0 + $0x1448] sm:$0x3]  ;;  %v6039_v5 = vld [vmem:[#allocation0 + $0x1470] sm:$0x3] }
 0x5bc   :  { %7439 = vst [vmem:[%s11716_s1 + $0x508] sm:$0x3] %v5979_v3  ;;  %v6069_v6 = vld [vmem:[#allocation0 + $0x1498] sm:$0x3]  ;;  %v6099_v7 = vld [vmem:[#allocation0 + $0x14c0] sm:$0x3] }
 0x5bd   :  { %7444 = vst [vmem:[%s11716_s1 + $0x512] sm:$0x3] %v6009_v4  ;;  %v6129_v9 = vld [vmem:[#allocation0 + $0x14e8] sm:$0x3]  ;;  %v6159_v11 = vld [vmem:[#allocation0 + $0x1510] sm:$0x3] }
 0x5be   :  { %7449 = vst [vmem:[%s11716_s1 + $0x51c] sm:$0x3] %v6039_v5  ;;  %v6189_v12 = vld [vmem:[#allocation0 + $0x1538] sm:$0x3] }
 0x5bf   :  { %7454 = vst [vmem:[%s11716_s1 + $0x526] sm:$0x3] %v6069_v6 }
 0x5c0   :  { %7459 = vst [vmem:[%s11716_s1 + $0x530] sm:$0x3] %v6099_v7 }
 0x5c1   :  { %7464 = vst [vmem:[%s11716_s1 + $0x53a] sm:$0x3] %v6129_v9 }
 0x5c2   :  { %7469 = vst [vmem:[%s11716_s1 + $0x544] sm:$0x3] %v6159_v11 }
 0x5c3   :  { %7474 = vst [vmem:[%s11716_s1 + $0x54e] sm:$0x3] %v6189_v12 }

// kernel: net_forward_pallas.1
= control target key start
LH: loop header
LB: loop body
LE: loop exit
PB: predicated region body
PF: predicated region fallthrough
CT: control target
= control target key end

     0   :  { %vm161_vm0 = vcmask 1041408   ;;  %vm152_vm1 = vcmask 80896   ;;  %vm144_vm2 = vcmask 1046528   ;;  %vm236_vm3 = vcmask 1042432   ;;  %s833_s1 = inlined_call_operand.vmem [shape: f32[128,384], index: 1, kind: input, shape index: {}]   ;;  %s834_s0 = inlined_call_operand.vmem [shape: f32[128,128], index: 0, kind: input, shape index: {}]   ;;  %s835_s2 = inlined_call_operand.vmem [shape: f32[8,128], index: 2, kind: output, shape index: {}]  }
   0x1   :  { %v42_v0 = vld [vmem:[%s833_s1 + $0x168] sm:$0xff]  ;;  %v41_v1 = vld [vmem:[%s833_s1 + $0x150] sm:$0xff]  ;;  %v40_v2 = vld [vmem:[%s833_s1 + $0x138] sm:$0xff]  ;;  %vm403_vm4 = vcmask 1043456   ;;  %vm365_vm5 = vcmask 1045504   ;;  %vm400_vm6 = vcmask 162816  }
   0x2   :  { %43 = vmatpush.msra.mxu0 %v42_v0  ;;  %578 = vmatpush.msra.mxu2 %v42_v0  ;;  %v39_v3 = vld [vmem:[%s833_s1 + $0x120] sm:$0xff]  ;;  %v38_v4 = vld [vmem:[%s833_s1 + $0x108] sm:$0xff]  ;;  %v37_v5 = vld [vmem:[%s833_s1 + $0xf0] sm:$0xff]  ;;  %vm518_vm8 = vcmask 1040384  }
   0x3   :  { %577 = vmatpush.msra.mxu1 %v42_v0  ;;  %v36_v6 = vld [vmem:[%s833_s1 + $0xd8] sm:$0xff]  ;;  %v35_v7 = vld [vmem:[%s833_s1 + $0xc0] sm:$0xff]  ;;  %v34_v8 = vld [vmem:[%s833_s1 + $0xa8] sm:$0xff] }
   0x4   :  { %44 = vmatpush.msra.mxu0 %v41_v1  ;;  %580 = vmatpush.msra.mxu2 %v41_v1  ;;  %v33_v9 = vld [vmem:[%s833_s1 + $0x90] sm:$0xff]  ;;  %v32_v10 = vld [vmem:[%s833_s1 + $0x78] sm:$0xff]  ;;  %v31_v11 = vld [vmem:[%s833_s1 + $0x60] sm:$0xff] }
   0x5   :  { %579 = vmatpush.msra.mxu1 %v41_v1  ;;  %v30_v12 = vld [vmem:[%s833_s1 + $0x48] sm:$0xff]  ;;  %v29_v13 = vld [vmem:[%s833_s1 + $0x30] sm:$0xff]  ;;  %v28_v14 = vld [vmem:[%s833_s1 + $0x18] sm:$0xff] }
   0x6   :  { %45 = vmatpush.msra.mxu0 %v40_v2  ;;  %582 = vmatpush.msra.mxu2 %v40_v2  ;;  %v27_v15 = vld [vmem:[%s833_s1] sm:$0xff]  ;;  %v20_v17 = vld [vmem:[%s834_s0 + $0x48] sm:$0xff]  ;;  %v21_v20 = vld [vmem:[%s834_s0 + $0x50] sm:$0xff] }
   0x7   :  { %581 = vmatpush.msra.mxu1 %v40_v2  ;;  %v11_v16 = vld [vmem:[%s834_s0] sm:$0xff]  ;;  %v12_v19 = vld [vmem:[%s834_s0 + $0x8] sm:$0xff]  ;;  %v13_v21 = vld [vmem:[%s834_s0 + $0x10] sm:$0xff] }
   0x8   :  { %46 = vmatpush.msra.mxu0 %v39_v3  ;;  %584 = vmatpush.msra.mxu2 %v39_v3  ;;  %v19_v18 = vld [vmem:[%s834_s0 + $0x40] sm:$0xff]  ;;  %v22_v22 = vld [vmem:[%s834_s0 + $0x58] sm:$0xff]  ;;  %v24_v26 = vld [vmem:[%s834_s0 + $0x68] sm:$0xff] }
   0x9   :  { %583 = vmatpush.msra.mxu1 %v39_v3  ;;  %v14_v23 = vld [vmem:[%s834_s0 + $0x18] sm:$0xff]  ;;  %v23_v24 = vld [vmem:[%s834_s0 + $0x60] sm:$0xff]  ;;  %v16_v27 = vld [vmem:[%s834_s0 + $0x28] sm:$0xff] }
   0xa   :  { %47 = vmatpush.msra.mxu0 %v38_v4  ;;  %586 = vmatpush.msra.mxu2 %v38_v4  ;;  %v15_v25 = vld [vmem:[%s834_s0 + $0x20] sm:$0xff]  ;;  %v25_v28 = vld [vmem:[%s834_s0 + $0x70] sm:$0xff]  ;;  %v26_v30 = vld [vmem:[%s834_s0 + $0x78] sm:$0xff] }
   0xb   :  { %585 = vmatpush.msra.mxu1 %v38_v4  ;;  %v17_v29 = vld [vmem:[%s834_s0 + $0x30] sm:$0xff]  ;;  %v18_v31 = vld [vmem:[%s834_s0 + $0x38] sm:$0xff]  ;;  %v137_v33 = vld [vmem:[%s833_s1 + $0x20] sm:$0x3] }
   0xc   :  { %48 = vmatpush.msra.mxu0 %v37_v5  ;;  %588 = vmatpush.msra.mxu2 %v37_v5  ;;  %v136_v34 = vld [vmem:[%s833_s1 + $0x8] sm:$0xff]  ;;  %v139_v37 = vld [vmem:[%s833_s1 + $0x50] sm:$0x3]  ;;  %v235_v38 = vld [vmem:[%s833_s1 + $0x80] sm:$0x3] }
   0xd   :  { %587 = vmatpush.msra.mxu1 %v37_v5  ;;  %554 = vmatpush.msk.msra.mxu3 %vm161_vm0, %v137_v33  ;;  %v138_v41 = vld [vmem:[%s833_s1 + $0x38] sm:$0xff]  ;;  %v289_v42 = vld [vmem:[%s833_s1 + $0xb0] sm:$0x3]  ;;  %v234_v47 = vld [vmem:[%s833_s1 + $0x68] sm:$0xff] }
   0xe   :  { %49 = vmatpush.msra.mxu0 %v36_v6  ;;  %590 = vmatpush.msra.mxu2 %v36_v6  ;;  %v288_v54 = vld [vmem:[%s833_s1 + $0x98] sm:$0xff] }
   0xf   :  { %589 = vmatpush.msra.mxu1 %v36_v6  ;;  %220 = vmatpush.msra.mxu3 %v136_v34 }
  0x10   :  { %50 = vmatpush.msra.mxu0 %v35_v7  ;;  %592 = vmatpush.msra.mxu2 %v35_v7 }
  0x11   :  { %591 = vmatpush.msra.mxu1 %v35_v7  ;;  %559 = vmatpush.msk.msrb.mxu3 %vm161_vm0, %v235_v38 }
  0x12   :  { %51 = vmatpush.msra.mxu0 %v34_v8  ;;  %594 = vmatpush.msra.mxu2 %v34_v8 }
  0x13   :  { %593 = vmatpush.msra.mxu1 %v34_v8  ;;  %270 = vmatpush.msrb.mxu3 %v234_v47 }
  0x14   :  { %52 = vmatpush.msra.mxu0 %v33_v9  ;;  %596 = vmatpush.msra.mxu2 %v33_v9 }
  0x15   :  { %595 = vmatpush.msra.mxu1 %v33_v9 }
  0x16   :  { %53 = vmatpush.msra.mxu0 %v32_v10  ;;  %598 = vmatpush.msra.mxu2 %v32_v10 }
  0x17   :  { %597 = vmatpush.msra.mxu1 %v32_v10 }
  0x18   :  { %54 = vmatpush.msra.mxu0 %v31_v11  ;;  %600 = vmatpush.msra.mxu2 %v31_v11 }
  0x19   :  { %599 = vmatpush.msra.mxu1 %v31_v11 }
  0x1a   :  { %55 = vmatpush.msra.mxu0 %v30_v12  ;;  %602 = vmatpush.msra.mxu2 %v30_v12 }
  0x1b   :  { %601 = vmatpush.msra.mxu1 %v30_v12 }
  0x1c   :  { %56 = vmatpush.msra.mxu0 %v29_v13  ;;  %604 = vmatpush.msra.mxu2 %v29_v13 }
  0x1d   :  { %603 = vmatpush.msra.mxu1 %v29_v13 }
  0x1e   :  { %57 = vmatpush.msra.mxu0 %v28_v14  ;;  %606 = vmatpush.msra.mxu2 %v28_v14 }
  0x1f   :  { %605 = vmatpush.msra.mxu1 %v28_v14 }
  0x20   :  { %58 = vmatpush.msra.mxu0 %v27_v15  ;;  %608 = vmatpush.msra.mxu2 %v27_v15 }
  0x21   :  { %59 = vmatmul.f32.vlgmr.msra.gmra.mxu0 %v11_v16  ;;  %86 = vmatmul.f32.vlgmr.msra.gmra.mxu2 %v20_v17 }
  0x22   :  { %607 = vmatpush.msra.mxu1 %v27_v15 }
  0x23   :  { %83 = vmatmul.f32.vlgmr.msra.gmra.mxu1 %v19_v18 }
  0x24   :  { %549 = vmatpush.msk.msrb.mxu1 %vm161_vm0, %v139_v37 }
  0x26   :  { %180 = vmatpush.msrb.mxu1 %v138_v41  ;;  %v397_v41 = vld [vmem:[%s833_s1 + $0x88] sm:$0xf] }
  0x27   :  { %569 = vmatpush.msk.msrb.mxu2 %vm403_vm4, %v397_v41 }
  0x28   :  { %564 = vmatpush.msk.msra.mxu1 %vm161_vm0, %v289_v42 }
  0x29   :  { %62 = vmatmul.f32.gmra.mxu0 %v12_v19  ;;  %89 = vmatmul.f32.gmra.mxu2 %v21_v20 }
  0x2a   :  { %323 = vmatpush.msra.mxu1 %v288_v54 }
  0x31   :  { %65 = vmatmul.f32.gmra.mxu0 %v13_v21  ;;  %92 = vmatmul.f32.gmra.mxu2 %v22_v22 }
  0x39   :  { %68 = vmatmul.f32.gmra.mxu0 %v14_v23  ;;  %95 = vmatmul.f32.gmra.mxu2 %v23_v24 }
  0x41   :  { %71 = vmatmul.f32.gmra.mxu0 %v15_v25  ;;  %98 = vmatmul.f32.gmra.mxu2 %v24_v26 }
  0x49   :  { %74 = vmatmul.f32.gmra.mxu0 %v16_v27  ;;  %101 = vmatmul.f32.gmra.mxu2 %v25_v28 }
  0x51   :  { %77 = vmatmul.f32.gmra.mxu0 %v17_v29  ;;  %104 = vmatmul.f32.gmra.mxu2 %v26_v30 }
  0x59   :  { %80 = vmatmul.f32.gmra.mxu0 %v18_v31 }
  0x9e   :  { %v60_v32 = vpop.f32.mrf.mxu0 }
  0x9f   :  { %v108_v51 = vmax.f32 %v60_v32, 0.0 }
  0xa0   :  { %v84_v45 = vpop.f32.mrf.mxu1 }
  0xa1   :  { %v116_v46 = vmax.f32 %v84_v45, 0.0  ;;  %v396_v45 = vld [vmem:[%s833_s1 + $0x70] sm:$0xff] }
  0xa2   :  { %421 = vmatpush.msrb.mxu2 %v396_v45 }
  0xa4   :  { %v87_v35 = vpop.f32.mrf.mxu2 }
  0xa5   :  { %v117_v60 = vmax.f32 %v87_v35, 0.0 }
  0xa6   :  { %v63_v36 = vpop.f32.mrf.mxu0 }
  0xa7   :  { %v109_v61 = vmax.f32 %v63_v36, 0.0 }
  0xac   :  { %v90_v39 = vpop.f32.mrf.mxu2 }
  0xad   :  { %v118_v7 = vmax.f32 %v90_v39, 0.0 }
  0xae   :  { %v66_v40 = vpop.f32.mrf.mxu0 }
  0xaf   :  { %v110_v8 = vmax.f32 %v66_v40, 0.0 }
  0xb4   :  { %v93_v43 = vpop.f32.mrf.mxu2 }
  0xb5   :  { %v119_v18 = vmax.f32 %v93_v43, 0.0 }
  0xb6   :  { %v69_v44 = vpop.f32.mrf.mxu0 }
  0xb7   :  { %v111_v19 = vmax.f32 %v69_v44, 0.0 }
  0xbc   :  { %v96_v48 = vpop.f32.mrf.mxu2 }
  0xbd   :  { %v120_v49 = vmax.f32 %v96_v48, 0.0 }
  0xbe   :  { %v72_v50 = vpop.f32.mrf.mxu0 }
  0xbf   :  { %v112_v52 = vmax.f32 %v72_v50, 0.0  ;;  %v128_v53 = vmax.f32 %v116_v46, %v120_v49  ;;  %v394_v50 = vld [vmem:[%s833_s1 + $0x40] sm:$0xf] }
  0xc1   :  { %v124_v55 = vmax.f32 %v108_v51, %v112_v52 }
  0xc3   :  { %v132_v56 = vmax.f32 %v124_v55, %v128_v53 }
  0xc4   :  { %v99_v57 = vpop.f32.mrf.mxu2 }
  0xc5   :  { %v121_v58 = vmax.f32 %v99_v57, 0.0  ;;  %555 = vmatmul.msk.f32.vlgmr.msra.gmra.mxu3 %vm152_vm1, %v132_v56  ;;  %v145_v4 = vrot.slane %v132_v56, 1  ;;  %v237_v28 = vrot.slane %v132_v56, 5  ;;  %v290_v33 = vrot.slane %v132_v56, 6  ;;  %v393_v56 = vld [vmem:[%s833_s1 + $0x28] sm:$0xff]  ;;  %v395_v57 = vld [vmem:[%s833_s1 + $0x58] sm:$0xff] }
  0xc6   :  { %v75_v59 = vpop.f32.mrf.mxu0  ;;  %571 = vmatpush.msk.msra.mxu3 %vm403_vm4, %v394_v50  ;;  %422 = vmatpush.msrb.mxu2 %v395_v57  ;;  %v514_v57 = vlaneseq }
  0xc7   :  { %v113_v62 = vmax.f32 %v75_v59, 0.0  ;;  %v129_v63 = vmax.f32 %v117_v60, %v121_v58  ;;  %v392_v58 = vld [vmem:[%s833_s1 + $0x10] sm:$0xff] }
  0xc8   :  { %446 = vmatpush.msra.mxu3 %v393_v56 }
  0xc9   :  { %v125_v0 = vmax.f32 %v109_v61, %v113_v62 }
  0xca   :  { %447 = vmatpush.msra.mxu3 %v392_v58 }
  0xcb   :  { %v133_v1 = vmax.f32 %v125_v0, %v129_v63  ;;  %v341_v63 = vld [vmem:[%s833_s1 + $0xc8] ss:$0 sm:$0xff] }
  0xcc   :  { %v102_v2 = vpop.f32.mrf.mxu2 }
  0xcd   :  { %v122_v3 = vmax.f32 %v102_v2, 0.0  ;;  %556 = vmatmul.msk.f32.gmra.mxu3 %vm152_vm1, %v133_v1  ;;  %v146_v5 = vrot.slane %v133_v1, 1  ;;  %v238_v27 = vrot.slane %v133_v1, 5  ;;  %v291_v31 = vrot.slane %v133_v1, 6 }
  0xce   :  { %v78_v6 = vpop.f32.mrf.mxu0 }
  0xcf   :  { %v114_v9 = vmax.f32 %v78_v6, 0.0  ;;  %v147_v10 = vsel %vm144_vm2, %v145_v4, %v146_v5  ;;  %v130_v11 = vmax.f32 %v118_v7, %v122_v3  ;;  %v239_v29 = vsel %vm236_vm3, %v237_v28, %v238_v27  ;;  %v484_v6 = vld [vmem:[%s833_s1 + $0x118] sm:$0xf] }
  0xd0   :  { %550 = vmatmul.msk.f32.vlgmr.msrb.gmra.mxu1 %vm152_vm1, %v147_v10  ;;  %v292_v34 = vsel %vm161_vm0, %v290_v33, %v291_v31  ;;  %v453_v7 = vld [vmem:[%s833_s1 + $0xb8] sm:$0xff] }
  0xd1   :  { %v126_v12 = vmax.f32 %v110_v8, %v114_v9  ;;  %v483_v8 = vld [vmem:[%s833_s1 + $0x100] sm:$0xff] }
  0xd3   :  { %v134_v13 = vmax.f32 %v126_v12, %v130_v11  ;;  %v482_v11 = vld [vmem:[%s833_s1 + $0xe8] sm:$0xff]  ;;  %v452_v12 = vld [vmem:[%s833_s1 + $0xa0] sm:$0xff] }
  0xd4   :  { %v105_v14 = vpop.f32.mrf.mxu2 }
  0xd5   :  { %v123_v15 = vmax.f32 %v105_v14, 0.0  ;;  %557 = vmatmul.msk.f32.gmra.mxu3 %vm152_vm1, %v134_v13  ;;  %v148_v16 = vrot.slane %v134_v13, 1  ;;  %v240_v30 = vrot.slane %v134_v13, 5  ;;  %v293_v36 = vrot.slane %v134_v13, 6 }
  0xd6   :  { %v81_v17 = vpop.f32.mrf.mxu0 }
  0xd7   :  { %v115_v20 = vmax.f32 %v81_v17, 0.0  ;;  %v149_v21 = vsel %vm144_vm2, %v146_v5, %v148_v16  ;;  %v131_v22 = vmax.f32 %v119_v18, %v123_v15  ;;  %v241_v32 = vsel %vm236_vm3, %v238_v27, %v240_v30  ;;  %v454_v5 = vld [vmem:[%s833_s1 + $0xd0] sm:$0xf] }
  0xd8   :  { %551 = vmatmul.msk.f32.gmra.mxu1 %vm152_vm1, %v149_v21  ;;  %v294_v38 = vsel %vm161_vm0, %v291_v31, %v293_v36  ;;  %573 = vmatpush.msk.msra.mxu2 %vm403_vm4, %v454_v5 }
  0xd9   :  { %v127_v23 = vmax.f32 %v111_v19, %v115_v20 }
  0xda   :  { %475 = vmatpush.msra.mxu2 %v453_v7 }
  0xdb   :  { %v135_v24 = vmax.f32 %v127_v23, %v131_v22 }
  0xdc   :  { %476 = vmatpush.msra.mxu2 %v452_v12 }
  0xdd   :  { %558 = vmatmul.msk.f32.gmra.mxu3 %vm152_vm1, %v135_v24  ;;  %v150_v25 = vrot.slane %v135_v24, 1  ;;  %v242_v35 = vrot.slane %v135_v24, 5  ;;  %v295_v39 = vrot.slane %v135_v24, 6 }
  0xdf   :  { %v151_v26 = vsel %vm144_vm2, %v148_v16, %v150_v25  ;;  %v243_v37 = vsel %vm236_vm3, %v240_v30, %v242_v35  ;;  %v296_v40 = vsel %vm161_vm0, %v293_v36, %v295_v39 }
  0xe0   :  { %552 = vmatmul.msk.f32.gmra.mxu1 %vm152_vm1, %v151_v26 }
  0xe5   :  { %560 = vmatmul.msk.f32.vlgmr.msrb.gmra.mxu3 %vm152_vm1, %v239_v29 }
  0xe6   :  { %575 = vmatpush.msk.msrb.mxu3 %vm403_vm4, %v484_v6 }
  0xe8   :  { %553 = vmatmul.msk.f32.gmra.mxu1 %vm152_vm1, %v150_v25  ;;  %505 = vmatpush.msrb.mxu3 %v483_v8 }
  0xea   :  { %506 = vmatpush.msrb.mxu3 %v482_v11 }
  0xed   :  { %561 = vmatmul.msk.f32.gmra.mxu3 %vm152_vm1, %v241_v32 }
  0xf0   :  { %565 = vmatmul.msk.f32.vlgmr.msra.gmra.mxu1 %vm152_vm1, %v292_v34 }
  0xf5   :  { %562 = vmatmul.msk.f32.gmra.mxu3 %vm152_vm1, %v243_v37 }
  0xf8   :  { %566 = vmatmul.msk.f32.gmra.mxu1 %vm152_vm1, %v294_v38 }
  0xfd   :  { %563 = vmatmul.msk.f32.gmra.mxu3 %vm152_vm1, %v242_v35 }
 0x100   :  { %567 = vmatmul.msk.f32.gmra.mxu1 %vm152_vm1, %v296_v40 }
 0x108   :  { %568 = vmatmul.msk.f32.gmra.mxu1 %vm152_vm1, %v295_v39 }
 0x148   :  { %v222_v42 = vpop.f32.mrf.mxu3 }
 0x14d   :  { %v182_v43 = vpop.f32.mrf.mxu1 }
 0x14e   :  { %v223_v54 = vadd.f32 %v222_v42, %v182_v43 }
 0x150   :  { %v225_v44 = vpop.f32.mrf.mxu3 }
 0x155   :  { %v185_v46 = vpop.f32.mrf.mxu1 }
 0x156   :  { %v226_v59 = vadd.f32 %v225_v44, %v185_v46 }
 0x158   :  { %v228_v47 = vpop.f32.mrf.mxu3 }
 0x15d   :  { %v188_v48 = vpop.f32.mrf.mxu1 }
 0x15e   :  { %v229_v9 = vadd.f32 %v228_v47, %v188_v48 }
 0x160   :  { %v231_v49 = vpop.f32.mrf.mxu3 }
 0x165   :  { %v191_v51 = vpop.f32.mrf.mxu1 }
 0x166   :  { %v232_v21 = vadd.f32 %v231_v49, %v191_v51 }
 0x168   :  { %v272_v52 = vpop.f32.mrf.mxu3 }
 0x169   :  { %v284_v60 = vadd.f32 %v272_v52, %v223_v54 }
 0x16d   :  { %v325_v53 = vpop.f32.mrf.mxu1 }
 0x16e   :  { %v337_v61 = vadd.f32 %v325_v53, %v284_v60  ;;  %v515_v60 = vand.u32 127, %v514_v57 }
 0x170   :  { %v275_v55 = vpop.f32.mrf.mxu3  ;;  %v342_v2 = vadd.f32 %v341_v63, %v337_v61  ;;  %vm516_vm7 = vcmp.lt.s32.totalorder %v515_v60, 2 }
 0x171   :  { %v285_v62 = vadd.f32 %v275_v55, %v226_v59 }
 0x172   :  { %v346_v13 = vmax.f32 %v342_v2, 0.0 }
 0x174   :  { %v353_v18 = vrot.slane %v346_v13, 1  ;;  %v366_v30 = vrot.slane %v346_v13, 2 }
 0x175   :  { %v328_v0 = vpop.f32.mrf.mxu1 }
 0x176   :  { %v338_v1 = vadd.f32 %v328_v0, %v285_v62 }
 0x178   :  { %v343_v3 = vadd.f32 %v341_v63, %v338_v1  ;;  %v278_v4 = vpop.f32.mrf.mxu3 }
 0x179   :  { %v286_v14 = vadd.f32 %v278_v4, %v229_v9 }
 0x17a   :  { %v347_v10 = vmax.f32 %v343_v3, 0.0 }
 0x17c   :  { %v354_v16 = vrot.slane %v347_v10, 1  ;;  %v367_v24 = vrot.slane %v347_v10, 2 }
 0x17d   :  { %v331_v15 = vpop.f32.mrf.mxu1 }
 0x17e   :  { %v339_v17 = vadd.f32 %v331_v15, %v286_v14  ;;  %v355_v22 = vsel %vm144_vm2, %v353_v18, %v354_v16  ;;  %v368_v34 = vsel %vm365_vm5, %v366_v30, %v367_v24 }
 0x17f   :  { %v361_v28 = vmax.f32 %v346_v13, %v355_v22 }
 0x180   :  { %v344_v19 = vadd.f32 %v341_v63, %v339_v17  ;;  %v281_v20 = vpop.f32.mrf.mxu3 }
 0x181   :  { %v287_v27 = vadd.f32 %v281_v20, %v232_v21  ;;  %v376_v37 = vmax.f32 %v361_v28, %v368_v34 }
 0x182   :  { %v348_v23 = vmax.f32 %v344_v19, 0.0 }
 0x183   :  { %v381_v42 = vrot.slane %v376_v37, 5 }
 0x184   :  { %v356_v25 = vrot.slane %v348_v23, 1  ;;  %v369_v26 = vrot.slane %v348_v23, 2 }
 0x185   :  { %v334_v29 = vpop.f32.mrf.mxu1 }
 0x186   :  { %v357_v31 = vsel %vm144_vm2, %v354_v16, %v356_v25  ;;  %v340_v32 = vadd.f32 %v334_v29, %v287_v27  ;;  %v370_v35 = vsel %vm365_vm5, %v367_v24, %v369_v26  ;;  %v363_v43 = vmax.f32 %v348_v23, %v356_v25 }
 0x187   :  { %v362_v33 = vmax.f32 %v347_v10, %v357_v31 }
 0x188   :  { %v345_v36 = vadd.f32 %v341_v63, %v340_v32  ;;  %v512_v63 = vld [vmem:[%s833_s1 + $0x130] ss:$0 sm:$0xff] }
 0x189   :  { %v377_v38 = vmax.f32 %v362_v33, %v370_v35 }
 0x18a   :  { %v349_v39 = vmax.f32 %v345_v36, 0.0 }
 0x18b   :  { %v382_v40 = vrot.slane %v377_v38, 5  ;;  %v387_v47 = vrot.slane %v377_v38, 2 }
 0x18c   :  { %v371_v41 = vrot.slane %v349_v39, 2 }
 0x18d   :  { %v383_v46 = vsel %vm236_vm3, %v381_v42, %v382_v40 }
 0x18e   :  { %v372_v44 = vsel %vm365_vm5, %v369_v26, %v371_v41  ;;  %v385_v49 = vmax.f32 %v376_v37, %v383_v46 }
 0x18f   :  { %v378_v45 = vmax.f32 %v363_v43, %v372_v44 }
 0x191   :  { %v388_v48 = vrot.slane %v378_v45, 2 }
 0x193   :  { %v389_v50 = vsel %vm365_vm5, %v387_v47, %v388_v48 }
 0x194   :  { %v391_v51 = vmax.f32 %v385_v49, %v389_v50 }
 0x196   :  { %572 = vmatmul.msk.f32.vlgmr.msra.gmra.mxu3 %vm400_vm6, %v391_v51  ;;  %v399_v52 = vrot.slane %v391_v51, 1  ;;  %v485_v53 = vrot.slane %v391_v51, 6  ;;  %v455_v54 = vrot.slane %v391_v51, 5 }
 0x198   :  { %570 = vmatmul.msk.f32.vlgmr.msrb.gmra.mxu2 %vm400_vm6, %v399_v52 }
 0x19e   :  { %576 = vmatmul.msk.f32.vlgmr.msrb.gmra.mxu3 %vm400_vm6, %v485_v53 }
 0x1a0   :  { %574 = vmatmul.msk.f32.vlgmr.msra.gmra.mxu2 %vm400_vm6, %v455_v54 }
 0x219   :  { %v449_v55 = vpop.f32.mrf.mxu3 }
 0x21b   :  { %v424_v56 = vpop.f32.mrf.mxu2 }
 0x21c   :  { %v450_v58 = vadd.f32 %v449_v55, %v424_v56 }
 0x221   :  { %v508_v62 = vpop.f32.mrf.mxu3 }
 0x223   :  { %v478_v59 = vpop.f32.mrf.mxu2 }
 0x224   :  { %v481_v61 = vadd.f32 %v478_v59, %v450_v58 }
 0x226   :  { %v511_v0 = vadd.f32 %v508_v62, %v481_v61 }
 0x228   :  { %v513_v1 = vadd.f32 %v512_v63, %v511_v0 }
 0x22a   :  { %v517_v2 = vsel %vm516_vm7, %v513_v1, -1e+30 }
 0x22b   :  { %v519_v3 = vsel %vm518_vm8, %v517_v2, -inf }
 0x22c   :  { %520 = vmax.xlane.f32.xlu0 %v519_v3 }
 0x29f   :  { %v521_v4 = vpop.xlane.xlu0 %520 }
 0x2a0   :  { %v522_v5 = vsub.f32 %v517_v2, %v521_v4 }
 0x2a2   :  { %v523_v6 = vmul.f32 1.442695, %v522_v5 }
 0x2a4   :  { %609 = vpow2.f32 %v523_v6 }
 0x2aa   :  { %v610_v7 = vpop.eup %609 }
 0x2ab   :  { %v525_v8 = vsel %vm518_vm8, %v610_v7, 0.0 }
 0x2ac   :  { %526 = vadd.xlane.f32.xlu0 %v525_v8 }
 0x31f   :  { %v527_v9 = vpop.xlane.xlu0 %526 }
 0x320   :  { %611 = vrcp.f32 %v527_v9  ;;  %v539_v13 = vand.u32 2147483648, %v527_v9  ;;  %v537_v15 = vand.u32 2147483647, %v527_v9  ;;  %vm533_vm10 = vweird.f32 %v527_v9 }
 0x322   :  { %v540_v17 = vor.u32 1.1754944e-38, %v539_v13  ;;  %vm538_vm12 = vcmp.eq.f32.partialorder %v537_v15, 8.507059e+37 }
 0x326   :  { %v612_v10 = vpop.eup %611 }
 0x327   :  { %v529_v11 = vmul.f32 %v612_v10, %v527_v9  ;;  %vm534_vm9 = vweird.f32 %v612_v10 }
 0x328   :  { %vm535_vm11 = vmor %vm533_vm10, %vm534_vm9 }
 0x329   :  { %v530_v12 = vsub.f32 1.0, %v529_v11 }
 0x32b   :  { %v531_v14 = vmul.f32 %v612_v10, %v530_v12 }
 0x32d   :  { %v532_v16 = vadd.f32 %v612_v10, %v531_v14 }
 0x32f   :  { %v536_v18 = vsel %vm535_vm11, %v612_v10, %v532_v16 }
 0x330   :  { %v541_v19 = vsel %vm538_vm12, %v540_v17, %v536_v18 }
 0x331   :  { %v542_v20 = vmul.f32 %v610_v7, %v541_v19 }
 0x333   :  { %v543_v21 = vperm.slane %v542_v20, 0 }
 0x335   :  { %544 = vst [vmem:[%s835_s2] sm:$0xff] %v543_v21 }

</bundles_post_ra>
